<compile_context>
chip_gen: v5e
topology: v5e:2x2
jax: 0.10.0
libtpu: 0.0.40
codegen_flags: <defaults>
</compile_context>

<pallas_src>
import jax
import jax.numpy as jnp
from jax.experimental import pallas as pl
from jax.experimental.pallas import tpu as pltpu


def _fused_kernel(gate_ref, w_ref, x_ref, o_ref):
    # gate_ref: (1, Cin) f32   w_ref: (Cout_blk, Cin) bf16
    # x_ref:    (Cin, HW) f32  o_ref: (Cout_blk, HW) f32
    g = jax.nn.sigmoid(gate_ref[...].astype(jnp.float32))            # EUP, lane-dense (1, Cin)
    # Fold the per-Cin gate into the weight columns (sublane broadcast on the VPU),
    # upcasting the bf16 weight in-register so the matmul runs fully in f32.
    w_scaled = w_ref[...].astype(jnp.float32) * g                    # (Cout_blk, Cin) f32
    o_ref[...] = jnp.dot(
        w_scaled, x_ref[...].astype(jnp.float32),
        preferred_element_type=jnp.float32,
    ).astype(o_ref.dtype)


def prepare_conv_weight(weight):
    """Convert the 1x1-conv weight to its persistent kernel layout ONCE (parameter-load time).

    weight: (Cout, Cin, 1, 1) f32  ->  (Cout, Cin) bf16
    """
    C_out, C_in = weight.shape[0], weight.shape[1]
    return weight.reshape(C_out, C_in).astype(jnp.bfloat16)


def sigmoid_mul_conv1x1(x680, x676, w_bf16):
    """x680: (N,Cin,1,1), x676: (N,Cin,H,W), w_bf16: (Cout,Cin) bf16 -> (N,Cout,H,W)."""
    N, C_in, H, W = x676.shape
    C_out = w_bf16.shape[0]
    assert N == 1, "gate broadcast implemented for N == 1 (as in the reference module)"
    assert C_out % 2 == 0 and (C_out // 2) % 8 == 0
    HW = H * W

    # Free views in native NCHW layout -- no jnp.transpose anywhere.
    x_mat = x676.reshape(C_in, HW)     # (Cin, HW)    f32
    gate = x680.reshape(1, C_in)       # (1, Cin)     f32, lane-dense

    half = C_out // 2

    cost = pl.CostEstimate(
        flops=2 * C_out * C_in * HW,
        transcendentals=C_in,
        bytes_accessed=(gate.size * 4 + x_mat.size * 4 + w_bf16.size * 2 + C_out * HW * 4),
    )

    out_mat = pl.pallas_call(
        _fused_kernel,
        out_shape=jax.ShapeDtypeStruct((C_out, HW), x676.dtype),
        grid=(2,),  # split Cout across the two v7x TensorCores; cheap no-op on v5e/v6e
        in_specs=[
            pl.BlockSpec((1, C_in), lambda i: (0, 0)),        # gate: full extent
            pl.BlockSpec((half, C_in), lambda i: (i, 0)),     # weight: half the rows per step
            pl.BlockSpec((C_in, HW), lambda i: (0, 0)),       # X: full extent
        ],
        out_specs=pl.BlockSpec((half, HW), lambda i: (i, 0)),
        compiler_params=pltpu.CompilerParams(
            dimension_semantics=("parallel",),
        ),
        cost_estimate=cost,
    )(gate, w_bf16, x_mat)

    return out_mat.reshape(N, C_out, H, W)  # view


if __name__ == "__main__":
    key = jax.random.PRNGKey(0)
    k1, k2, k3 = jax.random.split(key, 3)

    N, C_in, H, W, C_out = 1, 1824, 7, 7, 304

    x676 = jax.random.normal(k1, (N, C_in, H, W), dtype=jnp.float32)
    x680 = jax.random.normal(k2, (N, C_in, 1, 1), dtype=jnp.float32)
    # Deterministic synthetic conv weight (kaiming-ish scale), kernel size 1x1, no bias.
    weight = jax.random.normal(k3, (C_out, C_in, 1, 1), dtype=jnp.float32) * (1.0 / jnp.sqrt(C_in))

    # One-time parameter conversion (outside the hot path): f32 -> bf16 kernel layout.
    w_bf16 = jax.block_until_ready(prepare_conv_weight(weight))

    out = jax.block_until_ready(sigmoid_mul_conv1x1(x680, x676, w_bf16))
    assert out.shape == (N, C_out, H, W), out.shape

    # Pure-JAX f32 reference of the fused semantics.  The kernel stores the weight in bf16
    # (activations and accumulation stay f32), so tolerance reflects the bf16 weight mantissa
    # over a K=1824 contraction (expected max abs error ~few e-3 vs output std ~0.5).
    gated = jax.nn.sigmoid(x680) * x676
    ref = jnp.einsum("nchw,oc->nohw", gated, weight.reshape(C_out, C_in))
    err = float(jnp.max(jnp.abs(out - ref)))
    assert jnp.allclose(out, ref, atol=2e-2, rtol=2e-2), err

    print("KERNEL_OK")
</pallas_src>

<mosaic_0001>
module attributes {stable_mosaic.version = 11 : i64} {
  func.func @_fused_kernel(%arg0: i32, %arg1: memref<1x1824xf32, #tpu.memory_space<vmem>>, %arg2: memref<152x1824xbf16, #tpu.memory_space<vmem>>, %arg3: memref<1824x49xf32, #tpu.memory_space<vmem>>, %arg4: memref<152x49xf32, #tpu.memory_space<vmem>>) attributes {dimension_semantics = [#tpu.dimension_semantics<parallel>], iteration_bounds = array<i64: 2>, scalar_prefetch = 0 : i64, scratch_operands = 0 : i64, tpu.core_type = #tpu.core_type<tc>, window_params = [{pipeline_mode = #tpu.pipeline_mode<synchronous>, transform_indices = @transform_0, window_bounds = array<i64: 1, 1824>}, {transform_indices = @transform_1, window_bounds = array<i64: 152, 1824>}, {pipeline_mode = #tpu.pipeline_mode<synchronous>, transform_indices = @transform_2, window_bounds = array<i64: 1824, 49>}, {transform_indices = @transform_3, window_bounds = array<i64: 152, 49>}]} {
    %c0 = arith.constant 0 : index
    %c0_0 = arith.constant 0 : index
    %0 = vector.load %arg1[%c0, %c0_0] : memref<1x1824xf32, #tpu.memory_space<vmem>>, vector<1x1824xf32>
    %1 = arith.negf %0 : vector<1x1824xf32>
    %2 = math.exp %1 : vector<1x1824xf32>
    %cst = arith.constant 1.000000e+00 : f32
    %3 = vector.broadcast %cst : f32 to vector<1x1824xf32>
    %4 = arith.addf %3, %2 : vector<1x1824xf32>
    %5 = arith.divf %3, %4 : vector<1x1824xf32>
    %c0_1 = arith.constant 0 : index
    %c0_2 = arith.constant 0 : index
    %6 = vector.load %arg2[%c0_1, %c0_2] : memref<152x1824xbf16, #tpu.memory_space<vmem>>, vector<152x1824xbf16>
    %7 = arith.extf %6 : vector<152x1824xbf16> to vector<152x1824xf32>
    %8 = vector.broadcast %5 : vector<1x1824xf32> to vector<152x1824xf32>
    %9 = arith.mulf %7, %8 : vector<152x1824xf32>
    %c0_3 = arith.constant 0 : index
    %c0_4 = arith.constant 0 : index
    %10 = vector.load %arg3[%c0_3, %c0_4] : memref<1824x49xf32, #tpu.memory_space<vmem>>, vector<1824x49xf32>
    %cst_5 = arith.constant dense<0.000000e+00> : vector<152x49xf32>
    %11 = tpu.matmul %9, %10, %cst_5 {dimension_numbers = #tpu.dot_dimension_numbers<[1], [0], [0], [1], [0, 0, 1, 1], [], []>} : vector<152x1824xf32>, vector<1824x49xf32>, vector<152x49xf32> -> vector<152x49xf32>
    %c0_6 = arith.constant 0 : index
    %c0_7 = arith.constant 0 : index
    %12 = vector.load %arg4[%c0_6, %c0_7] : memref<152x49xf32, #tpu.memory_space<vmem>>, vector<152x49xf32>
    tpu.vector_store %arg4[%c0_6, %c0_7], %11 {strides = array<i32>} : memref<152x49xf32, #tpu.memory_space<vmem>>, vector<152x49xf32>,
    return
  }
  func.func @transform_0(%arg0: i32) -> (i32, i32) {
    %c0_i32 = arith.constant 0 : i32
    %c0_i32_0 = arith.constant 0 : i32
    %c0_i32_1 = arith.constant 0 : i32
    return %c0_i32, %c0_i32_0 : i32, i32
  }
  func.func @transform_1(%arg0: i32) -> (i32, i32) {
    %c0_i32 = arith.constant 0 : i32
    %c0_i32_0 = arith.constant 0 : i32
    return %arg0, %c0_i32 : i32, i32
  }
  func.func @transform_2(%arg0: i32) -> (i32, i32) {
    %c0_i32 = arith.constant 0 : i32
    %c0_i32_0 = arith.constant 0 : i32
    %c0_i32_1 = arith.constant 0 : i32
    return %c0_i32, %c0_i32_0 : i32, i32
  }
  func.func @transform_3(%arg0: i32) -> (i32, i32) {
    %c0_i32 = arith.constant 0 : i32
    %c0_i32_0 = arith.constant 0 : i32
    return %arg0, %c0_i32 : i32, i32
  }
}

</mosaic_0001>

<bundles_post_ra>
// kernel: tpu_custom_call.1
= control target key start
LH: loop header
LB: loop body
LE: loop exit
PB: predicated region body
PF: predicated region fallthrough
CT: control target
= control target key end

     0   :  { %s2589_s12 = smov 0   ;;  %s4724_s0 = inlined_call_operand.vmem [shape: f32[1,1824], index: 0, kind: input, shape index: {}]   ;;  %s4725_s1 = inlined_call_operand.vmem [shape: bf16[304,1824], index: 1, kind: input, shape index: {}]   ;;  %s4726_s2 = inlined_call_operand.vmem [shape: f32[1824,49], index: 2, kind: input, shape index: {}]   ;;  %s4727_s3 = inlined_call_operand.vmem [shape: f32[304,49], index: 3, kind: output, shape index: {}]  }
   0x1 LB: > { %s2443_s13 = sadd.s32 4294967295, %s2567_s12   ;;  %p2447_p0 = scmp.ge.s32.totalorder %s2567_s12, 1  ;;  %s2567_s12 = sphi %s2589_s12, %s13_s12  }
   0x2   : > { %p139_p1 = scmp.lt.s32.totalorder %s2567_s12, 3 }
   0x4   : > { %p140_p2 = pnand %p2447_p0, %p139_p1 }
   0x6   : > { %143 = sbr.rel (%p140_p2) target bundleno = 766 (0x2fe), region = 32 }
   0xb   : > { %v986_v0 = vld [vmem:[%s4726_s2 + $0x78] sm:$0xff]  ;;  %v985_v1 = vld [vmem:[%s4726_s2 + $0x70] sm:$0xff]  ;;  %v984_v4 = vld [vmem:[%s4726_s2 + $0x68] sm:$0xff]  ;;  %s2747_s26 = smul.u32 19, %s2443_s13  ;;  %vm1199_vm8 = vcmask 261120   ;;  %vm2367_vm9 = vcmask 400384  }
   0xc   : > { %v2606_v2 = vld [vmem:[%s4726_s2 + $0x178] sm:$0xff]  ;;  %1257 = vmatpush.msra.mxu0 %v986_v0  ;;  %2473 = vmatpush.msra.mxu3 %v986_v0  ;;  %v2611_v3 = vld [vmem:[%s4726_s2 + $0x170] sm:$0xff]  ;;  %v2625_v6 = vld [vmem:[%s4726_s2 + $0x168] sm:$0xff] }
   0xd   : > { %2505 = vmatpush.msra.mxu2 %v2606_v2  ;;  %v2620_v5 = vld [vmem:[%s4726_s2 + $0xf8] sm:$0xff]  ;;  %v2630_v7 = vld [vmem:[%s4726_s2 + $0xf0] sm:$0xff]  ;;  %v983_v8 = vld [vmem:[%s4726_s2 + $0x60] sm:$0xff]  ;;  %p165_p3 = scmp.lt.s32.totalorder %s2747_s26, 37 }
   0xe   : > { %1258 = vmatpush.msra.mxu0 %v985_v1  ;;  %2474 = vmatpush.msra.mxu3 %v985_v1  ;;  %v2640_v9 = vld [vmem:[%s4726_s2 + $0x160] sm:$0xff]  ;;  %v2645_v10 = vld [vmem:[%s4726_s2 + $0xe8] sm:$0xff]  ;;  %v982_v11 = vld [vmem:[%s4726_s2 + $0x58] sm:$0xff] }
   0xf   : > { %2506 = vmatpush.msra.mxu2 %v2611_v3  ;;  %2489 = vmatpush.msra.mxu1 %v2620_v5  ;;  %v2655_v12 = vld [vmem:[%s4726_s2 + $0x158] sm:$0xff]  ;;  %v2660_v13 = vld [vmem:[%s4726_s2 + $0xe0] sm:$0xff]  ;;  %v981_v14 = vld [vmem:[%s4726_s2 + $0x50] sm:$0xff]  ;;  %s4734_s26 = smov (!%p165_p3, %s2747_s26), 37 }
  0x10   : > { %1259 = vmatpush.msra.mxu0 %v984_v4  ;;  %2475 = vmatpush.msra.mxu3 %v984_v4  ;;  %v2670_v15 = vld [vmem:[%s4726_s2 + $0x150] sm:$0xff]  ;;  %v2675_v16 = vld [vmem:[%s4726_s2 + $0xd8] sm:$0xff]  ;;  %v980_v17 = vld [vmem:[%s4726_s2 + $0x48] sm:$0xff]  ;;  %s2521_s6 = smul.u32 60, %s4734_s26  ;;  %s2449_s17 = sshll.u32 %s4734_s26, 3 }
  0x11   : > { %2507 = vmatpush.msra.mxu2 %v2625_v6  ;;  %2490 = vmatpush.msra.mxu1 %v2630_v7  ;;  %v2685_v18 = vld [vmem:[%s4726_s2 + $0x148] sm:$0xff]  ;;  %v2690_v19 = vld [vmem:[%s4726_s2 + $0xd0] sm:$0xff]  ;;  %v979_v20 = vld [vmem:[%s4726_s2 + $0x40] sm:$0xff]  ;;  %s4655_s20 = scalar_lea.vmem %s4727_s3, %s2449_s17 }
  0x12   : > { %1260 = vmatpush.msra.mxu0 %v983_v8  ;;  %2476 = vmatpush.msra.mxu3 %v983_v8  ;;  %v2700_v21 = vld [vmem:[%s4726_s2 + $0x140] sm:$0xff]  ;;  %v2705_v22 = vld [vmem:[%s4726_s2 + $0xc8] sm:$0xff]  ;;  %v978_v23 = vld [vmem:[%s4726_s2 + $0x38] sm:$0xff]  ;;  %s2870_s23 = scalar_lea.vmem %s4725_s1, %s2521_s6 }
  0x13   : > { %2508 = vmatpush.msra.mxu2 %v2640_v9  ;;  %2491 = vmatpush.msra.mxu1 %v2645_v10  ;;  %v177_v24 = vld [vmem:[%s4724_s0] sm:$0xff]  ;;  %v2718_v25 = vld [vmem:[%s4726_s2 + $0x138] sm:$0xff]  ;;  %v977_v28 = vld [vmem:[%s4726_s2 + $0x30] sm:$0xff] }
  0x14   : > { %1261 = vmatpush.msra.mxu0 %v982_v11  ;;  %2477 = vmatpush.msra.mxu3 %v982_v11  ;;  %v2723_v26 = vld [vmem:[%s4726_s2 + $0xc0] sm:$0xff]  ;;  %v2450_v27 = vmul.f32 -1.442695, %v177_v24  ;;  %v2733_v29 = vld [vmem:[%s4726_s2 + $0x130] sm:$0xff]  ;;  %v2738_v30 = vld [vmem:[%s4726_s2 + $0xb8] sm:$0xff] }
  0x15   : > { %2509 = vmatpush.msra.mxu2 %v2655_v12  ;;  %2492 = vmatpush.msra.mxu1 %v2660_v13  ;;  %v976_v31 = vld [vmem:[%s4726_s2 + $0x28] sm:$0xff]  ;;  %v2757_v33 = vld [vmem:[%s4726_s2 + $0xb0] sm:$0xff]  ;;  %v975_v34 = vld [vmem:[%s4726_s2 + $0x20] sm:$0xff] }
  0x16   : > { %1262 = vmatpush.msra.mxu0 %v981_v14  ;;  %2478 = vmatpush.msra.mxu3 %v981_v14  ;;  %2530 = vpow2.f32 %v2450_v27  ;;  %v2752_v32 = vld [vmem:[%s4726_s2 + $0x128] sm:$0xff]  ;;  %v2767_v35 = vld [vmem:[%s4726_s2 + $0x120] sm:$0xff]  ;;  %v974_v37 = vld [vmem:[%s4726_s2 + $0x18] sm:$0xff] }
  0x17   : > { %2510 = vmatpush.msra.mxu2 %v2670_v15  ;;  %2493 = vmatpush.msra.mxu1 %v2675_v16  ;;  %v2772_v36 = vld [vmem:[%s4726_s2 + $0xa8] sm:$0xff]  ;;  %v2783_v39 = vld [vmem:[%s4726_s2 + $0x118] sm:$0xff]  ;;  %v2788_v40 = vld [vmem:[%s4726_s2 + $0xa0] sm:$0xff] }
  0x18   : > { %1263 = vmatpush.msra.mxu0 %v980_v17  ;;  %2479 = vmatpush.msra.mxu3 %v980_v17  ;;  %v973_v41 = vld [vmem:[%s4726_s2 + $0x10] sm:$0xff]  ;;  %v2805_v44 = vld [vmem:[%s4726_s2 + $0x98] sm:$0xff]  ;;  %v972_v45 = vld [vmem:[%s4726_s2 + $0x8] sm:$0xff] }
  0x19   : > { %2511 = vmatpush.msra.mxu2 %v2685_v18  ;;  %2494 = vmatpush.msra.mxu1 %v2690_v19  ;;  %v2800_v43 = vld [vmem:[%s4726_s2 + $0x110] sm:$0xff]  ;;  %v2821_v46 = vld [vmem:[%s4726_s2 + $0x108] sm:$0xff]  ;;  %v971_v48 = vld [vmem:[%s4726_s2] sm:$0xff] }
  0x1a   : > { %1264 = vmatpush.msra.mxu0 %v979_v20  ;;  %2480 = vmatpush.msra.mxu3 %v979_v20  ;;  %v2826_v47 = vld [vmem:[%s4726_s2 + $0x90] sm:$0xff]  ;;  %v1034_v49 = vld [vmem:[%s4726_s2 + $0x1f8] sm:$0xff]  ;;  %v2842_v50 = vld [vmem:[%s4726_s2 + $0x100] sm:$0xff] }
  0x1b   : > { %2512 = vmatpush.msra.mxu2 %v2700_v21  ;;  %2495 = vmatpush.msra.mxu1 %v2705_v22  ;;  %v2847_v51 = vld [vmem:[%s4726_s2 + $0x88] sm:$0xff]  ;;  %v1082_v52 = vld [vmem:[%s4726_s2 + $0x378] sm:$0xff]  ;;  %v2856_v54 = vld [vmem:[%s4726_s2 + $0x80] sm:$0xff] }
  0x1c   : > { %1265 = vmatpush.msra.mxu0 %v978_v23  ;;  %2481 = vmatpush.msra.mxu3 %v978_v23  ;;  %v2531_v38 = vpop.eup %2530  ;;  %v1033_v55 = vld [vmem:[%s4726_s2 + $0x1f0] sm:$0xff]  ;;  %v1066_v57 = vld [vmem:[%s4726_s2 + $0x2f8] sm:$0xff]  ;;  %v1032_v60 = vld [vmem:[%s4726_s2 + $0x1e8] sm:$0xff] }
  0x1d   : > { %2513 = vmatpush.msra.mxu2 %v2718_v25  ;;  %2496 = vmatpush.msra.mxu1 %v2723_v26  ;;  %v2795_v42 = vadd.f32 1.0, %v2531_v38  ;;  %v1081_v59 = vld [vmem:[%s4726_s2 + $0x370] sm:$0xff]  ;;  %v1080_v0 = vld [vmem:[%s4726_s2 + $0x368] sm:$0xff]  ;;  %v1031_v1 = vld [vmem:[%s4726_s2 + $0x1e0] sm:$0xff] }
  0x1e   : > { %1266 = vmatpush.msra.mxu0 %v977_v28  ;;  %2482 = vmatpush.msra.mxu3 %v977_v28  ;;  %v1065_v63 = vld [vmem:[%s4726_s2 + $0x2f0] sm:$0xff]  ;;  %v2902_v11 = vld [vmem:[%s2870_s23 + $0xf8] sm:$0xff]  ;;  %v1064_v17 = vld [vmem:[%s4726_s2 + $0x2e8] sm:$0xff] }
  0x1f   : > { %2514 = vmatpush.msra.mxu2 %v2733_v29  ;;  %2497 = vmatpush.msra.mxu1 %v2738_v30  ;;  %2532 = vrcp.f32 %v2795_v42  ;;  %v198_v58 = vand.u32 2147483648, %v2795_v42  ;;  %vm192_vm0 = vweird.f32 %v2795_v42  ;;  %v196_v62 = vand.u32 2147483647, %v2795_v42  ;;  %v1030_v23 = vld [vmem:[%s4726_s2 + $0x1d8] sm:$0xff] }
  0x20   : > { %1267 = vmatpush.msra.mxu0 %v976_v31  ;;  %2483 = vmatpush.msra.mxu3 %v976_v31  ;;  %v431_v28 = vunpack.c.l.bf16 %v2902_v11 }
  0x21   : > { %2515 = vmatpush.msra.mxu2 %v2752_v32  ;;  %2498 = vmatpush.msra.mxu1 %v2757_v33  ;;  %v199_v8 = vor.u32 1.1754944e-38, %v198_v58  ;;  %vm197_vm3 = vcmp.eq.f32.partialorder %v196_v62, 8.507059e+37  ;;  %v1029_v58 = vld [vmem:[%s4726_s2 + $0x1d0] sm:$0xff] }
  0x22   : > { %1268 = vmatpush.msra.mxu0 %v975_v34  ;;  %2484 = vmatpush.msra.mxu3 %v975_v34 }
  0x23   : > { %2516 = vmatpush.msra.mxu2 %v2767_v35  ;;  %2499 = vmatpush.msra.mxu1 %v2772_v36 }
  0x24   : > { %1269 = vmatpush.msra.mxu0 %v974_v37  ;;  %2485 = vmatpush.msra.mxu3 %v974_v37 }
  0x25   : > { %2517 = vmatpush.msra.mxu2 %v2783_v39  ;;  %2500 = vmatpush.msra.mxu1 %v2788_v40  ;;  %v2533_v53 = vpop.eup %2532 }
  0x26   : > { %1270 = vmatpush.msra.mxu0 %v973_v41  ;;  %2486 = vmatpush.msra.mxu3 %v973_v41  ;;  %v188_v56 = vmul.f32 %v2533_v53, %v2795_v42  ;;  %vm193_vm1 = vweird.f32 %v2533_v53  ;;  %v2932_v41 = vld [vmem:[%s2870_s23 + $0x3c] sm:$0xff]  ;;  %v257_v42 = vld [vmem:[%s2870_s23 + $0x12c] sm:$0xff] }
  0x27   : > { %2518 = vmatpush.msra.mxu2 %v2800_v43  ;;  %2501 = vmatpush.msra.mxu1 %v2805_v44  ;;  %vm2896_vm2 = vmor %vm192_vm0, %vm193_vm1 }
  0x28   : > { %1271 = vmatpush.msra.mxu0 %v972_v45  ;;  %2487 = vmatpush.msra.mxu3 %v972_v45  ;;  %v189_v61 = vsub.f32 1.0, %v188_v56 }
  0x29   : > { %2519 = vmatpush.msra.mxu2 %v2821_v46  ;;  %2502 = vmatpush.msra.mxu1 %v2826_v47 }
  0x2a   : > { %1272 = vmatpush.msra.mxu0 %v971_v48  ;;  %2488 = vmatpush.msra.mxu3 %v971_v48  ;;  %v190_v4 = vmul.f32 %v2533_v53, %v189_v61 }
  0x2b   : > { %2520 = vmatpush.msra.mxu2 %v2842_v50  ;;  %2503 = vmatpush.msra.mxu1 %v2847_v51 }
  0x2c   : > { %1479 = vmatpush.msrb.mxu3 %v1034_v49  ;;  %1331 = vmatpush.msrb.mxu0 %v2620_v5  ;;  %v2894_v5 = vld [vmem:[%s2870_s23] sm:$0xff]  ;;  %v191_v14 = vadd.f32 %v2533_v53, %v190_v4 }
  0x2d   : > { %1701 = vmatpush.msrb.mxu2 %v1082_v52  ;;  %2504 = vmatpush.msra.mxu1 %v2856_v54  ;;  %v369_v20 = vunpack.c.l.bf16 %v2894_v5  ;;  %v2941_v52 = vld [vmem:[%s2870_s23 + $0x134] sm:$0xff] }
  0x2e   : > { %1332 = vmatpush.msrb.mxu0 %v2630_v7  ;;  %1480 = vmatpush.msrb.mxu3 %v1033_v55  ;;  %v195_v24 = vsel %vm2896_vm2, %v2533_v53, %v191_v14  ;;  %v384_v53 = vunpack.c.l.bf16 %v2932_v41  ;;  %v444_v55 = vunpack.c.l.bf16 %v257_v42  ;;  %v446_v56 = vunpack.c.l.bf16 %v2941_v52 }
  0x2f   : > { %1627 = vmatpush.msrb.mxu1 %v1066_v57  ;;  %1702 = vmatpush.msrb.mxu2 %v1081_v59  ;;  %v445_v57 = vunpack.c.h.bf16 %v257_v42 }
  0x30   : > { %1333 = vmatpush.msrb.mxu0 %v2645_v10  ;;  %1481 = vmatpush.msrb.mxu3 %v1032_v60  ;;  %v249_v10 = vld [vmem:[%s2870_s23 + $0xf0] sm:$0xff] }
  0x31   : > { %1628 = vmatpush.msrb.mxu1 %v1065_v63  ;;  %1703 = vmatpush.msrb.mxu2 %v1080_v0  ;;  %v429_v27 = vunpack.c.l.bf16 %v249_v10  ;;  %v430_v31 = vunpack.c.h.bf16 %v249_v10  ;;  %v2962_v63 = vld [vmem:[%s2870_s23 + $0x78] sm:$0xff]  ;;  %v265_v0 = vld [vmem:[%s2870_s23 + $0x168] sm:$0xff] }
  0x32   : > { %1334 = vmatpush.msrb.mxu0 %v2660_v13  ;;  %1482 = vmatpush.msrb.mxu3 %v1031_v1  ;;  %v1079_v13 = vld [vmem:[%s4726_s2 + $0x360] sm:$0xff]  ;;  %v2966_v1 = vld [vmem:[%s2870_s23 + $0x170] sm:$0xff]  ;;  %v459_v4 = vunpack.c.l.bf16 %v265_v0  ;;  %v1028_v10 = vld [vmem:[%s4726_s2 + $0x1c8] sm:$0xff] }
  0x33   : > { %1629 = vmatpush.msrb.mxu1 %v1064_v17  ;;  %1704 = vmatpush.msrb.mxu2 %v1079_v13  ;;  %v461_v7 = vunpack.c.l.bf16 %v2966_v1 }
  0x34   : > { %1335 = vmatpush.msrb.mxu0 %v2675_v16  ;;  %1483 = vmatpush.msrb.mxu3 %v1030_v23  ;;  %v2919_v16 = vsel %vm197_vm3, %v199_v8, %v195_v24  ;;  %v460_v8 = vunpack.c.h.bf16 %v265_v0  ;;  %v2987_v23 = vld [vmem:[%s2870_s23 + $0xb4] sm:$0xff]  ;;  %v273_v24 = vld [vmem:[%s2870_s23 + $0x1a4] sm:$0xff] }
  0x35   : > { %v2923_v34 = vperm.slane %v2919_v16, 0  ;;  %v2926_v37 = vperm.slane %v2919_v16, 2  ;;  %v2929_v38 = vperm.slane %v2919_v16, 1  ;;  %v475_v42 = vunpack.c.h.bf16 %v273_v24 }
  0x36   : > { %1336 = vmatpush.msrb.mxu0 %v2690_v19  ;;  %1484 = vmatpush.msrb.mxu3 %v1029_v58 }
  0x37   : > { %v686_v45 = vmul.f32 %v2923_v34, %v369_v20  ;;  %v746_v48 = vmul.f32 %v2923_v34, %v429_v27  ;;  %v748_v19 = vmul.f32 %v2926_v37, %v431_v28  ;;  %v747_v49 = vmul.f32 %v2929_v38, %v430_v31  ;;  %v2991_v27 = vld [vmem:[%s2870_s23 + $0x1ac] sm:$0xff] }
  0x38   : > { %1337 = vmatpush.msrb.mxu0 %v2705_v22  ;;  %v1063_v22 = vld [vmem:[%s4726_s2 + $0x2e0] sm:$0xff]  ;;  %v701_v59 = vmul.f32 %v2923_v34, %v384_v53  ;;  %v761_v60 = vmul.f32 %v2923_v34, %v444_v55  ;;  %v763_v61 = vmul.f32 %v2926_v37, %v446_v56  ;;  %v762_v62 = vmul.f32 %v2929_v38, %v445_v57 }
  0x39   : > { %1273 = vmatmul.f32.vlgmr.msra.gmra.mxu0 %v686_v45  ;;  %1285 = vmatmul.f32.vlgmr.msra.gmra.mxu3 %v746_v48  ;;  %v776_v17 = vmul.f32 %v2923_v34, %v459_v4  ;;  %v778_v20 = vmul.f32 %v2926_v37, %v461_v7  ;;  %v777_v13 = vmul.f32 %v2929_v38, %v460_v8  ;;  %v474_v28 = vunpack.c.l.bf16 %v273_v24  ;;  %v1027_v45 = vld [vmem:[%s4726_s2 + $0x1c0] sm:$0xff]  ;;  %v1060_v48 = vld [vmem:[%s4726_s2 + $0x2c8] sm:$0xff]  ;;  %v1073_v24 = vld [vmem:[%s4726_s2 + $0x330] sm:$0xff] }
  0x3a   : > { %1338 = vmatpush.msrb.mxu0 %v2723_v26  ;;  %1433 = vmatmul.f32.vlgmr.msra.gmra.mxu2 %v748_v19  ;;  %v1078_v26 = vld [vmem:[%s4726_s2 + $0x358] sm:$0xff]  ;;  %v476_v31 = vunpack.c.l.bf16 %v2991_v27  ;;  %v792_v55 = vmul.f32 %v2929_v38, %v475_v42  ;;  %v370_v56 = vunpack.c.h.bf16 %v2894_v5  ;;  %v1059_v5 = vld [vmem:[%s4726_s2 + $0x2c0] sm:$0xff] }
  0x3b   : > { %1359 = vmatmul.f32.vlgmr.msra.gmra.mxu1 %v747_v49  ;;  %1705 = vmatpush.msrb.mxu2 %v1078_v26  ;;  %v791_v49 = vmul.f32 %v2923_v34, %v474_v28  ;;  %v305_v42 = vld [vmem:[%s2870_s23 + $0x294] sm:$0xff] }
  0x3c   : > { %1339 = vmatpush.msrb.mxu0 %v2738_v30  ;;  %1630 = vmatpush.msrb.mxu1 %v1063_v22  ;;  %v399_v30 = vunpack.c.l.bf16 %v2962_v63  ;;  %v793_v53 = vmul.f32 %v2926_v37, %v476_v31  ;;  %v281_v22 = vld [vmem:[%s2870_s23 + $0x1e0] sm:$0xff] }
  0x3d   : > { %1485 = vmatpush.msrb.mxu3 %v1028_v10  ;;  %v489_v57 = vunpack.c.l.bf16 %v281_v22  ;;  %v490_v26 = vunpack.c.h.bf16 %v281_v22  ;;  %v313_v22 = vld [vmem:[%s2870_s23 + $0x2d0] sm:$0xff] }
  0x3e   : > { %1340 = vmatpush.msrb.mxu0 %v2757_v33  ;;  %v1062_v33 = vld [vmem:[%s4726_s2 + $0x2d8] sm:$0xff]  ;;  %v716_v14 = vmul.f32 %v2923_v34, %v399_v30  ;;  %v385_v30 = vunpack.c.h.bf16 %v2932_v41 }
  0x3f   : > { %1631 = vmatpush.msrb.mxu1 %v1062_v33  ;;  %1486 = vmatpush.msrb.mxu3 %v1027_v45  ;;  %v806_v58 = vmul.f32 %v2923_v34, %v489_v57  ;;  %v1074_v33 = vld [vmem:[%s4726_s2 + $0x338] sm:$0xff]  ;;  %v415_v45 = vunpack.c.h.bf16 %v2987_v23 }
  0x40   : > { %1341 = vmatpush.msrb.mxu0 %v2772_v36  ;;  %v1077_v36 = vld [vmem:[%s4726_s2 + $0x350] sm:$0xff]  ;;  %v1058_v41 = vld [vmem:[%s4726_s2 + $0x2b8] sm:$0xff]  ;;  %v702_v8 = vmul.f32 %v2929_v38, %v385_v30 }
  0x41   : > { %1276 = vmatmul.f32.gmra.mxu0 %v701_v59  ;;  %1288 = vmatmul.f32.gmra.mxu3 %v761_v60  ;;  %v687_v59 = vmul.f32 %v2929_v38, %v370_v56  ;;  %v3104_v56 = vld [vmem:[%s2870_s23 + $0x8] sm:$0xff] }
  0x42   : > { %1436 = vmatmul.f32.gmra.mxu2 %v763_v61  ;;  %1342 = vmatpush.msrb.mxu0 %v2788_v40  ;;  %v414_v40 = vunpack.c.l.bf16 %v2987_v23  ;;  %v807_v61 = vmul.f32 %v2929_v38, %v490_v26  ;;  %v535_v23 = vunpack.c.h.bf16 %v305_v42  ;;  %v371_v26 = vunpack.c.l.bf16 %v3104_v56 }
  0x43   : > { %1362 = vmatmul.f32.gmra.mxu1 %v762_v62  ;;  %1706 = vmatpush.msrb.mxu2 %v1077_v36  ;;  %v289_v62 = vld [vmem:[%s2870_s23 + $0x21c] sm:$0xff] }
  0x44   : > { %1343 = vmatpush.msrb.mxu0 %v2805_v44  ;;  %v1061_v44 = vld [vmem:[%s4726_s2 + $0x2d0] sm:$0xff]  ;;  %v731_v19 = vmul.f32 %v2923_v34, %v414_v40  ;;  %v504_v0 = vunpack.c.l.bf16 %v289_v62  ;;  %v505_v4 = vunpack.c.h.bf16 %v289_v62  ;;  %v852_v57 = vmul.f32 %v2929_v38, %v535_v23 }
  0x45   : > { %1632 = vmatpush.msrb.mxu1 %v1061_v44 }
  0x46   : > { %1344 = vmatpush.msrb.mxu0 %v2826_v47  ;;  %v1076_v47 = vld [vmem:[%s4726_s2 + $0x348] sm:$0xff]  ;;  %v821_v7 = vmul.f32 %v2923_v34, %v504_v0  ;;  %v822_v10 = vmul.f32 %v2929_v38, %v505_v4  ;;  %v3133_v0 = vld [vmem:[%s2870_s23 + $0x314] sm:$0xff] }
  0x47   : > { %1707 = vmatpush.msrb.mxu2 %v1076_v47  ;;  %1633 = vmatpush.msrb.mxu1 %v1060_v48  ;;  %v534_v47 = vunpack.c.l.bf16 %v305_v42  ;;  %v1072_v48 = vld [vmem:[%s4726_s2 + $0x328] sm:$0xff]  ;;  %v1070_v4 = vld [vmem:[%s4726_s2 + $0x318] sm:$0xff] }
  0x48   : > { %1345 = vmatpush.msrb.mxu0 %v2847_v51  ;;  %v3017_v51 = vld [vmem:[%s2870_s23 + $0x1e8] sm:$0xff] }
  0x49   : > { %1279 = vmatmul.f32.gmra.mxu0 %v716_v14  ;;  %1291 = vmatmul.f32.gmra.mxu3 %v776_v17  ;;  %v297_v14 = vld [vmem:[%s2870_s23 + $0x258] sm:$0xff] }
  0x4a   : > { %1439 = vmatmul.f32.gmra.mxu2 %v778_v20  ;;  %1346 = vmatpush.msrb.mxu0 %v2856_v54  ;;  %v491_v54 = vunpack.c.l.bf16 %v3017_v51  ;;  %v519_v17 = vunpack.c.l.bf16 %v297_v14  ;;  %v400_v20 = vunpack.c.h.bf16 %v2962_v63  ;;  %v1057_v63 = vld [vmem:[%s4726_s2 + $0x2b0] sm:$0xff] }
  0x4b   : > { %1365 = vmatmul.f32.gmra.mxu1 %v777_v13 }
  0x4c   : > { %1405 = vmatpush.msra.mxu0 %v2606_v2  ;;  %v1075_v2 = vld [vmem:[%s4726_s2 + $0x340] sm:$0xff]  ;;  %1634 = vmatpush.msrb.mxu1 %v1059_v5  ;;  %v808_v60 = vmul.f32 %v2926_v37, %v491_v54  ;;  %v836_v40 = vmul.f32 %v2923_v34, %v519_v17  ;;  %v717_v28 = vmul.f32 %v2929_v38, %v400_v20  ;;  %v549_v54 = vunpack.c.l.bf16 %v313_v22 }
  0x4d   : > { %1708 = vmatpush.msrb.mxu2 %v1075_v2  ;;  %v1022_v2 = vld [vmem:[%s4726_s2 + $0x198] sm:$0xff]  ;;  %v550_v5 = vunpack.c.h.bf16 %v313_v22  ;;  %v1047_v17 = vld [vmem:[%s4726_s2 + $0x260] sm:$0xff] }
  0x4e   : > { %1406 = vmatpush.msra.mxu0 %v2611_v3  ;;  %v1026_v3 = vld [vmem:[%s4726_s2 + $0x1b8] sm:$0xff]  ;;  %1635 = vmatpush.msrb.mxu1 %v1058_v41  ;;  %v1049_v41 = vld [vmem:[%s4726_s2 + $0x270] sm:$0xff] }
  0x4f   : > { %1487 = vmatpush.msrb.mxu3 %v1026_v3  ;;  %1709 = vmatpush.msrb.mxu2 %v1074_v33  ;;  %v1055_v3 = vld [vmem:[%s4726_s2 + $0x2a0] sm:$0xff]  ;;  %v867_v62 = vmul.f32 %v2929_v38, %v550_v5  ;;  %v566_v33 = vunpack.c.l.bf16 %v3133_v0  ;;  %v1041_v5 = vld [vmem:[%s4726_s2 + $0x230] sm:$0xff] }
  0x50   : > { %1407 = vmatpush.msra.mxu0 %v2625_v6  ;;  %v3040_v6 = vld [vmem:[%s2870_s23 + $0x224] sm:$0xff]  ;;  %1636 = vmatpush.msrb.mxu1 %v1057_v63  ;;  %v3200_v22 = vld [vmem:[%s2870_s23 + $0xbc] sm:$0xff] }
  0x51   : > { %1282 = vmatmul.f32.gmra.mxu0 %v731_v19  ;;  %1294 = vmatmul.f32.gmra.mxu3 %v791_v49  ;;  %v1056_v19 = vld [vmem:[%s4726_s2 + $0x2a8] sm:$0xff]  ;;  %v851_v49 = vmul.f32 %v2923_v34, %v534_v47  ;;  %v883_v20 = vmul.f32 %v2926_v37, %v566_v33  ;;  %v1045_v47 = vld [vmem:[%s4726_s2 + $0x250] sm:$0xff] }
  0x52   : > { %1442 = vmatmul.f32.gmra.mxu2 %v793_v53  ;;  %1408 = vmatpush.msra.mxu0 %v2640_v9  ;;  %v506_v9 = vunpack.c.l.bf16 %v3040_v6  ;;  %v732_v53 = vmul.f32 %v2929_v38, %v415_v45  ;;  %v1053_v45 = vld [vmem:[%s4726_s2 + $0x290] sm:$0xff] }
  0x53   : > { %1368 = vmatmul.f32.gmra.mxu1 %v792_v55  ;;  %1710 = vmatpush.msrb.mxu2 %v1073_v24 }
  0x54   : > { %1409 = vmatpush.msra.mxu0 %v2655_v12  ;;  %v1025_v12 = vld [vmem:[%s4726_s2 + $0x1b0] sm:$0xff]  ;;  %v823_v36 = vmul.f32 %v2926_v37, %v506_v9  ;;  %1637 = vmatpush.msrb.mxu1 %v1056_v19  ;;  %v1050_v9 = vld [vmem:[%s4726_s2 + $0x278] sm:$0xff] }
  0x55   : > { %1488 = vmatpush.msrb.mxu3 %v1025_v12  ;;  %1711 = vmatpush.msrb.mxu2 %v1072_v48  ;;  %v1021_v12 = vld [vmem:[%s4726_s2 + $0x190] sm:$0xff] }
  0x56   : > { %1410 = vmatpush.msra.mxu0 %v2670_v15  ;;  %v3062_v15 = vld [vmem:[%s2870_s23 + $0x260] sm:$0xff]  ;;  %1638 = vmatpush.msrb.mxu1 %v1055_v3 }
  0x57   : > { %v521_v13 = vunpack.c.l.bf16 %v3062_v15 }
  0x58   : > { %1411 = vmatpush.msra.mxu0 %v2685_v18  ;;  %v520_v18 = vunpack.c.h.bf16 %v297_v14 }
  0x59   : > { %1297 = vmatmul.f32.gmra.mxu3 %v806_v58  ;;  %1347 = vmatmul.f32.vlgmr.msrb.gmra.mxu0 %v687_v59  ;;  %v838_v44 = vmul.f32 %v2926_v37, %v521_v13  ;;  %v866_v58 = vmul.f32 %v2923_v34, %v549_v54  ;;  %v329_v13 = vld [vmem:[%s2870_s23 + $0x348] sm:$0xff] }
  0x5a   : > { %1445 = vmatmul.f32.gmra.mxu2 %v808_v60  ;;  %1412 = vmatpush.msra.mxu0 %v2700_v21  ;;  %v1024_v21 = vld [vmem:[%s4726_s2 + $0x1a8] sm:$0xff]  ;;  %v837_v31 = vmul.f32 %v2929_v38, %v520_v18  ;;  %v3163_v18 = vld [vmem:[%s2870_s23 + $0x80] sm:$0xff]  ;;  %v579_v63 = vunpack.c.l.bf16 %v329_v13  ;;  %v580_v48 = vunpack.c.h.bf16 %v329_v13  ;;  %v3254_v13 = vld [vmem:[%s2870_s23 + $0x10] sm:$0xff] }
  0x5b   : > { %1371 = vmatmul.f32.gmra.mxu1 %v807_v61  ;;  %1489 = vmatpush.msrb.mxu3 %v1024_v21  ;;  %v321_v60 = vld [vmem:[%s2870_s23 + $0x30c] sm:$0xff]  ;;  %v3129_v61 = vld [vmem:[%s2870_s23 + $0x44] sm:$0xff] }
  0x5c   : > { %1413 = vmatpush.msra.mxu0 %v2718_v25  ;;  %v3084_v25 = vld [vmem:[%s2870_s23 + $0x29c] sm:$0xff]  ;;  %v564_v30 = vunpack.c.l.bf16 %v321_v60  ;;  %v3167_v21 = vld [vmem:[%s2870_s23 + $0x350] sm:$0xff]  ;;  %v896_v19 = vmul.f32 %v2923_v34, %v579_v63  ;;  %v373_v63 = vunpack.c.l.bf16 %v3254_v13 }
  0x5d   : > { %v581_v42 = vunpack.c.l.bf16 %v3167_v21  ;;  %v3204_v54 = vld [vmem:[%s2870_s23 + $0x38c] sm:$0xff] }
  0x5e   : > { %1414 = vmatpush.msra.mxu0 %v2733_v29  ;;  %v536_v29 = vunpack.c.l.bf16 %v3084_v25  ;;  %v596_v3 = vunpack.c.l.bf16 %v3204_v54 }
  0x60   : > { %1415 = vmatpush.msra.mxu0 %v2752_v32  ;;  %v1023_v32 = vld [vmem:[%s4726_s2 + $0x1a0] sm:$0xff]  ;;  %v853_v55 = vmul.f32 %v2926_v37, %v536_v29  ;;  %v1044_v29 = vld [vmem:[%s4726_s2 + $0x248] sm:$0xff] }
  0x61   : > { %1300 = vmatmul.f32.gmra.mxu3 %v821_v7  ;;  %1350 = vmatmul.f32.gmra.mxu0 %v702_v8  ;;  %v565_v7 = vunpack.c.h.bf16 %v321_v60  ;;  %v1048_v8 = vld [vmem:[%s4726_s2 + $0x268] sm:$0xff]  ;;  %v1067_v60 = vld [vmem:[%s4726_s2 + $0x300] sm:$0xff] }
  0x62   : > { %1448 = vmatmul.f32.gmra.mxu2 %v823_v36  ;;  %1416 = vmatpush.msra.mxu0 %v2767_v35  ;;  %v3109_v35 = vld [vmem:[%s2870_s23 + $0x2d8] sm:$0xff] }
  0x63   : > { %1374 = vmatmul.f32.gmra.mxu1 %v822_v10  ;;  %1490 = vmatpush.msrb.mxu3 %v1023_v32  ;;  %v1054_v36 = vld [vmem:[%s4726_s2 + $0x298] sm:$0xff]  ;;  %v881_v10 = vmul.f32 %v2923_v34, %v564_v30  ;;  %v882_v24 = vmul.f32 %v2929_v38, %v565_v7  ;;  %v1068_v32 = vld [vmem:[%s4726_s2 + $0x308] sm:$0xff] }
  0x64   : > { %1417 = vmatpush.msra.mxu0 %v2783_v39  ;;  %v1071_v39 = vld [vmem:[%s4726_s2 + $0x320] sm:$0xff]  ;;  %1639 = vmatpush.msrb.mxu1 %v1054_v36  ;;  %v1038_v7 = vld [vmem:[%s4726_s2 + $0x218] sm:$0xff]  ;;  %v1037_v36 = vld [vmem:[%s4726_s2 + $0x210] sm:$0xff] }
  0x65   : > { %1712 = vmatpush.msrb.mxu2 %v1071_v39  ;;  %1491 = vmatpush.msrb.mxu3 %v1022_v2  ;;  %v416_v39 = vunpack.c.l.bf16 %v3200_v22  ;;  %v1019_v2 = vld [vmem:[%s4726_s2 + $0x180] sm:$0xff] }
  0x66   : > { %1418 = vmatpush.msra.mxu0 %v2800_v43  ;;  %v551_v43 = vunpack.c.l.bf16 %v3109_v35  ;;  %1640 = vmatpush.msrb.mxu1 %v1053_v45  ;;  %v354_v45 = vld [vmem:[%s2870_s23 + $0x404] sm:$0xff] }
  0x67   : > { %1713 = vmatpush.msrb.mxu2 %v1070_v4  ;;  %1492 = vmatpush.msrb.mxu3 %v1021_v12  ;;  %v733_v30 = vmul.f32 %v2926_v37, %v416_v39  ;;  %v345_v4 = vld [vmem:[%s2870_s23 + $0x3c0] sm:$0xff]  ;;  %v3235_v12 = vld [vmem:[%s2870_s23 + $0x3c8] sm:$0xff] }
  0x68   : > { %1419 = vmatpush.msra.mxu0 %v2821_v46  ;;  %v688_v46 = vmul.f32 %v2926_v37, %v371_v26  ;;  %v868_v59 = vmul.f32 %v2926_v37, %v551_v43  ;;  %v1042_v43 = vld [vmem:[%s4726_s2 + $0x238] sm:$0xff] }
  0x69   : > { %1303 = vmatmul.f32.gmra.mxu3 %v836_v40  ;;  %1353 = vmatmul.f32.gmra.mxu0 %v717_v28  ;;  %v401_v40 = vunpack.c.l.bf16 %v3163_v18  ;;  %v1046_v28 = vld [vmem:[%s4726_s2 + $0x258] sm:$0xff] }
  0x6a   : > { %1451 = vmatmul.f32.gmra.mxu2 %v838_v44  ;;  %1420 = vmatpush.msra.mxu0 %v2842_v50  ;;  %v386_v50 = vunpack.c.l.bf16 %v3129_v61  ;;  %v1069_v44 = vld [vmem:[%s4726_s2 + $0x310] sm:$0xff] }
  0x6b   : > { %1377 = vmatmul.f32.gmra.mxu1 %v837_v31  ;;  %v1020_v31 = vld [vmem:[%s4726_s2 + $0x188] sm:$0xff]  ;;  %1714 = vmatpush.msrb.mxu2 %v1069_v44  ;;  %v718_v23 = vmul.f32 %v2926_v37, %v401_v40  ;;  %v3259_v40 = vperm.slane %v2919_v16, 4  ;;  %v353_v44 = vld [vmem:[%s2870_s23 + $0x3fc] sm:$0xff] }
  0x6c   : > { %1553 = vmatpush.msrb.mxu0 %v1050_v9  ;;  %v703_v14 = vmul.f32 %v2926_v37, %v386_v50  ;;  %1493 = vmatpush.msrb.mxu3 %v1020_v31  ;;  %v1039_v50 = vld [vmem:[%s4726_s2 + $0x220] sm:$0xff]  ;;  %v913_v9 = vmul.f32 %v2926_v37, %v596_v3 }
  0x6d   : > { %1715 = vmatpush.msrb.mxu2 %v1068_v32  ;;  %v1035_v31 = vld [vmem:[%s4726_s2 + $0x200] sm:$0xff]  ;;  %v1114_v32 = vld [vmem:[%s4726_s2 + $0x478] sm:$0xff] }
  0x6e   : > { %1554 = vmatpush.msrb.mxu0 %v1049_v41  ;;  %1494 = vmatpush.msrb.mxu3 %v1019_v2  ;;  %v609_v41 = vunpack.c.l.bf16 %v345_v4  ;;  %v362_v3 = vld [vmem:[%s2870_s23 + $0x440] sm:$0xff] }
  0x6f   : > { %1716 = vmatpush.msrb.mxu2 %v1067_v60  ;;  %v641_v60 = vunpack.c.l.bf16 %v362_v3  ;;  %v1127_v3 = vld [vmem:[%s4726_s2 + $0x4e0] sm:$0xff] }
  0x70   : > { %1555 = vmatpush.msrb.mxu0 %v1048_v8  ;;  %v1098_v8 = vld [vmem:[%s4726_s2 + $0x3f8] sm:$0xff] }
  0x71   : > { %1306 = vmatmul.f32.gmra.mxu3 %v851_v49  ;;  %1356 = vmatmul.f32.gmra.mxu0 %v732_v53  ;;  %v1043_v49 = vld [vmem:[%s4726_s2 + $0x240] sm:$0xff]  ;;  %v898_v53 = vmul.f32 %v2926_v37, %v581_v42  ;;  %v1146_v42 = vld [vmem:[%s4726_s2 + $0x578] sm:$0xff] }
  0x72   : > { %1454 = vmatmul.f32.gmra.mxu2 %v853_v55  ;;  %1556 = vmatpush.msrb.mxu0 %v1047_v17  ;;  %v337_v55 = vld [vmem:[%s2870_s23 + $0x384] sm:$0xff]  ;;  %v610_v17 = vunpack.c.h.bf16 %v345_v4  ;;  %v1129_v4 = vld [vmem:[%s4726_s2 + $0x4f0] sm:$0xff] }
  0x73   : > { %1380 = vmatmul.f32.gmra.mxu1 %v852_v57  ;;  %v897_v57 = vmul.f32 %v2929_v38, %v580_v48  ;;  %v594_v26 = vunpack.c.l.bf16 %v337_v55  ;;  %1775 = vmatpush.msra.mxu3 %v1098_v8  ;;  %v690_v48 = vmul.f32 %v3259_v40, %v373_v63  ;;  %v220_v8 = vld [vmem:[%s2870_s23 + $0x18] sm:$0xff]  ;;  %v1112_v63 = vld [vmem:[%s4726_s2 + $0x468] sm:$0xff] }
  0x74   : > { %1557 = vmatpush.msrb.mxu0 %v1046_v28  ;;  %1997 = vmatpush.msra.mxu2 %v1146_v42  ;;  %v1095_v42 = vld [vmem:[%s4726_s2 + $0x3e0] sm:$0xff] }
  0x76   : > { %1558 = vmatpush.msrb.mxu0 %v1045_v47  ;;  %v927_v47 = vmul.f32 %v2929_v38, %v610_v17  ;;  %v3320_v17 = vperm.slane %v2919_v16, 6 }
  0x78   : > { %1559 = vmatpush.msrb.mxu0 %v1044_v29  ;;  %v624_v29 = vunpack.c.l.bf16 %v353_v44 }
  0x79   : > { %1309 = vmatmul.f32.gmra.mxu3 %v866_v58  ;;  %1421 = vmatmul.f32.vlgmr.msra.gmra.mxu0 %v688_v46  ;;  %v1052_v58 = vld [vmem:[%s4726_s2 + $0x288] sm:$0xff]  ;;  %v595_v46 = vunpack.c.h.bf16 %v337_v55 }
  0x7a   : > { %1457 = vmatmul.f32.gmra.mxu2 %v868_v59  ;;  %1560 = vmatpush.msrb.mxu0 %v1043_v49  ;;  %v1040_v59 = vld [vmem:[%s4726_s2 + $0x228] sm:$0xff]  ;;  %v626_v49 = vunpack.c.l.bf16 %v354_v45 }
  0x7b   : > { %1383 = vmatmul.f32.gmra.mxu1 %v867_v62  ;;  %v911_v62 = vmul.f32 %v2923_v34, %v594_v26  ;;  %v912_v33 = vmul.f32 %v2929_v38, %v595_v46  ;;  %v3282_v55 = vld [vmem:[%s2870_s23 + $0x4c] sm:$0xff] }
  0x7c   : > { %1561 = vmatpush.msrb.mxu0 %v1042_v43  ;;  %1641 = vmatpush.msrb.mxu1 %v1052_v58  ;;  %v388_v26 = vunpack.c.l.bf16 %v3282_v55  ;;  %v943_v39 = vmul.f32 %v2926_v37, %v626_v49  ;;  %v361_v43 = vld [vmem:[%s2870_s23 + $0x438] sm:$0xff]  ;;  %v1145_v46 = vld [vmem:[%s4726_s2 + $0x570] sm:$0xff]  ;;  %v1143_v49 = vld [vmem:[%s4726_s2 + $0x560] sm:$0xff] }
  0x7d   : > { %v639_v58 = vunpack.c.l.bf16 %v361_v43  ;;  %1998 = vmatpush.msra.mxu2 %v1145_v46 }
  0x7e   : > { %1562 = vmatpush.msrb.mxu0 %v1041_v5  ;;  %v705_v5 = vmul.f32 %v3259_v40, %v388_v26  ;;  %v236_v26 = vld [vmem:[%s2870_s23 + $0x90] sm:$0xff] }
  0x7f   : > { %v405_v46 = vunpack.c.l.bf16 %v236_v26  ;;  %v432_v26 = vunpack.c.h.bf16 %v2902_v11 }
  0x80   : > { %1563 = vmatpush.msrb.mxu0 %v1040_v59  ;;  %v1113_v59 = vld [vmem:[%s4726_s2 + $0x470] sm:$0xff] }
  0x81   : > { %1312 = vmatmul.f32.gmra.mxu3 %v881_v10  ;;  %1424 = vmatmul.f32.gmra.mxu0 %v703_v14  ;;  %v611_v10 = vunpack.c.l.bf16 %v3235_v12  ;;  %v1051_v14 = vld [vmem:[%s4726_s2 + $0x280] sm:$0xff] }
  0x82   : > { %1460 = vmatmul.f32.gmra.mxu2 %v883_v20  ;;  %1564 = vmatpush.msrb.mxu0 %v1039_v50  ;;  %v1036_v20 = vld [vmem:[%s4726_s2 + $0x208] sm:$0xff]  ;;  %v956_v50 = vmul.f32 %v2923_v34, %v639_v58  ;;  %v402_v58 = vunpack.c.h.bf16 %v3163_v18 }
  0x83   : > { %1386 = vmatmul.f32.gmra.mxu1 %v882_v24  ;;  %v926_v24 = vmul.f32 %v2923_v34, %v609_v41  ;;  %v928_v28 = vmul.f32 %v2926_v37, %v611_v10  ;;  %v958_v41 = vmul.f32 %v2926_v37, %v641_v60  ;;  %v3314_v10 = vperm.slane %v2919_v16, 3  ;;  %v1144_v37 = vld [vmem:[%s4726_s2 + $0x568] sm:$0xff] }
  0x84   : > { %1565 = vmatpush.msrb.mxu0 %v1038_v7  ;;  %1642 = vmatpush.msrb.mxu1 %v1051_v14  ;;  %v375_v14 = vunpack.c.l.bf16 %v220_v8 }
  0x85   : > { %1999 = vmatpush.msra.mxu2 %v1144_v37  ;;  %v1110_v37 = vld [vmem:[%s4726_s2 + $0x458] sm:$0xff] }
  0x86   : > { %1566 = vmatpush.msrb.mxu0 %v1037_v36  ;;  %v372_v36 = vunpack.c.h.bf16 %v3104_v56  ;;  %v3327_v56 = vld [vmem:[%s2870_s23 + $0xc4] sm:$0xff] }
  0x87   : > { %2000 = vmatpush.msra.mxu2 %v1143_v49  ;;  %v252_v49 = vld [vmem:[%s2870_s23 + $0x108] sm:$0xff] }
  0x88   : > { %1567 = vmatpush.msrb.mxu0 %v1036_v20  ;;  %v3324_v20 = vperm.slane %v2919_v16, 5 }
  0x89   : > { %1315 = vmatmul.f32.gmra.mxu3 %v896_v19  ;;  %1427 = vmatmul.f32.gmra.mxu0 %v718_v23  ;;  %v1097_v19 = vld [vmem:[%s4726_s2 + $0x3f0] sm:$0xff]  ;;  %v1130_v23 = vld [vmem:[%s4726_s2 + $0x4f8] sm:$0xff] }
  0x8a   : > { %1463 = vmatmul.f32.gmra.mxu2 %v898_v53  ;;  %1568 = vmatpush.msrb.mxu0 %v1035_v31  ;;  %v625_v53 = vunpack.c.h.bf16 %v353_v44  ;;  %v692_v44 = vmul.f32 %v3320_v17, %v375_v14  ;;  %v228_v31 = vld [vmem:[%s2870_s23 + $0x54] sm:$0xff] }
  0x8b   : > { %1389 = vmatmul.f32.gmra.mxu1 %v897_v57  ;;  %1776 = vmatpush.msra.mxu3 %v1097_v19  ;;  %v941_v57 = vmul.f32 %v2923_v34, %v624_v29  ;;  %v390_v29 = vunpack.c.l.bf16 %v228_v31  ;;  %v3347_v19 = vld [vmem:[%s2870_s23 + $0x100] sm:$0xff]  ;;  %v3399_v31 = vld [vmem:[%s2870_s23 + $0x178] sm:$0xff] }
  0x8c   : > { %1849 = vmatpush.msra.mxu0 %v1114_v32  ;;  %1923 = vmatpush.msra.mxu1 %v1130_v23  ;;  %v942_v2 = vmul.f32 %v2929_v38, %v625_v53  ;;  %v389_v32 = vunpack.c.h.bf16 %v3282_v55  ;;  %v433_v53 = vunpack.c.l.bf16 %v3347_v19  ;;  %v1111_v55 = vld [vmem:[%s4726_s2 + $0x460] sm:$0xff] }
  0x8e   : > { %1850 = vmatpush.msra.mxu0 %v1113_v59  ;;  %1924 = vmatpush.msra.mxu1 %v1129_v4  ;;  %v719_v4 = vmul.f32 %v3314_v10, %v402_v58 }
  0x90   : > { %1851 = vmatpush.msra.mxu0 %v1112_v63  ;;  %v1126_v63 = vld [vmem:[%s4726_s2 + $0x4d8] sm:$0xff] }
  0x91   : > { %1318 = vmatmul.f32.gmra.mxu3 %v911_v62  ;;  %1430 = vmatmul.f32.gmra.mxu0 %v733_v30  ;;  %v640_v62 = vunpack.c.h.bf16 %v361_v43  ;;  %v3298_v30 = vld [vmem:[%s2870_s23 + $0x88] sm:$0xff]  ;;  %v706_v43 = vmul.f32 %v3324_v20, %v389_v32 }
  0x92   : > { %1466 = vmatmul.f32.gmra.mxu2 %v913_v9  ;;  %v1096_v9 = vld [vmem:[%s4726_s2 + $0x3e8] sm:$0xff]  ;;  %1852 = vmatpush.msra.mxu0 %v1111_v55  ;;  %v404_v59 = vunpack.c.h.bf16 %v3298_v30  ;;  %v1125_v55 = vld [vmem:[%s4726_s2 + $0x4d0] sm:$0xff] }
  0x93   : > { %1392 = vmatmul.f32.gmra.mxu1 %v912_v33  ;;  %v403_v33 = vunpack.c.l.bf16 %v3298_v30  ;;  %1777 = vmatpush.msra.mxu3 %v1096_v9  ;;  %v957_v7 = vmul.f32 %v2929_v38, %v640_v62  ;;  %v374_v38 = vunpack.c.h.bf16 %v3254_v13  ;;  %v3372_v62 = vld [vmem:[%s2870_s23 + $0x13c] sm:$0xff] }
  0x94   : > { %v448_v18 = vunpack.c.l.bf16 %v3372_v62  ;;  %1853 = vmatpush.msra.mxu0 %v1110_v37 }
  0x95   : > { %v720_v34 = vmul.f32 %v3259_v40, %v403_v33  ;;  %v691_v13 = vmul.f32 %v3324_v20, %v374_v38  ;;  %1778 = vmatpush.msra.mxu3 %v1095_v42  ;;  %v1142_v33 = vld [vmem:[%s4726_s2 + $0x558] sm:$0xff]  ;;  %v417_v38 = vunpack.c.h.bf16 %v3200_v22 }
  0x96   : > { %2001 = vmatpush.msra.mxu2 %v1142_v33  ;;  %v765_v14 = vmul.f32 %v3259_v40, %v448_v18  ;;  %v260_v18 = vld [vmem:[%s2870_s23 + $0x144] sm:$0xff] }
  0x97   : > { %v450_v37 = vunpack.c.l.bf16 %v260_v18 }
  0x99   : > { %1321 = vmatmul.f32.gmra.mxu3 %v926_v24  ;;  %1569 = vmatmul.f32.vlgmr.msrb.gmra.mxu0 %v690_v48  ;;  %v689_v24 = vmul.f32 %v3314_v10, %v372_v36  ;;  %v387_v48 = vunpack.c.h.bf16 %v3129_v61  ;;  %v707_v61 = vmul.f32 %v3320_v17, %v390_v29  ;;  %v244_v36 = vld [vmem:[%s2870_s23 + $0xcc] sm:$0xff] }
  0x9a   : > { %1469 = vmatmul.f32.gmra.mxu2 %v928_v28  ;;  %v418_v28 = vunpack.c.l.bf16 %v3327_v56 }
  0x9b   : > { %1395 = vmatmul.f32.gmra.mxu1 %v927_v47  ;;  %v1128_v47 = vld [vmem:[%s4726_s2 + $0x4e8] sm:$0xff]  ;;  %v704_v23 = vmul.f32 %v3314_v10, %v387_v48 }
  0x9c   : > { %v735_v45 = vmul.f32 %v3259_v40, %v418_v28  ;;  %1925 = vmatpush.msra.mxu1 %v1128_v47  ;;  %v420_v28 = vunpack.c.l.bf16 %v244_v36  ;;  %v734_v47 = vmul.f32 %v3314_v10, %v417_v38  ;;  %v1108_v36 = vld [vmem:[%s4726_s2 + $0x448] sm:$0xff] }
  0x9e   : > { %1926 = vmatpush.msra.mxu1 %v1127_v3  ;;  %v737_v29 = vmul.f32 %v3320_v17, %v420_v28  ;;  %v434_v3 = vunpack.c.h.bf16 %v3347_v19 }
  0xa0   : > { %1927 = vmatpush.msra.mxu1 %v1126_v63  ;;  %v751_v19 = vmul.f32 %v3324_v20, %v434_v3 }
  0xa1   : > { %1324 = vmatmul.f32.gmra.mxu3 %v941_v57  ;;  %1572 = vmatmul.f32.gmra.mxu0 %v705_v5  ;;  %v750_v5 = vmul.f32 %v3259_v40, %v433_v53  ;;  %v1141_v53 = vld [vmem:[%s4726_s2 + $0x550] sm:$0xff] }
  0xa2   : > { %1472 = vmatmul.f32.gmra.mxu2 %v943_v39  ;;  %1928 = vmatpush.msra.mxu1 %v1125_v55 }
  0xa3   : > { %1398 = vmatmul.f32.gmra.mxu1 %v942_v2  ;;  %v1094_v2 = vld [vmem:[%s4726_s2 + $0x3d8] sm:$0xff]  ;;  %2002 = vmatpush.msra.mxu2 %v1141_v53  ;;  %v1139_v53 = vld [vmem:[%s4726_s2 + $0x540] sm:$0xff] }
  0xa4   : > { %1779 = vmatpush.msra.mxu3 %v1094_v2  ;;  %v435_v2 = vunpack.c.l.bf16 %v252_v49  ;;  %v462_v49 = vunpack.c.h.bf16 %v2966_v1  ;;  %v1107_v1 = vld [vmem:[%s4726_s2 + $0x440] sm:$0xff] }
  0xa6   : > { %v779_v3 = vmul.f32 %v3314_v10, %v462_v49  ;;  %v492_v49 = vunpack.c.h.bf16 %v3017_v51 }
  0xa9   : > { %1327 = vmatmul.f32.gmra.mxu3 %v956_v50  ;;  %1575 = vmatmul.f32.gmra.mxu0 %v720_v34  ;;  %v721_v34 = vmul.f32 %v3324_v20, %v404_v59  ;;  %v749_v59 = vmul.f32 %v3314_v10, %v432_v26  ;;  %v464_v26 = vunpack.c.h.bf16 %v3399_v31 }
  0xaa   : > { %1475 = vmatmul.f32.gmra.mxu2 %v958_v41 }
  0xab   : > { %1401 = vmatmul.f32.gmra.mxu1 %v957_v7  ;;  %v722_v7 = vmul.f32 %v3320_v17, %v405_v46 }
  0xb1   : > { %1495 = vmatmul.f32.vlgmr.msrb.gmra.mxu3 %v689_v24  ;;  %1578 = vmatmul.f32.gmra.mxu0 %v735_v45  ;;  %v1093_v24 = vld [vmem:[%s4726_s2 + $0x3d0] sm:$0xff]  ;;  %v463_v45 = vunpack.c.l.bf16 %v3399_v31 }
  0xb2   : > { %1717 = vmatmul.f32.vlgmr.msrb.gmra.mxu2 %v692_v44  ;;  %v419_v44 = vunpack.c.h.bf16 %v3327_v56  ;;  %1780 = vmatpush.msra.mxu3 %v1093_v24  ;;  %v3447_v24 = vld [vmem:[%s2870_s23 + $0x1f0] sm:$0xff] }
  0xb3   : > { %1643 = vmatmul.f32.vlgmr.msrb.gmra.mxu1 %v691_v13 }
  0xb4   : > { %v736_v56 = vmul.f32 %v3324_v20, %v419_v44 }
  0xb6   : > { %v3354_v57 = vpop.f32.mrf.mxu0 }
  0xb8   : > { %v1360_v39 = vpop.f32.mrf.mxu1 }
  0xb9   : > { %1498 = vmatmul.f32.gmra.mxu3 %v704_v23  ;;  %1581 = vmatmul.f32.gmra.mxu0 %v750_v5  ;;  %v3426_v5 = vld [vmem:[%s2870_s23 + $0x1b4] sm:$0xff] }
  0xba   : > { %1720 = vmatmul.f32.gmra.mxu2 %v707_v61  ;;  %v780_v61 = vmul.f32 %v3259_v40, %v463_v45 }
  0xbb   : > { %1646 = vmatmul.f32.gmra.mxu1 %v706_v43  ;;  %v1092_v43 = vld [vmem:[%s4726_s2 + $0x3c8] sm:$0xff] }
  0xbc   : > { %v1286_v60 = vpop.f32.mrf.mxu3  ;;  %1781 = vmatpush.msra.mxu3 %v1092_v43  ;;  %v3471_v43 = vld [vmem:[%s2870_s23 + $0x22c] sm:$0xff] }
  0xbd   : > { %v1361_v50 = vadd.f32 %v1360_v39, %v1286_v60  ;;  %v1434_v9 = vpop.f32.mrf.mxu2  ;;  %v1109_v39 = vld [vmem:[%s4726_s2 + $0x450] sm:$0xff]  ;;  %v478_v60 = vunpack.c.l.bf16 %v3426_v5 }
  0xbe   : > { %v3379_v41 = vpop.f32.mrf.mxu0  ;;  %1854 = vmatpush.msra.mxu0 %v1109_v39 }
  0xbf   : > { %v3382_v8 = vadd.f32 %v1434_v9, %v1361_v50  ;;  %v752_v9 = vmul.f32 %v3320_v17, %v435_v2 }
  0xc0   : > { %v1363_v30 = vpop.f32.mrf.mxu1  ;;  %1855 = vmatpush.msra.mxu0 %v1108_v36  ;;  %v479_v36 = vunpack.c.h.bf16 %v3426_v5 }
  0xc1   : > { %1501 = vmatmul.f32.gmra.mxu3 %v719_v4  ;;  %1584 = vmatmul.f32.gmra.mxu0 %v765_v14  ;;  %v449_v14 = vunpack.c.h.bf16 %v3372_v62 }
  0xc2   : > { %1723 = vmatmul.f32.gmra.mxu2 %v722_v7  ;;  %v1140_v7 = vld [vmem:[%s4726_s2 + $0x548] sm:$0xff]  ;;  %1856 = vmatpush.msra.mxu0 %v1107_v1  ;;  %v1137_v1 = vld [vmem:[%s4726_s2 + $0x530] sm:$0xff] }
  0xc3   : > { %1649 = vmatmul.f32.gmra.mxu1 %v721_v34  ;;  %2003 = vmatpush.msra.mxu2 %v1140_v7  ;;  %v447_v34 = vunpack.c.h.bf16 %v2941_v52  ;;  %v1091_v52 = vld [vmem:[%s4726_s2 + $0x3c0] sm:$0xff]  ;;  %v477_v7 = vunpack.c.h.bf16 %v2991_v27  ;;  %v1106_v27 = vld [vmem:[%s4726_s2 + $0x438] sm:$0xff] }
  0xc4   : > { %v1289_v13 = vpop.f32.mrf.mxu3  ;;  %1782 = vmatpush.msra.mxu3 %v1091_v52  ;;  %1857 = vmatpush.msra.mxu0 %v1106_v27 }
  0xc5   : > { %v1364_v22 = vadd.f32 %v1363_v30, %v1289_v13  ;;  %v1437_v42 = vpop.f32.mrf.mxu2  ;;  %v795_v30 = vmul.f32 %v3259_v40, %v478_v60  ;;  %v764_v44 = vmul.f32 %v3314_v10, %v447_v34  ;;  %v1124_v13 = vld [vmem:[%s4726_s2 + $0x4c8] sm:$0xff]  ;;  %2004 = vmatpush.msra.mxu2 %v1139_v53 }
  0xc6   : > { %v3403_v48 = vpop.f32.mrf.mxu0  ;;  %1929 = vmatpush.msra.mxu1 %v1124_v13 }
  0xc7   : > { %v3406_v32 = vadd.f32 %v1437_v42, %v1364_v22  ;;  %v493_v22 = vunpack.c.l.bf16 %v3447_v24  ;;  %v767_v42 = vmul.f32 %v3320_v17, %v450_v37 }
  0xc8   : > { %v1366_v23 = vpop.f32.mrf.mxu1 }
  0xc9   : > { %1504 = vmatmul.f32.gmra.mxu3 %v734_v47  ;;  %1587 = vmatmul.f32.gmra.mxu0 %v780_v61 }
  0xca   : > { %1726 = vmatmul.f32.gmra.mxu2 %v737_v29  ;;  %v766_v29 = vmul.f32 %v3324_v20, %v449_v14  ;;  %v3498_v14 = vld [vmem:[%s2870_s23 + $0x268] sm:$0xff] }
  0xcb   : > { %1652 = vmatmul.f32.gmra.mxu1 %v736_v56  ;;  %v810_v56 = vmul.f32 %v3259_v40, %v493_v22 }
  0xcc   : > { %v1292_v11 = vpop.f32.mrf.mxu3 }
  0xcd   : > { %v1367_v58 = vadd.f32 %v1366_v23, %v1292_v11  ;;  %v1440_v46 = vpop.f32.mrf.mxu2  ;;  %v268_v23 = vld [vmem:[%s2870_s23 + $0x180] sm:$0xff]  ;;  %v1090_v11 = vld [vmem:[%s4726_s2 + $0x3b8] sm:$0xff] }
  0xce   : > { %v3430_v50 = vpop.f32.mrf.mxu0  ;;  %v465_v61 = vunpack.c.l.bf16 %v268_v23  ;;  %1783 = vmatpush.msra.mxu3 %v1090_v11  ;;  %v1122_v23 = vld [vmem:[%s4726_s2 + $0x4b8] sm:$0xff] }
  0xcf   : > { %v3433_v4 = vadd.f32 %v1440_v46, %v1367_v58  ;;  %v508_v58 = vunpack.c.l.bf16 %v3471_v43 }
  0xd0   : > { %v1369_v33 = vpop.f32.mrf.mxu1  ;;  %v782_v46 = vmul.f32 %v3320_v17, %v465_v61  ;;  %v494_v61 = vunpack.c.h.bf16 %v3447_v24 }
  0xd1   : > { %1507 = vmatmul.f32.gmra.mxu3 %v749_v59  ;;  %1590 = vmatmul.f32.gmra.mxu0 %v795_v30  ;;  %v825_v18 = vmul.f32 %v3259_v40, %v508_v58  ;;  %v1138_v30 = vld [vmem:[%s4726_s2 + $0x538] sm:$0xff] }
  0xd2   : > { %1729 = vmatmul.f32.gmra.mxu2 %v752_v9  ;;  %v781_v9 = vmul.f32 %v3324_v20, %v464_v26  ;;  %v811_v24 = vmul.f32 %v3324_v20, %v494_v61  ;;  %v1120_v61 = vld [vmem:[%s4726_s2 + $0x4a8] sm:$0xff] }
  0xd3   : > { %1655 = vmatmul.f32.gmra.mxu1 %v751_v19  ;;  %v1123_v19 = vld [vmem:[%s4726_s2 + $0x4c0] sm:$0xff]  ;;  %2005 = vmatpush.msra.mxu2 %v1138_v30  ;;  %v1121_v30 = vld [vmem:[%s4726_s2 + $0x4b0] sm:$0xff] }
  0xd4   : > { %v1295_v38 = vpop.f32.mrf.mxu3  ;;  %1930 = vmatpush.msra.mxu1 %v1123_v19 }
  0xd5   : > { %v1370_v63 = vadd.f32 %v1369_v33, %v1295_v38  ;;  %v1443_v28 = vpop.f32.mrf.mxu2  ;;  %v276_v33 = vld [vmem:[%s2870_s23 + $0x1bc] sm:$0xff]  ;;  %2006 = vmatpush.msra.mxu2 %v1137_v1 }
  0xd6   : > { %v3457_v62 = vpop.f32.mrf.mxu0  ;;  %v480_v34 = vunpack.c.l.bf16 %v276_v33  ;;  %1931 = vmatpush.msra.mxu1 %v1122_v23  ;;  %v1088_v33 = vld [vmem:[%s4726_s2 + $0x3a8] sm:$0xff] }
  0xd7   : > { %v3460_v47 = vadd.f32 %v1443_v28, %v1370_v63  ;;  %v794_v28 = vmul.f32 %v3314_v10, %v477_v7  ;;  %v507_v7 = vunpack.c.h.bf16 %v3040_v6 }
  0xd8   : > { %v1372_v45 = vpop.f32.mrf.mxu1  ;;  %v797_v13 = vmul.f32 %v3320_v17, %v480_v34  ;;  %1932 = vmatpush.msra.mxu1 %v1121_v30  ;;  %v537_v30 = vunpack.c.h.bf16 %v3084_v25  ;;  %v3600_v25 = vld [vmem:[%s2870_s23 + $0x358] sm:$0xff] }
  0xd9   : > { %1510 = vmatmul.f32.gmra.mxu3 %v764_v44  ;;  %1593 = vmatmul.f32.gmra.mxu0 %v810_v56  ;;  %v523_v44 = vunpack.c.l.bf16 %v3498_v14  ;;  %v824_v6 = vmul.f32 %v3314_v10, %v507_v7 }
  0xda   : > { %1732 = vmatmul.f32.gmra.mxu2 %v767_v42  ;;  %v796_v42 = vmul.f32 %v3324_v20, %v479_v36  ;;  %v509_v36 = vunpack.c.h.bf16 %v3471_v43  ;;  %v1136_v43 = vld [vmem:[%s4726_s2 + $0x528] sm:$0xff]  ;;  %1933 = vmatpush.msra.mxu1 %v1120_v61  ;;  %v552_v61 = vunpack.c.h.bf16 %v3109_v35  ;;  %v3624_v35 = vld [vmem:[%s2870_s23 + $0x394] sm:$0xff] }
  0xdb   : > { %1658 = vmatmul.f32.gmra.mxu1 %v766_v29  ;;  %v1089_v29 = vld [vmem:[%s4726_s2 + $0x3b0] sm:$0xff]  ;;  %v840_v56 = vmul.f32 %v3259_v40, %v523_v44  ;;  %2007 = vmatpush.msra.mxu2 %v1136_v43 }
  0xdc   : > { %v1298_v39 = vpop.f32.mrf.mxu3  ;;  %1784 = vmatpush.msra.mxu3 %v1089_v29  ;;  %v1104_v29 = vld [vmem:[%s4726_s2 + $0x428] sm:$0xff] }
  0xdd   : > { %v1373_v55 = vadd.f32 %v1372_v45, %v1298_v39  ;;  %v1446_v2 = vpop.f32.mrf.mxu2  ;;  %v284_v45 = vld [vmem:[%s2870_s23 + $0x1f8] sm:$0xff]  ;;  %v3522_v39 = vld [vmem:[%s2870_s23 + $0x2a4] sm:$0xff] }
  0xde   : > { %v3481_v31 = vpop.f32.mrf.mxu0  ;;  %v495_v53 = vunpack.c.l.bf16 %v284_v45  ;;  %v538_v51 = vunpack.c.l.bf16 %v3522_v39  ;;  %1785 = vmatpush.msra.mxu3 %v1088_v33  ;;  %v300_v45 = vld [vmem:[%s2870_s23 + $0x270] sm:$0xff] }
  0xdf   : > { %v3484_v59 = vadd.f32 %v1446_v2, %v1373_v55 }
  0xe0   : > { %v1375_v60 = vpop.f32.mrf.mxu1  ;;  %v812_v58 = vmul.f32 %v3320_v17, %v495_v53  ;;  %v1087_v53 = vld [vmem:[%s4726_s2 + $0x3a0] sm:$0xff] }
  0xe1   : > { %1513 = vmatmul.f32.gmra.mxu3 %v779_v3  ;;  %1596 = vmatmul.f32.gmra.mxu0 %v825_v18  ;;  %v809_v3 = vmul.f32 %v3314_v10, %v492_v49  ;;  %v855_v18 = vmul.f32 %v3259_v40, %v538_v51  ;;  %v522_v49 = vunpack.c.h.bf16 %v3062_v15  ;;  %v3576_v15 = vld [vmem:[%s2870_s23 + $0x31c] sm:$0xff] }
  0xe2   : > { %1735 = vmatmul.f32.gmra.mxu2 %v782_v46  ;;  %1786 = vmatpush.msra.mxu3 %v1087_v53 }
  0xe3   : > { %1661 = vmatmul.f32.gmra.mxu1 %v781_v9  ;;  %v1105_v9 = vld [vmem:[%s4726_s2 + $0x430] sm:$0xff]  ;;  %v839_v51 = vmul.f32 %v3314_v10, %v522_v49 }
  0xe4   : > { %v1301_v37 = vpop.f32.mrf.mxu3  ;;  %1858 = vmatpush.msra.mxu0 %v1105_v9 }
  0xe5   : > { %v1376_v38 = vadd.f32 %v1375_v60, %v1301_v37  ;;  %v1449_v63 = vpop.f32.mrf.mxu2  ;;  %v292_v60 = vld [vmem:[%s2870_s23 + $0x234] sm:$0xff] }
  0xe6   : > { %v3505_v52 = vpop.f32.mrf.mxu0  ;;  %v510_v34 = vunpack.c.l.bf16 %v292_v60  ;;  %1859 = vmatpush.msra.mxu0 %v1104_v29 }
  0xe7   : > { %v3508_v5 = vadd.f32 %v1449_v63, %v1376_v38  ;;  %v3549_v38 = vld [vmem:[%s2870_s23 + $0x2e0] sm:$0xff] }
  0xe8   : > { %v1378_v22 = vpop.f32.mrf.mxu1  ;;  %v553_v27 = vunpack.c.l.bf16 %v3549_v38 }
  0xe9   : > { %1516 = vmatmul.f32.gmra.mxu3 %v794_v28  ;;  %1599 = vmatmul.f32.gmra.mxu0 %v840_v56 }
  0xea   : > { %1738 = vmatmul.f32.gmra.mxu2 %v797_v13  ;;  %v827_v13 = vmul.f32 %v3320_v17, %v510_v34  ;;  %v870_v23 = vmul.f32 %v3259_v40, %v553_v27  ;;  %v1103_v34 = vld [vmem:[%s4726_s2 + $0x420] sm:$0xff] }
  0xeb   : > { %1664 = vmatmul.f32.gmra.mxu1 %v796_v42  ;;  %v826_v42 = vmul.f32 %v3324_v20, %v509_v36  ;;  %v1086_v36 = vld [vmem:[%s4726_s2 + $0x398] sm:$0xff]  ;;  %1860 = vmatpush.msra.mxu0 %v1103_v34 }
  0xec   : > { %v1304_v26 = vpop.f32.mrf.mxu3  ;;  %1787 = vmatpush.msra.mxu3 %v1086_v36  ;;  %v324_v36 = vld [vmem:[%s2870_s23 + $0x324] sm:$0xff] }
  0xed   : > { %v1379_v55 = vadd.f32 %v1378_v22, %v1304_v26  ;;  %v1452_v2 = vpop.f32.mrf.mxu2  ;;  %v525_v26 = vunpack.c.l.bf16 %v300_v45  ;;  %v583_v45 = vunpack.c.l.bf16 %v3600_v25 }
  0xee   : > { %v3529_v11 = vpop.f32.mrf.mxu0 }
  0xef   : > { %v3532_v46 = vadd.f32 %v1452_v2, %v1379_v55  ;;  %v524_v55 = vunpack.c.h.bf16 %v3498_v14  ;;  %v842_v60 = vmul.f32 %v3320_v17, %v525_v26  ;;  %v308_v14 = vld [vmem:[%s2870_s23 + $0x2ac] sm:$0xff]  ;;  %v900_v49 = vmul.f32 %v3259_v40, %v583_v45  ;;  %v1134_v26 = vld [vmem:[%s4726_s2 + $0x518] sm:$0xff] }
  0xf0   : > { %v1381_v19 = vpop.f32.mrf.mxu1 }
  0xf1   : > { %1519 = vmatmul.f32.gmra.mxu3 %v809_v3  ;;  %1602 = vmatmul.f32.gmra.mxu0 %v855_v18  ;;  %v841_v33 = vmul.f32 %v3324_v20, %v524_v55  ;;  %v1102_v55 = vld [vmem:[%s4726_s2 + $0x418] sm:$0xff] }
  0xf2   : > { %1741 = vmatmul.f32.gmra.mxu2 %v812_v58  ;;  %v568_v58 = vunpack.c.l.bf16 %v3576_v15  ;;  %1861 = vmatpush.msra.mxu0 %v1102_v55 }
  0xf3   : > { %1667 = vmatmul.f32.gmra.mxu1 %v811_v24 }
  0xf4   : > { %v1307_v37 = vpop.f32.mrf.mxu3  ;;  %v885_v18 = vmul.f32 %v3259_v40, %v568_v58 }
  0xf5   : > { %v1382_v63 = vadd.f32 %v1381_v19, %v1307_v37  ;;  %v1455_v28 = vpop.f32.mrf.mxu2  ;;  %v1135_v19 = vld [vmem:[%s4726_s2 + $0x520] sm:$0xff]  ;;  %v540_v37 = vunpack.c.l.bf16 %v308_v14  ;;  %v1118_v14 = vld [vmem:[%s4726_s2 + $0x498] sm:$0xff] }
  0xf6   : > { %v3553_v44 = vpop.f32.mrf.mxu0  ;;  %2008 = vmatpush.msra.mxu2 %v1135_v19 }
  0xf7   : > { %v3556_v22 = vadd.f32 %v1455_v28, %v1382_v63  ;;  %v539_v63 = vunpack.c.h.bf16 %v3522_v39  ;;  %v857_v29 = vmul.f32 %v3320_v17, %v540_v37 }
  0xf8   : > { %v1384_v56 = vpop.f32.mrf.mxu1  ;;  %2009 = vmatpush.msra.mxu2 %v1134_v26 }
  0xf9   : > { %1522 = vmatmul.f32.gmra.mxu3 %v824_v6  ;;  %1605 = vmatmul.f32.gmra.mxu0 %v870_v23  ;;  %v856_v23 = vmul.f32 %v3324_v20, %v539_v63 }
  0xfa   : > { %1744 = vmatmul.f32.gmra.mxu2 %v827_v13  ;;  %v854_v13 = vmul.f32 %v3314_v10, %v537_v30 }
  0xfb   : > { %1670 = vmatmul.f32.gmra.mxu1 %v826_v42  ;;  %v1119_v42 = vld [vmem:[%s4726_s2 + $0x4a0] sm:$0xff] }
  0xfc   : > { %v1310_v2 = vpop.f32.mrf.mxu3  ;;  %1934 = vmatpush.msra.mxu1 %v1119_v42  ;;  %v569_v42 = vunpack.c.h.bf16 %v3576_v15 }
  0xfd   : > { %v1385_v3 = vadd.f32 %v1384_v56, %v1310_v2  ;;  %v1458_v1 = vpop.f32.mrf.mxu2  ;;  %v316_v56 = vld [vmem:[%s2870_s23 + $0x2e8] sm:$0xff] }
  0xfe   : > { %v3580_v24 = vpop.f32.mrf.mxu0  ;;  %v555_v2 = vunpack.c.l.bf16 %v316_v56  ;;  %1935 = vmatpush.msra.mxu1 %v1118_v14  ;;  %v886_v55 = vmul.f32 %v3324_v20, %v569_v42  ;;  %v340_v42 = vld [vmem:[%s2870_s23 + $0x39c] sm:$0xff] }
  0xff   : > { %v3583_v9 = vadd.f32 %v1458_v1, %v1385_v3  ;;  %v554_v3 = vunpack.c.h.bf16 %v3549_v38  ;;  %v598_v38 = vunpack.c.l.bf16 %v3624_v35 }
 0x100   : > { %v1387_v7 = vpop.f32.mrf.mxu1 }
 0x101   : > { %1525 = vmatmul.f32.gmra.mxu3 %v839_v51  ;;  %1608 = vmatmul.f32.gmra.mxu0 %v885_v18  ;;  %v872_v18 = vmul.f32 %v3320_v17, %v555_v2  ;;  %v871_v34 = vmul.f32 %v3324_v20, %v554_v3  ;;  %v915_v37 = vmul.f32 %v3259_v40, %v598_v38  ;;  %v332_v2 = vld [vmem:[%s2870_s23 + $0x360] sm:$0xff]  ;;  %v1084_v3 = vld [vmem:[%s4726_s2 + $0x388] sm:$0xff] }
 0x102   : > { %1747 = vmatmul.f32.gmra.mxu2 %v842_v60  ;;  %v869_v60 = vmul.f32 %v3314_v10, %v552_v61  ;;  %v585_v38 = vunpack.c.l.bf16 %v332_v2 }
 0x103   : > { %1673 = vmatmul.f32.gmra.mxu1 %v841_v33  ;;  %v1085_v33 = vld [vmem:[%s4726_s2 + $0x390] sm:$0xff] }
 0x104   : > { %v1313_v28 = vpop.f32.mrf.mxu3  ;;  %1788 = vmatpush.msra.mxu3 %v1085_v33  ;;  %v582_v33 = vunpack.c.h.bf16 %v3167_v21  ;;  %v1132_v21 = vld [vmem:[%s4726_s2 + $0x508] sm:$0xff] }
 0x105   : > { %v1388_v6 = vadd.f32 %v1387_v7, %v1313_v28  ;;  %v1461_v27 = vpop.f32.mrf.mxu2  ;;  %v178_v7 = vld [vmem:[%s4724_s0 + $0x8] sm:$0x7f] }
 0x106   : > { %v3607_v43 = vpop.f32.mrf.mxu0  ;;  %v2451_v28 = vmul.f32 -1.442695, %v178_v7  ;;  %1789 = vmatpush.msra.mxu3 %v1084_v3  ;;  %v599_v3 = vunpack.c.h.bf16 %v3624_v35 }
 0x107   : > { %v3610_v39 = vadd.f32 %v1461_v27, %v1388_v6  ;;  %v567_v6 = vunpack.c.h.bf16 %v3133_v0  ;;  %v1133_v27 = vld [vmem:[%s4726_s2 + $0x510] sm:$0xff] }
 0x108   : > { %v1390_v53 = vpop.f32.mrf.mxu1  ;;  %2534 = vpow2.f32 %v2451_v28  ;;  %2010 = vmatpush.msra.mxu2 %v1133_v27 }
 0x109   : > { %1528 = vmatmul.f32.gmra.mxu3 %v854_v13  ;;  %1611 = vmatmul.f32.gmra.mxu0 %v900_v49  ;;  %v570_v13 = vunpack.c.l.bf16 %v324_v36  ;;  %v884_v0 = vmul.f32 %v3314_v10, %v567_v6  ;;  %v1101_v49 = vld [vmem:[%s4726_s2 + $0x410] sm:$0xff]  ;;  %v902_v6 = vmul.f32 %v3320_v17, %v585_v38 }
 0x10a   : > { %1750 = vmatmul.f32.gmra.mxu2 %v857_v29  ;;  %v3651_v29 = vld [vmem:[%s2870_s23 + $0x3d0] sm:$0xff]  ;;  %1862 = vmatpush.msra.mxu0 %v1101_v49  ;;  %v597_v49 = vunpack.c.h.bf16 %v3204_v54 }
 0x10b   : > { %1676 = vmatmul.f32.gmra.mxu1 %v856_v23  ;;  %v887_v61 = vmul.f32 %v3320_v17, %v570_v13  ;;  %2011 = vmatpush.msra.mxu2 %v1132_v21  ;;  %v348_v21 = vld [vmem:[%s2870_s23 + $0x3d8] sm:$0xff] }
 0x10c   : > { %v1316_v1 = vpop.f32.mrf.mxu3 }
 0x10d   : > { %v1391_v51 = vadd.f32 %v1390_v53, %v1316_v1  ;;  %v1464_v58 = vpop.f32.mrf.mxu2  ;;  %v613_v53 = vunpack.c.l.bf16 %v3651_v29  ;;  %v1117_v1 = vld [vmem:[%s4726_s2 + $0x490] sm:$0xff] }
 0x10e   : > { %v3634_v19 = vpop.f32.mrf.mxu0  ;;  %1936 = vmatpush.msra.mxu1 %v1117_v1  ;;  %v3706_v1 = vld [vmem:[%s2870_s23 + $0x448] sm:$0xff] }
 0x10f   : > { %v3640_v30 = vadd.f32 %v1464_v58, %v1391_v51  ;;  %v930_v51 = vmul.f32 %v3259_v40, %v613_v53  ;;  %v2535_v58 = vpop.eup %2534  ;;  %v1083_v53 = vld [vmem:[%s4726_s2 + $0x380] sm:$0xff]  ;;  %v643_v38 = vunpack.c.l.bf16 %v3706_v1 }
 0x110   : > { %v1393_v63 = vpop.f32.mrf.mxu1  ;;  %v3673_v14 = vadd.f32 1.0, %v2535_v58  ;;  %1790 = vmatpush.msra.mxu3 %v1083_v53  ;;  %v615_v53 = vunpack.c.l.bf16 %v348_v21 }
 0x111   : > { %1531 = vmatmul.f32.gmra.mxu3 %v869_v60  ;;  %1614 = vmatmul.f32.gmra.mxu0 %v915_v37 }
 0x112   : > { %1753 = vmatmul.f32.gmra.mxu2 %v872_v18  ;;  %v584_v18 = vunpack.c.h.bf16 %v3600_v25  ;;  %2536 = vrcp.f32 %v3673_v14  ;;  %v213_v35 = vand.u32 2147483648, %v3673_v14  ;;  %vm207_vm4 = vweird.f32 %v3673_v14 }
 0x113   : > { %1679 = vmatmul.f32.gmra.mxu1 %v871_v34  ;;  %v3678_v34 = vld [vmem:[%s2870_s23 + $0x40c] sm:$0xff] }
 0x114   : > { %v1319_v45 = vpop.f32.mrf.mxu3  ;;  %v628_v28 = vunpack.c.l.bf16 %v3678_v34  ;;  %v901_v13 = vmul.f32 %v3324_v20, %v584_v18 }
 0x115   : > { %v1394_v23 = vadd.f32 %v1393_v63, %v1319_v45  ;;  %v1467_v56 = vpop.f32.mrf.mxu2  ;;  %v899_v63 = vmul.f32 %v3314_v10, %v582_v33  ;;  %v1100_v45 = vld [vmem:[%s4726_s2 + $0x408] sm:$0xff]  ;;  %v914_v33 = vmul.f32 %v3314_v10, %v597_v49  ;;  %v1099_v49 = vld [vmem:[%s4726_s2 + $0x400] sm:$0xff] }
 0x116   : > { %v3659_v26 = vpop.f32.mrf.mxu0  ;;  %1863 = vmatpush.msra.mxu0 %v1100_v45  ;;  %v211_v45 = vand.u32 2147483647, %v3673_v14 }
 0x117   : > { %v3661_v15 = vadd.f32 %v1467_v56, %v1394_v23  ;;  %v945_v23 = vmul.f32 %v3259_v40, %v628_v28  ;;  %v1131_v28 = vld [vmem:[%s4726_s2 + $0x500] sm:$0xff] }
 0x118   : > { %v1396_v60 = vpop.f32.mrf.mxu1  ;;  %2012 = vmatpush.msra.mxu2 %v1131_v28  ;;  %1864 = vmatpush.msra.mxu0 %v1099_v49  ;;  %vm212_vm7 = vcmp.eq.f32.partialorder %v211_v45, 8.507059e+37  ;;  %v2538_v28 = vld [vmem:[%s2870_s23 + $0x404] sm:$0xff]  ;;  %v1161_v49 = vld [vmem:[%s4726_s2 + $0x5f0] sm:$0xff] }
 0x119   : > { %1534 = vmatmul.f32.gmra.mxu3 %v884_v0  ;;  %1617 = vmatmul.f32.gmra.mxu0 %v930_v51  ;;  %v2537_v0 = vpop.eup %2536 }
 0x11a   : > { %1756 = vmatmul.f32.gmra.mxu2 %v887_v61  ;;  %v1116_v61 = vld [vmem:[%s4726_s2 + $0x488] sm:$0xff]  ;;  %v203_v2 = vmul.f32 %v2537_v0, %v3673_v14  ;;  %vm208_vm5 = vweird.f32 %v2537_v0  ;;  %v614_v14 = vunpack.c.h.bf16 %v3651_v29 }
 0x11b   : > { %1682 = vmatmul.f32.gmra.mxu1 %v886_v55  ;;  %v600_v55 = vunpack.c.l.bf16 %v340_v42  ;;  %vm209_vm6 = vmor %vm207_vm4, %vm208_vm5 }
 0x11c   : > { %v1322_v7 = vpop.f32.mrf.mxu3  ;;  %1937 = vmatpush.msra.mxu1 %v1116_v61  ;;  %v204_v51 = vsub.f32 1.0, %v203_v2 }
 0x11d   : > { %v1397_v36 = vadd.f32 %v1396_v60, %v1322_v7  ;;  %v1470_v37 = vpop.f32.mrf.mxu2  ;;  %v917_v18 = vmul.f32 %v3320_v17, %v600_v55 }
 0x11e   : > { %v3686_v27 = vpop.f32.mrf.mxu0 }
 0x11f   : > { %v3688_v25 = vadd.f32 %v1470_v37, %v1397_v36  ;;  %v205_v36 = vmul.f32 %v2537_v0, %v204_v51 }
 0x120   : > { %v1399_v56 = vpop.f32.mrf.mxu1 }
 0x121   : > { %1537 = vmatmul.f32.gmra.mxu3 %v899_v63  ;;  %1620 = vmatmul.f32.gmra.mxu0 %v945_v23  ;;  %v916_v63 = vmul.f32 %v3324_v20, %v599_v3  ;;  %v206_v42 = vadd.f32 %v2537_v0, %v205_v36  ;;  %v214_v23 = vor.u32 1.1754944e-38, %v213_v35  ;;  %v3738_v3 = vld [vmem:[%s2870_s23 + $0x20] sm:$0xff]  ;;  %v356_v36 = vld [vmem:[%s2870_s23 + $0x414] sm:$0xff] }
 0x122   : > { %1759 = vmatmul.f32.gmra.mxu2 %v902_v6  ;;  %v960_v6 = vmul.f32 %v3259_v40, %v643_v38  ;;  %v1162_v40 = vld [vmem:[%s4726_s2 + $0x5f8] sm:$0xff]  ;;  %v377_v29 = vunpack.c.l.bf16 %v3738_v3  ;;  %v630_v45 = vunpack.c.l.bf16 %v356_v36  ;;  %v1352_v36 = vadd.f32 %v3481_v31, %v3379_v41 }
 0x123   : > { %1685 = vmatmul.f32.gmra.mxu1 %v901_v13  ;;  %v210_v61 = vsel %vm209_vm6, %v2537_v0, %v206_v42  ;;  %2071 = vmatpush.msrb.mxu3 %v1162_v40  ;;  %v1198_v35 = vld [vmem:[%s4726_s2 + $0x718] sm:$0xff] }
 0x124   : > { %v1325_v54 = vpop.f32.mrf.mxu3  ;;  %v3735_v2 = vsel %vm212_vm7, %v214_v23, %v210_v61  ;;  %2305 = vmatpush.msrb.mxu2 %v1198_v35  ;;  %v1178_v42 = vld [vmem:[%s4726_s2 + $0x678] sm:$0xff] }
 0x125   : > { %v1400_v58 = vadd.f32 %v1399_v56, %v1325_v54  ;;  %v1473_v60 = vpop.f32.mrf.mxu2  ;;  %v612_v56 = vunpack.c.h.bf16 %v3235_v12  ;;  %v1115_v12 = vld [vmem:[%s4726_s2 + $0x480] sm:$0xff]  ;;  %2145 = vmatpush.msrb.mxu0 %v1178_v42  ;;  %2072 = vmatpush.msrb.mxu3 %v1161_v49  ;;  %v3793_v41 = vld [vmem:[%s2870_s23 + $0x98] sm:$0xff] }
 0x126   : > { %v3711_v7 = vpop.f32.mrf.mxu0  ;;  %1938 = vmatpush.msra.mxu1 %v1115_v12  ;;  %v3771_v40 = vld [vmem:[%s2870_s23 + $0x5c] sm:$0xff] }
 0x127   : > { %v3714_v37 = vadd.f32 %v1473_v60, %v1400_v58  ;;  %v929_v51 = vmul.f32 %v3314_v10, %v612_v56  ;;  %v3743_v58 = vperm.slane %v3735_v2, 0  ;;  %v932_v60 = vmul.f32 %v3320_v17, %v615_v53 }
 0x128   : > { %v1402_v13 = vpop.f32.mrf.mxu1  ;;  %v629_v56 = vunpack.c.h.bf16 %v3678_v34  ;;  %v392_v34 = vunpack.c.l.bf16 %v3771_v40 }
 0x129   : > { %1540 = vmatmul.f32.gmra.mxu3 %v914_v33  ;;  %1623 = vmatmul.f32.gmra.mxu0 %v960_v6  ;;  %v627_v6 = vunpack.c.h.bf16 %v2538_v28 }
 0x12a   : > { %1762 = vmatmul.f32.gmra.mxu2 %v917_v18  ;;  %v931_v18 = vmul.f32 %v3324_v20, %v614_v14  ;;  %v947_v14 = vmul.f32 %v3320_v17, %v630_v45  ;;  %v1160_v45 = vld [vmem:[%s4726_s2 + $0x5e8] sm:$0xff] }
 0x12b   : > { %1688 = vmatmul.f32.gmra.mxu1 %v916_v63  ;;  %v694_v63 = vmul.f32 %v3743_v58, %v377_v29  ;;  %v944_v53 = vmul.f32 %v3314_v10, %v627_v6  ;;  %v644_v6 = vunpack.c.h.bf16 %v3706_v1  ;;  %v1193_v1 = vld [vmem:[%s4726_s2 + $0x6f0] sm:$0xff]  ;;  %2073 = vmatpush.msrb.mxu3 %v1160_v45  ;;  %v1358_v45 = vadd.f32 %v3529_v11, %v3430_v50 }
 0x12c   : > { %v1328_v55 = vpop.f32.mrf.mxu3 }
 0x12d   : > { %v1403_v54 = vadd.f32 %v1402_v13, %v1328_v55  ;;  %v1476_v0 = vpop.f32.mrf.mxu2  ;;  %v1349_v13 = vadd.f32 %v3457_v62, %v3354_v57  ;;  %v1194_v57 = vld [vmem:[%s4726_s2 + $0x6f8] sm:$0xff]  ;;  %v946_v55 = vmul.f32 %v3324_v20, %v629_v56 }
 0x12e   : > { %v3746_v33 = vpop.f32.mrf.mxu0  ;;  %2219 = vmatpush.msrb.mxu1 %v1194_v57  ;;  %v961_v57 = vmul.f32 %v3324_v20, %v644_v6  ;;  %v3817_v20 = vperm.slane %v3735_v2, 2 }
 0x12f   : > { %v3748_v38 = vadd.f32 %v1476_v0, %v1403_v54  ;;  %v1423_v23 = vadd.f32 %v3553_v44, %v1349_v13  ;;  %v364_v54 = vld [vmem:[%s2870_s23 + $0x450] sm:$0xff] }
 0x130   : > { %v1644_v21 = vpop.f32.mrf.mxu1  ;;  %v1177_v13 = vld [vmem:[%s4726_s2 + $0x670] sm:$0xff]  ;;  %2220 = vmatpush.msrb.mxu1 %v1193_v1 }
 0x131   : > { %1543 = vmatmul.f32.gmra.mxu3 %v929_v51  ;;  %1865 = vmatmul.f32.vlgmr.msra.gmra.mxu0 %v694_v63  ;;  %v709_v51 = vmul.f32 %v3743_v58, %v392_v34  ;;  %v645_v63 = vunpack.c.l.bf16 %v364_v54 }
 0x132   : > { %1765 = vmatmul.f32.gmra.mxu2 %v932_v60  ;;  %v2539_v60 = vld [vmem:[%s2870_s23 + $0x440] sm:$0xff]  ;;  %2146 = vmatpush.msrb.mxu0 %v1177_v13 }
 0x133   : > { %1691 = vmatmul.f32.gmra.mxu1 %v931_v18  ;;  %v642_v18 = vunpack.c.h.bf16 %v2539_v60  ;;  %v962_v56 = vmul.f32 %v3320_v17, %v645_v63  ;;  %v1355_v17 = vadd.f32 %v3505_v52, %v3403_v48  ;;  %v3827_v52 = vld [vmem:[%s2870_s23 + $0xd4] sm:$0xff]  ;;  %v1159_v13 = vld [vmem:[%s4726_s2 + $0x5e0] sm:$0xff] }
 0x134   : > { %v1496_v62 = vpop.f32.mrf.mxu3  ;;  %2074 = vmatpush.msrb.mxu3 %v1159_v13 }
 0x135   : > { %v1497_v44 = vadd.f32 %v1496_v62, %v1423_v23  ;;  %v1718_v61 = vpop.f32.mrf.mxu2  ;;  %v407_v23 = vunpack.c.l.bf16 %v3793_v41 }
 0x136   : > { %v3779_v0 = vpop.f32.mrf.mxu0 }
 0x137   : > { %v1571_v12 = vadd.f32 %v3659_v26, %v1497_v44  ;;  %v1426_v26 = vadd.f32 %v3580_v24, %v1352_v36  ;;  %v724_v44 = vmul.f32 %v3743_v58, %v407_v23  ;;  %v422_v36 = vunpack.c.l.bf16 %v3827_v52 }
 0x138   : > { %v1647_v29 = vpop.f32.mrf.mxu1 }
 0x139   : > { %v1645_v35 = vadd.f32 %v1644_v21, %v1571_v12  ;;  %1546 = vmatmul.f32.gmra.mxu3 %v944_v53  ;;  %1868 = vmatmul.f32.gmra.mxu0 %v709_v51  ;;  %v959_v21 = vmul.f32 %v3314_v10, %v642_v18  ;;  %v222_v10 = vld [vmem:[%s2870_s23 + $0x28] sm:$0xff]  ;;  %v378_v51 = vunpack.c.h.bf16 %v3738_v3 }
 0x13a   : > { %1768 = vmatmul.f32.gmra.mxu2 %v947_v14  ;;  %v3812_v14 = vperm.slane %v2919_v16, 7  ;;  %v3824_v16 = vperm.slane %v3735_v2, 1 }
 0x13b   : > { %v3786_v28 = vadd.f32 %v1718_v61, %v1645_v35  ;;  %1694 = vmatmul.f32.gmra.mxu1 %v946_v55  ;;  %v2540_v61 = vld [vmem:[%s2870_s23 + $0x18] sm:$0xff]  ;;  %v1429_v55 = vadd.f32 %v3607_v43, %v1355_v17  ;;  %v1176_v43 = vld [vmem:[%s4726_s2 + $0x668] sm:$0xff] }
 0x13c   : > { %v1499_v42 = vpop.f32.mrf.mxu3  ;;  %v376_v34 = vunpack.c.h.bf16 %v2540_v61  ;;  %2147 = vmatpush.msrb.mxu0 %v1176_v43  ;;  %v695_v63 = vmul.f32 %v3824_v16, %v378_v51 }
 0x13d   : > { %v1500_v31 = vadd.f32 %v1499_v42, %v1426_v26  ;;  %v1721_v24 = vpop.f32.mrf.mxu2  ;;  %v230_v26 = vld [vmem:[%s2870_s23 + $0x64] sm:$0xff] }
 0x13e   : > { %v3807_v62 = vpop.f32.mrf.mxu0  ;;  %v1192_v42 = vld [vmem:[%s4726_s2 + $0x6e8] sm:$0xff]  ;;  %v394_v23 = vunpack.c.l.bf16 %v230_v26 }
 0x13f   : > { %v1574_v49 = vadd.f32 %v3686_v27, %v1500_v31  ;;  %v379_v27 = vunpack.c.l.bf16 %v222_v10  ;;  %v739_v31 = vmul.f32 %v3743_v58, %v422_v36  ;;  %2221 = vmatpush.msrb.mxu1 %v1192_v42 }
 0x140   : > { %v1650_v53 = vpop.f32.mrf.mxu1 }
 0x141   : > { %v1648_v12 = vadd.f32 %v1647_v29, %v1574_v49  ;;  %1549 = vmatmul.f32.gmra.mxu3 %v959_v21  ;;  %1871 = vmatmul.f32.gmra.mxu0 %v724_v44  ;;  %v693_v29 = vmul.f32 %v3812_v14, %v376_v34  ;;  %v696_v3 = vmul.f32 %v3817_v20, %v379_v27  ;;  %v3855_v44 = vld [vmem:[%s2870_s23 + $0x110] sm:$0xff]  ;;  %v1175_v27 = vld [vmem:[%s4726_s2 + $0x660] sm:$0xff] }
 0x142   : > { %1771 = vmatmul.f32.gmra.mxu2 %v962_v56  ;;  %v1432_v56 = vadd.f32 %v3634_v19, %v1358_v45  ;;  %v711_v34 = vmul.f32 %v3817_v20, %v394_v23  ;;  %2148 = vmatpush.msrb.mxu0 %v1175_v27  ;;  %v3895_v45 = vld [vmem:[%s2870_s23 + $0xdc] sm:$0xff] }
 0x143   : > { %v3820_v54 = vadd.f32 %v1721_v24, %v1648_v12  ;;  %1697 = vmatmul.f32.gmra.mxu1 %v961_v57  ;;  %v393_v57 = vunpack.c.h.bf16 %v3771_v40  ;;  %v3863_v12 = vld [vmem:[%s2870_s23 + $0xa0] sm:$0xff] }
 0x144   : > { %v1502_v48 = vpop.f32.mrf.mxu3  ;;  %v409_v43 = vunpack.c.l.bf16 %v3863_v12 }
 0x145   : > { %v1503_v60 = vadd.f32 %v1502_v48, %v1429_v55  ;;  %v1724_v18 = vpop.f32.mrf.mxu2  ;;  %v710_v17 = vmul.f32 %v3824_v16, %v393_v57  ;;  %v1158_v55 = vld [vmem:[%s4726_s2 + $0x5d8] sm:$0xff]  ;;  %v2543_v57 = vld [vmem:[%s2870_s23 + $0xcc] sm:$0xff] }
 0x146   : > { %v3838_v6 = vpop.f32.mrf.mxu0  ;;  %2075 = vmatpush.msrb.mxu3 %v1158_v55 }
 0x147   : > { %v1577_v35 = vadd.f32 %v3711_v7, %v1503_v60  ;;  %v2541_v7 = vld [vmem:[%s2870_s23 + $0x54] sm:$0xff] }
 0x148   : > { %v1653_v21 = vpop.f32.mrf.mxu1  ;;  %v391_v24 = vunpack.c.h.bf16 %v2541_v7  ;;  %v726_v7 = vmul.f32 %v3817_v20, %v409_v43 }
 0x149   : > { %v1651_v1 = vadd.f32 %v1650_v53, %v1577_v35  ;;  %1791 = vmatmul.f32.vlgmr.msra.gmra.mxu3 %v693_v29  ;;  %1874 = vmatmul.f32.gmra.mxu0 %v739_v31  ;;  %v437_v53 = vunpack.c.l.bf16 %v3855_v44  ;;  %v1197_v31 = vld [vmem:[%s4726_s2 + $0x710] sm:$0xff] }
 0x14a   : > { %2013 = vmatmul.f32.vlgmr.msra.gmra.mxu2 %v696_v3  ;;  %v708_v50 = vmul.f32 %v3812_v14, %v391_v24  ;;  %v408_v3 = vunpack.c.h.bf16 %v3793_v41 }
 0x14b   : > { %v3851_v49 = vadd.f32 %v1724_v18, %v1651_v1  ;;  %1939 = vmatmul.f32.vlgmr.msra.gmra.mxu1 %v695_v63  ;;  %v754_v51 = vmul.f32 %v3743_v58, %v437_v53  ;;  %v1191_v18 = vld [vmem:[%s4726_s2 + $0x6e0] sm:$0xff]  ;;  %v3883_v63 = vld [vmem:[%s2870_s23 + $0x14c] sm:$0xff]  ;;  %2306 = vmatpush.msrb.mxu2 %v1197_v31  ;;  %v438_v31 = vunpack.c.h.bf16 %v3855_v44 }
 0x14c   : > { %v1505_v10 = vpop.f32.mrf.mxu3  ;;  %2222 = vmatpush.msrb.mxu1 %v1191_v18  ;;  %v725_v24 = vmul.f32 %v3824_v16, %v408_v3 }
 0x14d   : > { %v1506_v61 = vadd.f32 %v1505_v10, %v1432_v56  ;;  %v1727_v11 = vpop.f32.mrf.mxu2  ;;  %v421_v10 = vunpack.c.h.bf16 %v2543_v57 }
 0x14e   : > { %v3865_v40 = vpop.f32.mrf.mxu0 }
 0x14f   : > { %v1580_v19 = vadd.f32 %v3746_v33, %v1506_v61  ;;  %v2542_v33 = vld [vmem:[%s2870_s23 + $0x90] sm:$0xff]  ;;  %v738_v55 = vmul.f32 %v3812_v14, %v421_v10 }
 0x150   : > { %v1656_v48 = vpop.f32.mrf.mxu1  ;;  %v406_v29 = vunpack.c.h.bf16 %v2542_v33 }
 0x151   : > { %v1654_v60 = vadd.f32 %v1653_v21, %v1580_v19  ;;  %1794 = vmatmul.f32.gmra.mxu3 %v708_v50  ;;  %1877 = vmatmul.f32.gmra.mxu0 %v754_v51  ;;  %v452_v21 = vunpack.c.l.bf16 %v3883_v63  ;;  %v1190_v50 = vld [vmem:[%s4726_s2 + $0x6d8] sm:$0xff] }
 0x152   : > { %2016 = vmatmul.f32.gmra.mxu2 %v711_v34  ;;  %v723_v13 = vmul.f32 %v3812_v14, %v406_v29  ;;  %v423_v34 = vunpack.c.h.bf16 %v3827_v52  ;;  %2223 = vmatpush.msrb.mxu1 %v1190_v50  ;;  %v3924_v52 = vld [vmem:[%s2870_s23 + $0x118] sm:$0xff] }
 0x153   : > { %v3879_v36 = vadd.f32 %v1727_v11, %v1654_v60  ;;  %1942 = vmatmul.f32.gmra.mxu1 %v710_v17  ;;  %v769_v23 = vmul.f32 %v3743_v58, %v452_v21  ;;  %v424_v11 = vunpack.c.l.bf16 %v3895_v45  ;;  %v3915_v17 = vld [vmem:[%s2870_s23 + $0x188] sm:$0xff] }
 0x154   : > { %v1508_v35 = vpop.f32.mrf.mxu3  ;;  %v740_v60 = vmul.f32 %v3824_v16, %v423_v34  ;;  %v1156_v21 = vld [vmem:[%s4726_s2 + $0x5c8] sm:$0xff] }
 0x155   : > { %v1509_v26 = vadd.f32 %v1508_v35, %v3382_v8  ;;  %v1730_v42 = vpop.f32.mrf.mxu2  ;;  %v1174_v8 = vld [vmem:[%s4726_s2 + $0x658] sm:$0xff]  ;;  %v741_v33 = vmul.f32 %v3817_v20, %v424_v11  ;;  %v2544_v35 = vld [vmem:[%s2870_s23 + $0x108] sm:$0xff] }
 0x156   : > { %v3897_v1 = vpop.f32.mrf.mxu0  ;;  %2149 = vmatpush.msrb.mxu0 %v1174_v8 }
 0x157   : > { %v1583_v41 = vadd.f32 %v3779_v0, %v1509_v26  ;;  %v1157_v0 = vld [vmem:[%s4726_s2 + $0x5d0] sm:$0xff] }
 0x158   : > { %v1659_v56 = vpop.f32.mrf.mxu1  ;;  %2076 = vmatpush.msrb.mxu3 %v1157_v0  ;;  %v3953_v0 = vld [vmem:[%s2870_s23 + $0x154] sm:$0xff] }
 0x159   : > { %v1657_v61 = vadd.f32 %v1656_v48, %v1583_v41  ;;  %1797 = vmatmul.f32.gmra.mxu3 %v723_v13  ;;  %1880 = vmatmul.f32.gmra.mxu0 %v769_v23  ;;  %v467_v48 = vunpack.c.l.bf16 %v3915_v17  ;;  %v1173_v13 = vld [vmem:[%s4726_s2 + $0x650] sm:$0xff] }
 0x15a   : > { %2019 = vmatmul.f32.gmra.mxu2 %v726_v7  ;;  %2150 = vmatpush.msrb.mxu0 %v1173_v13  ;;  %v1189_v7 = vld [vmem:[%s4726_s2 + $0x6d0] sm:$0xff] }
 0x15b   : > { %v3911_v53 = vadd.f32 %v1730_v42, %v1657_v61  ;;  %1945 = vmatmul.f32.gmra.mxu1 %v725_v24  ;;  %v784_v43 = vmul.f32 %v3743_v58, %v467_v48  ;;  %2077 = vmatpush.msrb.mxu3 %v1156_v21  ;;  %v3944_v24 = vld [vmem:[%s2870_s23 + $0x1c4] sm:$0xff]  ;;  %v755_v61 = vmul.f32 %v3824_v16, %v438_v31 }
 0x15c   : > { %v1511_v19 = vpop.f32.mrf.mxu3  ;;  %2224 = vmatpush.msrb.mxu1 %v1189_v7  ;;  %v1172_v48 = vld [vmem:[%s4726_s2 + $0x648] sm:$0xff] }
 0x15d   : > { %v1512_v27 = vadd.f32 %v1511_v19, %v3406_v32  ;;  %v1733_v51 = vpop.f32.mrf.mxu2  ;;  %v436_v32 = vunpack.c.h.bf16 %v2544_v35  ;;  %2151 = vmatpush.msrb.mxu0 %v1172_v48  ;;  %v1188_v35 = vld [vmem:[%s4726_s2 + $0x6c8] sm:$0xff] }
 0x15e   : > { %v3926_v18 = vpop.f32.mrf.mxu0  ;;  %2225 = vmatpush.msrb.mxu1 %v1188_v35 }
 0x15f   : > { %v1586_v29 = vadd.f32 %v3807_v62, %v1512_v27  ;;  %v439_v62 = vunpack.c.l.bf16 %v3924_v52  ;;  %v753_v23 = vmul.f32 %v3812_v14, %v436_v32 }
 0x160   : > { %v1662_v3 = vpop.f32.mrf.mxu1 }
 0x161   : > { %v1660_v26 = vadd.f32 %v1659_v56, %v1586_v29  ;;  %1800 = vmatmul.f32.gmra.mxu3 %v738_v55  ;;  %1883 = vmatmul.f32.gmra.mxu0 %v784_v43  ;;  %v482_v56 = vunpack.c.l.bf16 %v3944_v24  ;;  %v756_v57 = vmul.f32 %v3817_v20, %v439_v62  ;;  %v454_v55 = vunpack.c.l.bf16 %v3953_v0  ;;  %v3967_v29 = vld [vmem:[%s2870_s23 + $0x200] sm:$0xff]  ;;  %v3982_v62 = vld [vmem:[%s2870_s23 + $0x190] sm:$0xff] }
 0x162   : > { %2022 = vmatmul.f32.gmra.mxu2 %v741_v33  ;;  %v497_v32 = vunpack.c.l.bf16 %v3967_v29 }
 0x163   : > { %v3934_v42 = vadd.f32 %v1733_v51, %v1660_v26  ;;  %1948 = vmatmul.f32.gmra.mxu1 %v740_v60  ;;  %v799_v11 = vmul.f32 %v3743_v58, %v482_v56  ;;  %v771_v26 = vmul.f32 %v3817_v20, %v454_v55 }
 0x164   : > { %v1514_v41 = vpop.f32.mrf.mxu3  ;;  %v814_v21 = vmul.f32 %v3743_v58, %v497_v32 }
 0x165   : > { %v1515_v8 = vadd.f32 %v1514_v41, %v3433_v4  ;;  %v1736_v44 = vpop.f32.mrf.mxu2  ;;  %v2545_v4 = vld [vmem:[%s2870_s23 + $0x144] sm:$0xff] }
 0x166   : > { %v3955_v50 = vpop.f32.mrf.mxu0  ;;  %v451_v19 = vunpack.c.h.bf16 %v2545_v4  ;;  %v2546_v41 = vld [vmem:[%s2870_s23 + $0x180] sm:$0xff] }
 0x167   : > { %v1589_v10 = vadd.f32 %v3838_v6, %v1515_v8  ;;  %v453_v6 = vunpack.c.h.bf16 %v3883_v63  ;;  %v1155_v63 = vld [vmem:[%s4726_s2 + $0x5c0] sm:$0xff]  ;;  %v466_v8 = vunpack.c.h.bf16 %v2546_v41 }
 0x168   : > { %v1665_v34 = vpop.f32.mrf.mxu1  ;;  %v768_v43 = vmul.f32 %v3812_v14, %v451_v19  ;;  %2078 = vmatpush.msrb.mxu3 %v1155_v63  ;;  %v1171_v4 = vld [vmem:[%s4726_s2 + $0x640] sm:$0xff]  ;;  %v1154_v19 = vld [vmem:[%s4726_s2 + $0x5b8] sm:$0xff] }
 0x169   : > { %v1663_v27 = vadd.f32 %v1662_v3, %v1589_v10  ;;  %1803 = vmatmul.f32.gmra.mxu3 %v753_v23  ;;  %1886 = vmatmul.f32.gmra.mxu0 %v799_v11  ;;  %v3993_v10 = vld [vmem:[%s2870_s23 + $0x23c] sm:$0xff]  ;;  %v783_v11 = vmul.f32 %v3812_v14, %v466_v8 }
 0x16a   : > { %2025 = vmatmul.f32.gmra.mxu2 %v756_v57  ;;  %2152 = vmatpush.msrb.mxu0 %v1171_v4 }
 0x16b   : > { %v3960_v51 = vadd.f32 %v1736_v44, %v1663_v27  ;;  %1951 = vmatmul.f32.gmra.mxu1 %v755_v61  ;;  %v469_v44 = vunpack.c.l.bf16 %v3982_v62  ;;  %2079 = vmatpush.msrb.mxu3 %v1154_v19 }
 0x16c   : > { %v1517_v33 = vpop.f32.mrf.mxu3 }
 0x16d   : > { %v1518_v60 = vadd.f32 %v1517_v33, %v3460_v47  ;;  %v1739_v3 = vpop.f32.mrf.mxu2  ;;  %v770_v47 = vmul.f32 %v3824_v16, %v453_v6  ;;  %v786_v27 = vmul.f32 %v3817_v20, %v469_v44  ;;  %v4008_v6 = vld [vmem:[%s2870_s23 + $0x1cc] sm:$0xff]  ;;  %v1187_v33 = vld [vmem:[%s4726_s2 + $0x6c0] sm:$0xff] }
 0x16e   : > { %v3984_v31 = vpop.f32.mrf.mxu0  ;;  %2226 = vmatpush.msrb.mxu1 %v1187_v33  ;;  %v498_v33 = vunpack.c.h.bf16 %v3967_v29 }
 0x16f   : > { %v1592_v13 = vadd.f32 %v3865_v40, %v1518_v60  ;;  %v468_v40 = vunpack.c.h.bf16 %v3915_v17  ;;  %v512_v17 = vunpack.c.l.bf16 %v3993_v10 }
 0x170   : > { %v1668_v7 = vpop.f32.mrf.mxu1 }
 0x171   : > { %v1666_v23 = vadd.f32 %v1665_v34, %v1592_v13  ;;  %1806 = vmatmul.f32.gmra.mxu3 %v768_v43  ;;  %1889 = vmatmul.f32.gmra.mxu0 %v814_v21  ;;  %v785_v55 = vmul.f32 %v3824_v16, %v468_v40  ;;  %v829_v60 = vmul.f32 %v3743_v58, %v512_v17  ;;  %v1196_v13 = vld [vmem:[%s4726_s2 + $0x708] sm:$0xff]  ;;  %v4025_v21 = vld [vmem:[%s2870_s23 + $0x278] sm:$0xff] }
 0x172   : > { %2028 = vmatmul.f32.gmra.mxu2 %v771_v26  ;;  %v483_v26 = vunpack.c.h.bf16 %v3944_v24  ;;  %v527_v24 = vunpack.c.l.bf16 %v4025_v21 }
 0x173   : > { %v3989_v56 = vadd.f32 %v1739_v3, %v1666_v23  ;;  %1954 = vmatmul.f32.gmra.mxu1 %v770_v47  ;;  %v2547_v3 = vld [vmem:[%s2870_s23 + $0x1bc] sm:$0xff]  ;;  %2307 = vmatpush.msrb.mxu2 %v1196_v13 }
 0x174   : > { %v1520_v57 = vpop.f32.mrf.mxu3  ;;  %v481_v63 = vunpack.c.h.bf16 %v2547_v3  ;;  %v1170_v23 = vld [vmem:[%s4726_s2 + $0x638] sm:$0xff]  ;;  %v844_v4 = vmul.f32 %v3743_v58, %v527_v24 }
 0x175   : > { %v1521_v61 = vadd.f32 %v1520_v57, %v3484_v59  ;;  %v1742_v34 = vpop.f32.mrf.mxu2  ;;  %2153 = vmatpush.msrb.mxu0 %v1170_v23  ;;  %v800_v57 = vmul.f32 %v3824_v16, %v483_v26  ;;  %v4054_v3 = vld [vmem:[%s2870_s23 + $0x2b4] sm:$0xff] }
 0x176   : > { %v4010_v48 = vpop.f32.mrf.mxu0  ;;  %v798_v41 = vmul.f32 %v3812_v14, %v481_v63  ;;  %v2549_v24 = vld [vmem:[%s2870_s23 + $0x234] sm:$0xff] }
 0x177   : > { %v1595_v59 = vadd.f32 %v3897_v1, %v1521_v61  ;;  %v484_v1 = vunpack.c.l.bf16 %v4008_v6  ;;  %v4037_v61 = vld [vmem:[%s2870_s23 + $0x208] sm:$0xff] }
 0x178   : > { %v1671_v43 = vpop.f32.mrf.mxu1 }
 0x179   : > { %v1669_v35 = vadd.f32 %v1668_v7, %v1595_v59  ;;  %1809 = vmatmul.f32.gmra.mxu3 %v783_v11  ;;  %1892 = vmatmul.f32.gmra.mxu0 %v829_v60  ;;  %v801_v44 = vmul.f32 %v3817_v20, %v484_v1  ;;  %v1153_v11 = vld [vmem:[%s4726_s2 + $0x5b0] sm:$0xff]  ;;  %v499_v59 = vunpack.c.l.bf16 %v4037_v61  ;;  %v542_v1 = vunpack.c.l.bf16 %v4054_v3 }
 0x17a   : > { %2031 = vmatmul.f32.gmra.mxu2 %v786_v27  ;;  %2080 = vmatpush.msrb.mxu3 %v1153_v11 }
 0x17b   : > { %v4018_v32 = vadd.f32 %v1742_v34, %v1669_v35  ;;  %1957 = vmatmul.f32.gmra.mxu1 %v785_v55  ;;  %v1186_v34 = vld [vmem:[%s4726_s2 + $0x6b8] sm:$0xff]  ;;  %v816_v26 = vmul.f32 %v3817_v20, %v499_v59 }
 0x17c   : > { %v1523_v47 = vpop.f32.mrf.mxu3  ;;  %2227 = vmatpush.msrb.mxu1 %v1186_v34  ;;  %v513_v34 = vunpack.c.h.bf16 %v3993_v10  ;;  %v4092_v10 = vld [vmem:[%s2870_s23 + $0x280] sm:$0xff] }
 0x17d   : > { %v1524_v7 = vadd.f32 %v1523_v47, %v3508_v5  ;;  %v1745_v8 = vpop.f32.mrf.mxu2  ;;  %v815_v47 = vmul.f32 %v3824_v16, %v498_v33 }
 0x17e   : > { %v4039_v5 = vpop.f32.mrf.mxu0 }
 0x17f   : > { %v1598_v40 = vadd.f32 %v3926_v18, %v1524_v7  ;;  %v2548_v18 = vld [vmem:[%s2870_s23 + $0x1f8] sm:$0xff]  ;;  %v4063_v7 = vld [vmem:[%s2870_s23 + $0x244] sm:$0xff] }
 0x180   : > { %v1674_v19 = vpop.f32.mrf.mxu1  ;;  %v496_v17 = vunpack.c.h.bf16 %v2548_v18 }
 0x181   : > { %v1672_v27 = vadd.f32 %v1671_v43, %v1598_v40  ;;  %1812 = vmatmul.f32.gmra.mxu3 %v798_v41  ;;  %1895 = vmatmul.f32.gmra.mxu0 %v844_v4  ;;  %v1169_v41 = vld [vmem:[%s4726_s2 + $0x630] sm:$0xff] }
 0x182   : > { %2034 = vmatmul.f32.gmra.mxu2 %v801_v44  ;;  %v813_v35 = vmul.f32 %v3812_v14, %v496_v17  ;;  %2154 = vmatpush.msrb.mxu0 %v1169_v41  ;;  %v511_v44 = vunpack.c.h.bf16 %v2549_v24  ;;  %v1185_v40 = vld [vmem:[%s4726_s2 + $0x6b0] sm:$0xff] }
 0x183   : > { %v4050_v55 = vadd.f32 %v1745_v8, %v1672_v27  ;;  %1960 = vmatmul.f32.gmra.mxu1 %v800_v57  ;;  %v514_v57 = vunpack.c.l.bf16 %v4063_v7 }
 0x184   : > { %v1526_v60 = vpop.f32.mrf.mxu3  ;;  %2228 = vmatpush.msrb.mxu1 %v1185_v40  ;;  %v828_v17 = vmul.f32 %v3812_v14, %v511_v44  ;;  %v4112_v44 = vld [vmem:[%s2870_s23 + $0x32c] sm:$0xff] }
 0x185   : > { %v1527_v63 = vadd.f32 %v1526_v60, %v3532_v46  ;;  %v1748_v43 = vpop.f32.mrf.mxu2  ;;  %v859_v46 = vmul.f32 %v3743_v58, %v542_v1  ;;  %v831_v33 = vmul.f32 %v3817_v20, %v514_v57  ;;  %v572_v57 = vunpack.c.l.bf16 %v4112_v44 }
 0x186   : > { %v4065_v29 = vpop.f32.mrf.mxu0 }
 0x187   : > { %v1601_v13 = vadd.f32 %v3955_v50, %v1527_v63  ;;  %v1152_v50 = vld [vmem:[%s4726_s2 + $0x5a8] sm:$0xff]  ;;  %v830_v63 = vmul.f32 %v3824_v16, %v513_v34 }
 0x188   : > { %v1677_v8 = vpop.f32.mrf.mxu1  ;;  %2081 = vmatpush.msrb.mxu3 %v1152_v50 }
 0x189   : > { %v1675_v23 = vadd.f32 %v1674_v19, %v1601_v13  ;;  %1815 = vmatmul.f32.gmra.mxu3 %v813_v35  ;;  %1898 = vmatmul.f32.gmra.mxu0 %v859_v46  ;;  %v4083_v19 = vld [vmem:[%s2870_s23 + $0x2f0] sm:$0xff]  ;;  %v528_v46 = vunpack.c.h.bf16 %v4025_v21 }
 0x18a   : > { %2037 = vmatmul.f32.gmra.mxu2 %v816_v26  ;;  %v557_v59 = vunpack.c.l.bf16 %v4083_v19 }
 0x18b   : > { %v4079_v11 = vadd.f32 %v1748_v43, %v1675_v23  ;;  %1963 = vmatmul.f32.gmra.mxu1 %v815_v47  ;;  %v1168_v47 = vld [vmem:[%s4726_s2 + $0x628] sm:$0xff] }
 0x18c   : > { %v1529_v4 = vpop.f32.mrf.mxu3  ;;  %v874_v43 = vmul.f32 %v3743_v58, %v557_v59  ;;  %2155 = vmatpush.msrb.mxu0 %v1168_v47  ;;  %v1184_v23 = vld [vmem:[%s4726_s2 + $0x6a8] sm:$0xff]  ;;  %v889_v59 = vmul.f32 %v3743_v58, %v572_v57 }
 0x18d   : > { %v1530_v18 = vadd.f32 %v1529_v4, %v3556_v22  ;;  %v1751_v27 = vpop.f32.mrf.mxu2  ;;  %v2550_v22 = vld [vmem:[%s2870_s23 + $0x270] sm:$0xff]  ;;  %2229 = vmatpush.msrb.mxu1 %v1184_v23  ;;  %v4138_v47 = vld [vmem:[%s2870_s23 + $0x368] sm:$0xff] }
 0x18e   : > { %v4094_v35 = vpop.f32.mrf.mxu0  ;;  %v526_v13 = vunpack.c.h.bf16 %v2550_v22  ;;  %v1167_v22 = vld [vmem:[%s4726_s2 + $0x620] sm:$0xff]  ;;  %v587_v23 = vunpack.c.l.bf16 %v4138_v47 }
 0x18f   : > { %v1604_v60 = vadd.f32 %v3984_v31, %v1530_v18  ;;  %v529_v31 = vunpack.c.l.bf16 %v4092_v10  ;;  %v845_v18 = vmul.f32 %v3824_v16, %v528_v46  ;;  %2156 = vmatpush.msrb.mxu0 %v1167_v22 }
 0x190   : > { %v1680_v1 = vpop.f32.mrf.mxu1  ;;  %v843_v40 = vmul.f32 %v3812_v14, %v526_v13 }
 0x191   : > { %v1678_v26 = vadd.f32 %v1677_v8, %v1604_v60  ;;  %1818 = vmatmul.f32.gmra.mxu3 %v828_v17  ;;  %1901 = vmatmul.f32.gmra.mxu0 %v874_v43  ;;  %v1151_v8 = vld [vmem:[%s4726_s2 + $0x5a0] sm:$0xff]  ;;  %v846_v34 = vmul.f32 %v3817_v20, %v529_v31  ;;  %v2551_v60 = vld [vmem:[%s2870_s23 + $0x2ac] sm:$0xff] }
 0x192   : > { %2040 = vmatmul.f32.gmra.mxu2 %v831_v33  ;;  %2082 = vmatpush.msrb.mxu3 %v1151_v8  ;;  %v4121_v17 = vld [vmem:[%s2870_s23 + $0x2bc] sm:$0xff] }
 0x193   : > { %v4102_v41 = vadd.f32 %v1751_v27, %v1678_v26  ;;  %1966 = vmatmul.f32.gmra.mxu1 %v830_v63  ;;  %v541_v63 = vunpack.c.h.bf16 %v2551_v60  ;;  %v544_v43 = vunpack.c.l.bf16 %v4121_v17  ;;  %v1183_v8 = vld [vmem:[%s4726_s2 + $0x6a0] sm:$0xff] }
 0x194   : > { %v1532_v24 = vpop.f32.mrf.mxu3  ;;  %2230 = vmatpush.msrb.mxu1 %v1183_v8 }
 0x195   : > { %v1533_v50 = vadd.f32 %v1532_v24, %v3583_v9  ;;  %v1754_v21 = vpop.f32.mrf.mxu2  ;;  %v861_v24 = vmul.f32 %v3817_v20, %v544_v43 }
 0x196   : > { %v4123_v27 = vpop.f32.mrf.mxu0 }
 0x197   : > { %v1607_v4 = vadd.f32 %v4010_v48, %v1533_v50  ;;  %v543_v48 = vunpack.c.h.bf16 %v4054_v3  ;;  %v858_v3 = vmul.f32 %v3812_v14, %v541_v63  ;;  %v558_v63 = vunpack.c.h.bf16 %v4083_v19  ;;  %v1149_v19 = vld [vmem:[%s4726_s2 + $0x590] sm:$0xff] }
 0x198   : > { %v1683_v33 = vpop.f32.mrf.mxu1 }
 0x199   : > { %v1681_v9 = vadd.f32 %v1680_v1, %v1607_v4  ;;  %1821 = vmatmul.f32.gmra.mxu3 %v843_v40  ;;  %1904 = vmatmul.f32.gmra.mxu0 %v889_v59  ;;  %v1150_v1 = vld [vmem:[%s4726_s2 + $0x598] sm:$0xff]  ;;  %v860_v40 = vmul.f32 %v3824_v16, %v543_v48  ;;  %v4167_v48 = vld [vmem:[%s2870_s23 + $0x3a4] sm:$0xff]  ;;  %v875_v8 = vmul.f32 %v3824_v16, %v558_v63 }
 0x19a   : > { %2043 = vmatmul.f32.gmra.mxu2 %v846_v34  ;;  %2083 = vmatpush.msrb.mxu3 %v1150_v1  ;;  %v4193_v63 = vld [vmem:[%s2870_s23 + $0x3e0] sm:$0xff] }
 0x19b   : > { %v4128_v26 = vadd.f32 %v1754_v21, %v1681_v9  ;;  %1969 = vmatmul.f32.gmra.mxu1 %v845_v18  ;;  %v4150_v21 = vld [vmem:[%s2870_s23 + $0x2f8] sm:$0xff]  ;;  %v2552_v18 = vld [vmem:[%s2870_s23 + $0x2e8] sm:$0xff]  ;;  %v1195_v9 = vld [vmem:[%s4726_s2 + $0x700] sm:$0xff] }
 0x19c   : > { %v1535_v13 = vpop.f32.mrf.mxu3  ;;  %v556_v59 = vunpack.c.h.bf16 %v2552_v18  ;;  %2308 = vmatpush.msrb.mxu2 %v1195_v9  ;;  %2084 = vmatpush.msrb.mxu3 %v1149_v19 }
 0x19d   : > { %v1536_v31 = vadd.f32 %v1535_v13, %v3610_v39  ;;  %v1757_v46 = vpop.f32.mrf.mxu2  ;;  %v904_v39 = vmul.f32 %v3743_v58, %v587_v23  ;;  %v4182_v23 = vld [vmem:[%s2870_s23 + $0x334] sm:$0xff] }
 0x19e   : > { %v4153_v34 = vpop.f32.mrf.mxu0  ;;  %v873_v1 = vmul.f32 %v3812_v14, %v556_v59  ;;  %v574_v59 = vunpack.c.l.bf16 %v4182_v23 }
 0x19f   : > { %v1610_v50 = vadd.f32 %v4039_v5, %v1536_v31  ;;  %v559_v5 = vunpack.c.l.bf16 %v4150_v21  ;;  %v1182_v31 = vld [vmem:[%s4726_s2 + $0x698] sm:$0xff] }
 0x1a0   : > { %v1686_v57 = vpop.f32.mrf.mxu1  ;;  %2231 = vmatpush.msrb.mxu1 %v1182_v31  ;;  %v4205_v31 = vld [vmem:[%s2870_s23 + $0x370] sm:$0xff] }
 0x1a1   : > { %v1684_v4 = vadd.f32 %v1683_v33, %v1610_v50  ;;  %1824 = vmatmul.f32.gmra.mxu3 %v858_v3  ;;  %1907 = vmatmul.f32.gmra.mxu0 %v904_v39  ;;  %v1166_v33 = vld [vmem:[%s4726_s2 + $0x618] sm:$0xff]  ;;  %v602_v3 = vunpack.c.l.bf16 %v4167_v48 }
 0x1a2   : > { %2046 = vmatmul.f32.gmra.mxu2 %v861_v24  ;;  %2157 = vmatpush.msrb.mxu0 %v1166_v33 }
 0x1a3   : > { %v4160_v60 = vadd.f32 %v1757_v46, %v1684_v4  ;;  %1972 = vmatmul.f32.gmra.mxu1 %v860_v40  ;;  %v876_v46 = vmul.f32 %v3817_v20, %v559_v5  ;;  %v919_v24 = vmul.f32 %v3743_v58, %v602_v3  ;;  %v2553_v4 = vld [vmem:[%s2870_s23 + $0x324] sm:$0xff]  ;;  %v1181_v3 = vld [vmem:[%s4726_s2 + $0x690] sm:$0xff] }
 0x1a4   : > { %v1538_v43 = vpop.f32.mrf.mxu3  ;;  %v571_v18 = vunpack.c.h.bf16 %v2553_v4  ;;  %2232 = vmatpush.msrb.mxu1 %v1181_v3  ;;  %v589_v4 = vunpack.c.l.bf16 %v4205_v31 }
 0x1a5   : > { %v1539_v22 = vadd.f32 %v1538_v43, %v3640_v30  ;;  %v1760_v13 = vpop.f32.mrf.mxu2 }
 0x1a6   : > { %v4185_v40 = vpop.f32.mrf.mxu0 }
 0x1a7   : > { %v1613_v30 = vadd.f32 %v4065_v29, %v1539_v22  ;;  %v573_v29 = vunpack.c.h.bf16 %v4112_v44  ;;  %v1165_v22 = vld [vmem:[%s4726_s2 + $0x610] sm:$0xff] }
 0x1a8   : > { %v1689_v50 = vpop.f32.mrf.mxu1  ;;  %2158 = vmatpush.msrb.mxu0 %v1165_v22 }
 0x1a9   : > { %v1687_v39 = vadd.f32 %v1686_v57, %v1613_v30  ;;  %1827 = vmatmul.f32.gmra.mxu3 %v873_v1  ;;  %1910 = vmatmul.f32.gmra.mxu0 %v919_v24  ;;  %v888_v57 = vmul.f32 %v3812_v14, %v571_v18  ;;  %v617_v1 = vunpack.c.l.bf16 %v4193_v63  ;;  %v890_v19 = vmul.f32 %v3824_v16, %v573_v29  ;;  %v2554_v24 = vld [vmem:[%s2870_s23 + $0x360] sm:$0xff] }
 0x1aa   : > { %2049 = vmatmul.f32.gmra.mxu2 %v876_v46 }
 0x1ab   : > { %v4189_v9 = vadd.f32 %v1760_v13, %v1687_v39  ;;  %1975 = vmatmul.f32.gmra.mxu1 %v875_v8  ;;  %v891_v13 = vmul.f32 %v3817_v20, %v574_v59  ;;  %v934_v46 = vmul.f32 %v3743_v58, %v617_v1  ;;  %v586_v39 = vunpack.c.h.bf16 %v2554_v24  ;;  %v1180_v24 = vld [vmem:[%s4726_s2 + $0x688] sm:$0xff] }
 0x1ac   : > { %v1541_v5 = vpop.f32.mrf.mxu3  ;;  %v588_v59 = vunpack.c.h.bf16 %v4138_v47  ;;  %v906_v1 = vmul.f32 %v3817_v20, %v589_v4  ;;  %v1164_v47 = vld [vmem:[%s4726_s2 + $0x608] sm:$0xff]  ;;  %2233 = vmatpush.msrb.mxu1 %v1180_v24 }
 0x1ad   : > { %v1542_v33 = vadd.f32 %v1541_v5, %v3661_v15  ;;  %v1763_v43 = vpop.f32.mrf.mxu2  ;;  %v1148_v15 = vld [vmem:[%s4726_s2 + $0x588] sm:$0xff]  ;;  %v4222_v5 = vld [vmem:[%s2870_s23 + $0x41c] sm:$0xff]  ;;  %2159 = vmatpush.msrb.mxu0 %v1164_v47 }
 0x1ae   : > { %v4214_v8 = vpop.f32.mrf.mxu0  ;;  %2085 = vmatpush.msrb.mxu3 %v1148_v15  ;;  %v632_v22 = vunpack.c.l.bf16 %v4222_v5 }
 0x1af   : > { %v1616_v44 = vadd.f32 %v4094_v35, %v1542_v33 }
 0x1b0   : > { %v1692_v30 = vpop.f32.mrf.mxu1 }
 0x1b1   : > { %v1690_v35 = vadd.f32 %v1689_v50, %v1616_v44  ;;  %1830 = vmatmul.f32.gmra.mxu3 %v888_v57  ;;  %1913 = vmatmul.f32.gmra.mxu0 %v934_v46  ;;  %v903_v50 = vmul.f32 %v3812_v14, %v586_v39  ;;  %v4231_v44 = vld [vmem:[%s2870_s23 + $0x3ac] sm:$0xff]  ;;  %v2555_v46 = vld [vmem:[%s2870_s23 + $0x39c] sm:$0xff] }
 0x1b2   : > { %2052 = vmatmul.f32.gmra.mxu2 %v891_v13  ;;  %v905_v13 = vmul.f32 %v3824_v16, %v588_v59  ;;  %v604_v39 = vunpack.c.l.bf16 %v4231_v44 }
 0x1b3   : > { %v4218_v18 = vadd.f32 %v1763_v43, %v1690_v35  ;;  %1978 = vmatmul.f32.gmra.mxu1 %v890_v19  ;;  %v949_v19 = vmul.f32 %v3743_v58, %v632_v22  ;;  %v601_v35 = vunpack.c.h.bf16 %v2555_v46  ;;  %v2556_v46 = vld [vmem:[%s2870_s23 + $0x3d8] sm:$0xff] }
 0x1b4   : > { %v1544_v29 = vpop.f32.mrf.mxu3 }
 0x1b5   : > { %v1545_v33 = vadd.f32 %v1544_v29, %v3688_v25  ;;  %v1766_v57 = vpop.f32.mrf.mxu2  ;;  %v4251_v29 = vld [vmem:[%s2870_s23 + $0x458] sm:$0xff] }
 0x1b6   : > { %v4237_v15 = vpop.f32.mrf.mxu0 }
 0x1b7   : > { %v1619_v43 = vadd.f32 %v4123_v27, %v1545_v33  ;;  %v1147_v27 = vld [vmem:[%s4726_s2 + $0x580] sm:$0xff] }
 0x1b8   : > { %v1695_v25 = vpop.f32.mrf.mxu1  ;;  %2086 = vmatpush.msrb.mxu3 %v1147_v27  ;;  %v1163_v27 = vld [vmem:[%s4726_s2 + $0x600] sm:$0xff] }
 0x1b9   : > { %v1693_v3 = vadd.f32 %v1692_v30, %v1619_v43  ;;  %1833 = vmatmul.f32.gmra.mxu3 %v903_v50  ;;  %v603_v30 = vunpack.c.h.bf16 %v4167_v48  ;;  %1916 = vmatmul.f32.gmra.mxu0 %v949_v19  ;;  %v918_v50 = vmul.f32 %v3812_v14, %v601_v35  ;;  %v921_v43 = vmul.f32 %v3817_v20, %v604_v39  ;;  %v4260_v48 = vld [vmem:[%s2870_s23 + $0x3e8] sm:$0xff] }
 0x1ba   : > { %2055 = vmatmul.f32.gmra.mxu2 %v906_v1  ;;  %v647_v1 = vunpack.c.l.bf16 %v4251_v29  ;;  %v616_v35 = vunpack.c.h.bf16 %v2556_v46  ;;  %2160 = vmatpush.msrb.mxu0 %v1163_v27 }
 0x1bb   : > { %v4247_v4 = vadd.f32 %v1766_v57, %v1693_v3  ;;  %1981 = vmatmul.f32.gmra.mxu1 %v905_v13  ;;  %v920_v13 = vmul.f32 %v3824_v16, %v603_v30  ;;  %v4277_v30 = vld [vmem:[%s2870_s23 + $0x30] sm:$0xff] }
 0x1bc   : > { %v1547_v59 = vpop.f32.mrf.mxu3  ;;  %v964_v47 = vmul.f32 %v3743_v58, %v647_v1  ;;  %v618_v58 = vunpack.c.h.bf16 %v4193_v63  ;;  %v4284_v63 = vperm.slane %v3735_v2, 4 }
 0x1bd   : > { %v1548_v33 = vadd.f32 %v1547_v59, %v3714_v37  ;;  %v1769_v22 = vpop.f32.mrf.mxu2 }
 0x1be   : > { %v4263_v3 = vpop.f32.mrf.mxu0 }
 0x1bf   : > { %v1622_v57 = vadd.f32 %v4153_v34, %v1548_v33  ;;  %v619_v34 = vunpack.c.l.bf16 %v4260_v48  ;;  %v933_v33 = vmul.f32 %v3812_v14, %v616_v35  ;;  %v2557_v35 = vld [vmem:[%s2870_s23 + $0x414] sm:$0xff] }
 0x1c0   : > { %v1698_v19 = vpop.f32.mrf.mxu1  ;;  %v631_v27 = vunpack.c.h.bf16 %v2557_v35  ;;  %v2558_v35 = vld [vmem:[%s2870_s23 + $0x450] sm:$0xff] }
 0x1c1   : > { %v1696_v37 = vadd.f32 %v1695_v25, %v1622_v57  ;;  %1836 = vmatmul.f32.gmra.mxu3 %v918_v50  ;;  %1919 = vmatmul.f32.gmra.mxu0 %v964_v47  ;;  %v1179_v25 = vld [vmem:[%s4726_s2 + $0x680] sm:$0xff]  ;;  %v936_v1 = vmul.f32 %v3817_v20, %v619_v34  ;;  %v935_v57 = vmul.f32 %v3824_v16, %v618_v58 }
 0x1c2   : > { %2058 = vmatmul.f32.gmra.mxu2 %v921_v43  ;;  %2234 = vmatpush.msrb.mxu1 %v1179_v25 }
 0x1c3   : > { %v4270_v24 = vadd.f32 %v1769_v22, %v1696_v37  ;;  %1984 = vmatmul.f32.gmra.mxu1 %v920_v13  ;;  %v381_v22 = vunpack.c.l.bf16 %v4277_v30  ;;  %v4289_v13 = vld [vmem:[%s2870_s23 + $0x424] sm:$0xff] }
 0x1c4   : > { %v1550_v39 = vpop.f32.mrf.mxu3  ;;  %v634_v34 = vunpack.c.l.bf16 %v4289_v13 }
 0x1c5   : > { %v1551_v59 = vadd.f32 %v1550_v39, %v3748_v38  ;;  %v1772_v50 = vpop.f32.mrf.mxu2  ;;  %v698_v38 = vmul.f32 %v4284_v63, %v381_v22  ;;  %v4300_v39 = vld [vmem:[%s2870_s23 + $0x6c] sm:$0xff] }
 0x1c6   : > { %v4291_v37 = vpop.f32.mrf.mxu0  ;;  %v396_v22 = vunpack.c.l.bf16 %v4300_v39 }
 0x1c7   : > { %v1625_v43 = vadd.f32 %v4185_v40, %v1551_v59  ;;  %v633_v40 = vunpack.c.h.bf16 %v4222_v5  ;;  %v4309_v5 = vld [vmem:[%s2870_s23 + $0x460] sm:$0xff] }
 0x1c8   : > { %v1940_v47 = vpop.f32.mrf.mxu1  ;;  %4731 = vst [vmem:[#allocation2_spill] sm:$0xff] %v4309_v5 }
 0x1c9   : > { %v1699_v46 = vadd.f32 %v1698_v19, %v1625_v43  ;;  %1839 = vmatmul.f32.gmra.mxu3 %v933_v33  ;;  %2161 = vmatmul.f32.vlgmr.msrb.gmra.mxu0 %v698_v38  ;;  %v948_v19 = vmul.f32 %v3812_v14, %v631_v27  ;;  %v950_v43 = vmul.f32 %v3824_v16, %v633_v40  ;;  %v646_v27 = vunpack.c.h.bf16 %v2558_v35 }
 0x1ca   : > { %2061 = vmatmul.f32.gmra.mxu2 %v936_v1  ;;  %v951_v1 = vmul.f32 %v3817_v20, %v634_v34  ;;  %v649_v34 = vunpack.c.l.bf16 %v4309_v5 }
 0x1cb   : > { %v4296_v25 = vadd.f32 %v1772_v50, %v1699_v46  ;;  %1987 = vmatmul.f32.gmra.mxu1 %v935_v57  ;;  %v713_v57 = vmul.f32 %v4284_v63, %v396_v22 }
 0x1cc   : > { %v1792_v58 = vpop.f32.mrf.mxu3 }
 0x1cd   : > { %v1793_v59 = vadd.f32 %v1792_v58, %v3786_v28  ;;  %v2014_v33 = vpop.f32.mrf.mxu2 }
 0x1ce   : > { %v4312_v46 = vpop.f32.mrf.mxu0 }
 0x1cf   : > { %v1867_v50 = vadd.f32 %v4214_v8, %v1793_v59  ;;  %v648_v8 = vunpack.c.h.bf16 %v4251_v29  ;;  %v4320_v59 = vld [vmem:[%s2870_s23 + $0xa8] sm:$0xff] }
 0x1d0   : > { %v1943_v38 = vpop.f32.mrf.mxu1 }
 0x1d1   : > { %v1941_v28 = vadd.f32 %v1940_v47, %v1867_v50  ;;  %1842 = vmatmul.f32.gmra.mxu3 %v948_v19  ;;  %2164 = vmatmul.f32.gmra.mxu0 %v713_v57  ;;  %v963_v47 = vmul.f32 %v3812_v14, %v646_v27  ;;  %v411_v50 = vunpack.c.l.bf16 %v4320_v59  ;;  %v4334_v27 = vperm.slane %v3735_v2, 3 }
 0x1d2   : > { %2064 = vmatmul.f32.gmra.mxu2 %v951_v1  ;;  %v966_v1 = vmul.f32 %v3817_v20, %v649_v34  ;;  %v382_v34 = vunpack.c.h.bf16 %v4277_v30  ;;  %v232_v30 = vld [vmem:[%s2870_s23 + $0x74] sm:$0xf] }
 0x1d3   : > { %v4316_v58 = vadd.f32 %v2014_v33, %v1941_v28  ;;  %1990 = vmatmul.f32.gmra.mxu1 %v950_v43  ;;  %v965_v43 = vmul.f32 %v3824_v16, %v648_v8  ;;  %v224_v28 = vld [vmem:[%s2870_s23 + $0x38] sm:$0xf]  ;;  %v728_v29 = vmul.f32 %v4284_v63, %v411_v50  ;;  %v4343_v8 = vperm.slane %v3735_v2, 5 }
 0x1d4   : > { %v1795_v40 = vpop.f32.mrf.mxu3  ;;  %v383_v20 = vunpack.c.l.bf16 %v224_v28 }
 0x1d5   : > { %v1796_v22 = vadd.f32 %v1795_v40, %v3820_v54  ;;  %v2017_v19 = vpop.f32.mrf.mxu2  ;;  %v2559_v54 = vld [vmem:[%s2870_s23 + $0x28] sm:$0xff] }
 0x1d6   : > { %v4330_v35 = vpop.f32.mrf.mxu0  ;;  %v380_v14 = vunpack.c.h.bf16 %v2559_v54  ;;  %v4346_v40 = vld [vmem:[%s2870_s23 + $0xe4] sm:$0xff] }
 0x1d7   : > { %v1870_v33 = vadd.f32 %v4237_v15, %v1796_v22  ;;  %v4337_v15 = vperm.slane %v3735_v2, 6  ;;  %v699_v2 = vmul.f32 %v4343_v8, %v382_v34 }
 0x1d8   : > { %v1946_v57 = vpop.f32.mrf.mxu1 }
 0x1d9   : > { %v1944_v5 = vadd.f32 %v1943_v38, %v1870_v33  ;;  %1845 = vmatmul.f32.gmra.mxu3 %v963_v47  ;;  %2167 = vmatmul.f32.gmra.mxu0 %v728_v29  ;;  %v697_v47 = vmul.f32 %v4334_v27, %v380_v14  ;;  %v2560_v29 = vld [vmem:[%s2870_s23 + $0x64] sm:$0xff]  ;;  %v398_v14 = vunpack.c.l.bf16 %v232_v30 }
 0x1da   : > { %2067 = vmatmul.f32.gmra.mxu2 %v966_v1  ;;  %v426_v1 = vunpack.c.l.bf16 %v4346_v40  ;;  %v395_v54 = vunpack.c.h.bf16 %v2560_v29 }
 0x1db   : > { %v4339_v16 = vadd.f32 %v2017_v19, %v1944_v5  ;;  %1993 = vmatmul.f32.gmra.mxu1 %v965_v43  ;;  %v700_v5 = vmul.f32 %v4337_v15, %v383_v20 }
 0x1dc   : > { %v1798_v38 = vpop.f32.mrf.mxu3  ;;  %v743_v33 = vmul.f32 %v4284_v63, %v426_v1 }
 0x1dd   : > { %v1799_v22 = vadd.f32 %v1798_v38, %v3851_v49  ;;  %v2020_v50 = vpop.f32.mrf.mxu2  ;;  %v4364_v38 = vld [vmem:[%s2870_s23 + $0x120] sm:$0xff] }
 0x1de   : > { %v4356_v28 = vpop.f32.mrf.mxu0  ;;  %v441_v1 = vunpack.c.l.bf16 %v4364_v38 }
 0x1df   : > { %v1873_v19 = vadd.f32 %v4263_v3, %v1799_v22  ;;  %v397_v3 = vunpack.c.h.bf16 %v4300_v39 }
 0x1e0   : > { %v1949_v43 = vpop.f32.mrf.mxu1  ;;  %v758_v39 = vmul.f32 %v4284_v63, %v441_v1 }
 0x1e1   : > { %v1947_v49 = vadd.f32 %v1946_v57, %v1873_v19  ;;  %2087 = vmatmul.f32.vlgmr.msrb.gmra.mxu3 %v697_v47  ;;  %2170 = vmatmul.f32.gmra.mxu0 %v743_v33  ;;  %v712_v57 = vmul.f32 %v4334_v27, %v395_v54  ;;  %v715_v19 = vmul.f32 %v4337_v15, %v398_v14 }
 0x1e2   : > { %2452 = vmatmul.msk.f32.vlgmr.msrb.gmra.mxu2 %vm1199_vm8, %v700_v5 }
 0x1e3   : > { %v4360_v20 = vadd.f32 %v2020_v50, %v1947_v49  ;;  %2235 = vmatmul.f32.vlgmr.msrb.gmra.mxu1 %v699_v2  ;;  %v714_v50 = vmul.f32 %v4343_v8, %v397_v3  ;;  %v240_v2 = vld [vmem:[%s2870_s23 + $0xb0] sm:$0xf]  ;;  %v4382_v3 = vld [vmem:[%s2870_s23 + $0x15c] sm:$0xff] }
 0x1e4   : > { %v1801_v34 = vpop.f32.mrf.mxu3  ;;  %v413_v29 = vunpack.c.l.bf16 %v240_v2 }
 0x1e5   : > { %v1802_v22 = vadd.f32 %v1801_v34, %v3879_v36  ;;  %v2023_v47 = vpop.f32.mrf.mxu2  ;;  %v410_v36 = vunpack.c.h.bf16 %v3863_v12  ;;  %v456_v12 = vunpack.c.l.bf16 %v4382_v3 }
 0x1e6   : > { %v4374_v33 = vpop.f32.mrf.mxu0 }
 0x1e7   : > { %v1876_v5 = vadd.f32 %v4291_v37, %v1802_v22  ;;  %v412_v37 = vunpack.c.h.bf16 %v4320_v59  ;;  %v773_v59 = vmul.f32 %v4284_v63, %v456_v12  ;;  %v256_v12 = vld [vmem:[%s2870_s23 + $0x128] sm:$0xf] }
 0x1e8   : > { %v1952_v30 = vpop.f32.mrf.mxu1 }
 0x1e9   : > { %v1950_v49 = vadd.f32 %v1949_v43, %v1876_v5  ;;  %2090 = vmatmul.f32.gmra.mxu3 %v712_v57  ;;  %2173 = vmatmul.f32.gmra.mxu0 %v758_v39  ;;  %v727_v43 = vmul.f32 %v4334_v27, %v410_v36  ;;  %v730_v57 = vmul.f32 %v4337_v15, %v413_v29  ;;  %v4400_v29 = vld [vmem:[%s2870_s23 + $0x198] sm:$0xff] }
 0x1ea   : > { %2453 = vmatmul.msk.f32.gmra.mxu2 %vm1199_vm8, %v715_v19  ;;  %v248_v19 = vld [vmem:[%s2870_s23 + $0xec] sm:$0xf] }
 0x1eb   : > { %v4378_v54 = vadd.f32 %v2023_v47, %v1950_v49  ;;  %2238 = vmatmul.f32.gmra.mxu1 %v714_v50  ;;  %v729_v47 = vmul.f32 %v4343_v8, %v412_v37  ;;  %v428_v39 = vunpack.c.l.bf16 %v248_v19  ;;  %v443_v19 = vunpack.c.l.bf16 %v256_v12 }
 0x1ec   : > { %v1804_v14 = vpop.f32.mrf.mxu3 }
 0x1ed   : > { %v1805_v34 = vadd.f32 %v1804_v14, %v3911_v53  ;;  %v2026_v22 = vpop.f32.mrf.mxu2  ;;  %v425_v53 = vunpack.c.h.bf16 %v3895_v45  ;;  %v471_v45 = vunpack.c.l.bf16 %v4400_v29 }
 0x1ee   : > { %v4392_v50 = vpop.f32.mrf.mxu0 }
 0x1ef   : > { %v1879_v1 = vadd.f32 %v4312_v46, %v1805_v34  ;;  %v427_v46 = vunpack.c.h.bf16 %v4346_v40  ;;  %v745_v34 = vmul.f32 %v4337_v15, %v428_v39  ;;  %v788_v40 = vmul.f32 %v4284_v63, %v471_v45 }
 0x1f0   : > { %v1955_v5 = vpop.f32.mrf.mxu1 }
 0x1f1   : > { %v1953_v2 = vadd.f32 %v1952_v30, %v1879_v1  ;;  %2093 = vmatmul.f32.gmra.mxu3 %v727_v43  ;;  %2176 = vmatmul.f32.gmra.mxu0 %v773_v59  ;;  %v742_v30 = vmul.f32 %v4334_v27, %v425_v53  ;;  %v4418_v53 = vld [vmem:[%s2870_s23 + $0x1d4] sm:$0xff] }
 0x1f2   : > { %2454 = vmatmul.msk.f32.gmra.mxu2 %vm1199_vm8, %v730_v57 }
 0x1f3   : > { %v4396_v49 = vadd.f32 %v2026_v22, %v1953_v2  ;;  %2241 = vmatmul.f32.gmra.mxu1 %v729_v47  ;;  %v744_v22 = vmul.f32 %v4343_v8, %v427_v46 }
 0x1f4   : > { %v1807_v36 = vpop.f32.mrf.mxu3 }
 0x1f5   : > { %v1808_v37 = vadd.f32 %v1807_v36, %v3934_v42  ;;  %v2029_v14 = vpop.f32.mrf.mxu2  ;;  %v440_v42 = vunpack.c.h.bf16 %v3924_v52  ;;  %v486_v52 = vunpack.c.l.bf16 %v4418_v53  ;;  %v760_v36 = vmul.f32 %v4337_v15, %v443_v19 }
 0x1f6   : > { %v4410_v1 = vpop.f32.mrf.mxu0 }
 0x1f7   : > { %v1882_v43 = vadd.f32 %v4330_v35, %v1808_v37  ;;  %v442_v35 = vunpack.c.h.bf16 %v4364_v38  ;;  %v803_v38 = vmul.f32 %v4284_v63, %v486_v52 }
 0x1f8   : > { %v1958_v57 = vpop.f32.mrf.mxu1 }
 0x1f9   : > { %v1956_v47 = vadd.f32 %v1955_v5, %v1882_v43  ;;  %2096 = vmatmul.f32.gmra.mxu3 %v742_v30  ;;  %2179 = vmatmul.f32.gmra.mxu0 %v788_v40  ;;  %v757_v5 = vmul.f32 %v4334_v27, %v440_v42  ;;  %v759_v30 = vmul.f32 %v4343_v8, %v442_v35 }
 0x1fa   : > { %2455 = vmatmul.msk.f32.gmra.mxu2 %vm1199_vm8, %v745_v34 }
 0x1fb   : > { %v4414_v59 = vadd.f32 %v2029_v14, %v1956_v47  ;;  %2244 = vmatmul.f32.gmra.mxu1 %v744_v22  ;;  %v264_v14 = vld [vmem:[%s2870_s23 + $0x164] sm:$0xf]  ;;  %v4436_v47 = vld [vmem:[%s2870_s23 + $0x210] sm:$0xff] }
 0x1fc   : > { %v1810_v2 = vpop.f32.mrf.mxu3  ;;  %v458_v22 = vunpack.c.l.bf16 %v264_v14 }
 0x1fd   : > { %v1811_v39 = vadd.f32 %v1810_v2, %v3960_v51  ;;  %v2032_v46 = vpop.f32.mrf.mxu2  ;;  %v455_v51 = vunpack.c.h.bf16 %v3953_v0  ;;  %v501_v0 = vunpack.c.l.bf16 %v4436_v47 }
 0x1fe   : > { %v4428_v34 = vpop.f32.mrf.mxu0  ;;  %v775_v35 = vmul.f32 %v4337_v15, %v458_v22 }
 0x1ff   : > { %v1885_v37 = vadd.f32 %v4356_v28, %v1811_v39  ;;  %v457_v28 = vunpack.c.h.bf16 %v4382_v3  ;;  %v818_v3 = vmul.f32 %v4284_v63, %v501_v0 }
 0x200   : > { %v1961_v45 = vpop.f32.mrf.mxu1 }
 0x201   : > { %v1959_v43 = vadd.f32 %v1958_v57, %v1885_v37  ;;  %2099 = vmatmul.f32.gmra.mxu3 %v757_v5  ;;  %2182 = vmatmul.f32.gmra.mxu0 %v803_v38  ;;  %v772_v57 = vmul.f32 %v4334_v27, %v455_v51  ;;  %v774_v39 = vmul.f32 %v4343_v8, %v457_v28  ;;  %v272_v5 = vld [vmem:[%s2870_s23 + $0x1a0] sm:$0xf]  ;;  %v4454_v38 = vld [vmem:[%s2870_s23 + $0x24c] sm:$0xff] }
 0x202   : > { %2456 = vmatmul.msk.f32.gmra.mxu2 %vm1199_vm8, %v760_v36  ;;  %v473_v37 = vunpack.c.l.bf16 %v272_v5  ;;  %v4472_v5 = vld [vmem:[%s2870_s23 + $0x288] sm:$0xff] }
 0x203   : > { %v4432_v12 = vadd.f32 %v2032_v46, %v1959_v43  ;;  %2247 = vmatmul.f32.gmra.mxu1 %v759_v30 }
 0x204   : > { %v1813_v40 = vpop.f32.mrf.mxu3  ;;  %v790_v22 = vmul.f32 %v4337_v15, %v473_v37 }
 0x205   : > { %v1814_v42 = vadd.f32 %v1813_v40, %v3989_v56  ;;  %v2035_v19 = vpop.f32.mrf.mxu2  ;;  %v470_v56 = vunpack.c.h.bf16 %v3982_v62  ;;  %v516_v62 = vunpack.c.l.bf16 %v4454_v38 }
 0x206   : > { %v4446_v52 = vpop.f32.mrf.mxu0 }
 0x207   : > { %v1888_v2 = vadd.f32 %v4374_v33, %v1814_v42  ;;  %v472_v33 = vunpack.c.h.bf16 %v4400_v29  ;;  %v280_v42 = vld [vmem:[%s2870_s23 + $0x1dc] sm:$0xf]  ;;  %v833_v29 = vmul.f32 %v4284_v63, %v516_v62 }
 0x208   : > { %v1964_v46 = vpop.f32.mrf.mxu1 }
 0x209   : > { %v1962_v36 = vadd.f32 %v1961_v45, %v1888_v2  ;;  %2102 = vmatmul.f32.gmra.mxu3 %v772_v57  ;;  %2185 = vmatmul.f32.gmra.mxu0 %v818_v3  ;;  %v787_v45 = vmul.f32 %v4334_v27, %v470_v56  ;;  %v789_v40 = vmul.f32 %v4343_v8, %v472_v33 }
 0x20a   : > { %2457 = vmatmul.msk.f32.gmra.mxu2 %vm1199_vm8, %v775_v35  ;;  %v488_v35 = vunpack.c.l.bf16 %v280_v42 }
 0x20b   : > { %v4450_v30 = vadd.f32 %v2035_v19, %v1962_v36  ;;  %2250 = vmatmul.f32.gmra.mxu1 %v774_v39 }
 0x20c   : > { %v1816_v14 = vpop.f32.mrf.mxu3  ;;  %v805_v56 = vmul.f32 %v4337_v15, %v488_v35 }
 0x20d   : > { %v1817_v43 = vadd.f32 %v1816_v14, %v4018_v32  ;;  %v2038_v51 = vpop.f32.mrf.mxu2  ;;  %v485_v32 = vunpack.c.h.bf16 %v4008_v6  ;;  %v531_v6 = vunpack.c.l.bf16 %v4472_v5  ;;  %v288_v14 = vld [vmem:[%s2870_s23 + $0x218] sm:$0xf] }
 0x20e   : > { %v4464_v19 = vpop.f32.mrf.mxu0  ;;  %v503_v62 = vunpack.c.l.bf16 %v288_v14 }
 0x20f   : > { %v1891_v28 = vadd.f32 %v4392_v50, %v1817_v43  ;;  %v487_v50 = vunpack.c.h.bf16 %v4418_v53  ;;  %v848_v53 = vmul.f32 %v4284_v63, %v531_v6 }
 0x210   : > { %v1967_v57 = vpop.f32.mrf.mxu1 }
 0x211   : > { %v1965_v0 = vadd.f32 %v1964_v46, %v1891_v28  ;;  %2105 = vmatmul.f32.gmra.mxu3 %v787_v45  ;;  %2188 = vmatmul.f32.gmra.mxu0 %v833_v29  ;;  %v802_v46 = vmul.f32 %v4334_v27, %v485_v32  ;;  %v804_v33 = vmul.f32 %v4343_v8, %v487_v50  ;;  %v296_v50 = vld [vmem:[%s2870_s23 + $0x254] sm:$0xf] }
 0x212   : > { %2458 = vmatmul.msk.f32.gmra.mxu2 %vm1199_vm8, %v790_v22 }
 0x213   : > { %v4468_v2 = vadd.f32 %v2038_v51, %v1965_v0  ;;  %2253 = vmatmul.f32.gmra.mxu1 %v789_v40  ;;  %v4490_v40 = vld [vmem:[%s2870_s23 + $0x2c4] sm:$0xff]  ;;  %v820_v0 = vmul.f32 %v4337_v15, %v503_v62  ;;  %v304_v62 = vld [vmem:[%s2870_s23 + $0x290] sm:$0xf] }
 0x214   : > { %v1819_v39 = vpop.f32.mrf.mxu3 }
 0x215   : > { %v1820_v3 = vadd.f32 %v1819_v39, %v4050_v55  ;;  %v2041_v36 = vpop.f32.mrf.mxu2  ;;  %v500_v55 = vunpack.c.h.bf16 %v4037_v61  ;;  %v546_v61 = vunpack.c.l.bf16 %v4490_v40 }
 0x216   : > { %v4482_v45 = vpop.f32.mrf.mxu0 }
 0x217   : > { %v1894_v37 = vadd.f32 %v4410_v1, %v1820_v3  ;;  %v502_v1 = vunpack.c.h.bf16 %v4436_v47  ;;  %v817_v29 = vmul.f32 %v4334_v27, %v500_v55  ;;  %v863_v47 = vmul.f32 %v4284_v63, %v546_v61 }
 0x218   : > { %v1970_v43 = vpop.f32.mrf.mxu1 }
 0x219   : > { %v1968_v51 = vadd.f32 %v1967_v57, %v1894_v37  ;;  %2108 = vmatmul.f32.gmra.mxu3 %v802_v46  ;;  %2191 = vmatmul.f32.gmra.mxu0 %v848_v53  ;;  %v819_v35 = vmul.f32 %v4343_v8, %v502_v1  ;;  %v4508_v37 = vld [vmem:[%s2870_s23 + $0x300] sm:$0xff] }
 0x21a   : > { %2459 = vmatmul.msk.f32.gmra.mxu2 %vm1199_vm8, %v805_v56 }
 0x21b   : > { %v4486_v22 = vadd.f32 %v2041_v36, %v1968_v51  ;;  %2256 = vmatmul.f32.gmra.mxu1 %v804_v33  ;;  %v518_v36 = vunpack.c.l.bf16 %v296_v50 }
 0x21c   : > { %v1822_v28 = vpop.f32.mrf.mxu3 }
 0x21d   : > { %v1823_v42 = vadd.f32 %v1822_v28, %v4079_v11  ;;  %v2044_v57 = vpop.f32.mrf.mxu2  ;;  %v515_v11 = vunpack.c.h.bf16 %v4063_v7  ;;  %v561_v7 = vunpack.c.l.bf16 %v4508_v37 }
 0x21e   : > { %v4500_v3 = vpop.f32.mrf.mxu0 }
 0x21f   : > { %v1897_v32 = vadd.f32 %v4428_v34, %v1823_v42  ;;  %v517_v34 = vunpack.c.h.bf16 %v4454_v38  ;;  %v832_v14 = vmul.f32 %v4334_v27, %v515_v11  ;;  %v878_v38 = vmul.f32 %v4284_v63, %v561_v7  ;;  %v312_v11 = vld [vmem:[%s2870_s23 + $0x2cc] sm:$0xf]  ;;  %v4544_v7 = vld [vmem:[%s2870_s23 + $0x378] sm:$0xff] }
 0x220   : > { %v1973_v39 = vpop.f32.mrf.mxu1 }
 0x221   : > { %v1971_v46 = vadd.f32 %v1970_v43, %v1897_v32  ;;  %2111 = vmatmul.f32.gmra.mxu3 %v817_v29  ;;  %2194 = vmatmul.f32.gmra.mxu0 %v863_v47  ;;  %v835_v43 = vmul.f32 %v4337_v15, %v518_v36  ;;  %v834_v55 = vmul.f32 %v4343_v8, %v517_v34  ;;  %v533_v29 = vunpack.c.l.bf16 %v304_v62 }
 0x222   : > { %2460 = vmatmul.msk.f32.gmra.mxu2 %vm1199_vm8, %v820_v0  ;;  %v4526_v0 = vld [vmem:[%s2870_s23 + $0x33c] sm:$0xff] }
 0x223   : > { %v4504_v6 = vadd.f32 %v2044_v57, %v1971_v46  ;;  %2259 = vmatmul.f32.gmra.mxu1 %v819_v35  ;;  %v850_v47 = vmul.f32 %v4337_v15, %v533_v29 }
 0x224   : > { %v1825_v56 = vpop.f32.mrf.mxu3 }
 0x225   : > { %v1826_v33 = vadd.f32 %v1825_v56, %v4102_v41  ;;  %v2047_v53 = vpop.f32.mrf.mxu2  ;;  %v530_v41 = vunpack.c.h.bf16 %v4092_v10  ;;  %v576_v10 = vunpack.c.l.bf16 %v4526_v0 }
 0x226   : > { %v4518_v28 = vpop.f32.mrf.mxu0 }
 0x227   : > { %v1900_v51 = vadd.f32 %v4446_v52, %v1826_v33  ;;  %v532_v52 = vunpack.c.h.bf16 %v4472_v5  ;;  %v847_v35 = vmul.f32 %v4334_v27, %v530_v41  ;;  %v893_v5 = vmul.f32 %v4284_v63, %v576_v10 }
 0x228   : > { %v1976_v1 = vpop.f32.mrf.mxu1  ;;  %v548_v33 = vunpack.c.l.bf16 %v312_v11 }
 0x229   : > { %v1974_v42 = vadd.f32 %v1973_v39, %v1900_v51  ;;  %2114 = vmatmul.f32.gmra.mxu3 %v832_v14  ;;  %2197 = vmatmul.f32.gmra.mxu0 %v878_v38  ;;  %v849_v46 = vmul.f32 %v4343_v8, %v532_v52 }
 0x22a   : > { %2461 = vmatmul.msk.f32.gmra.mxu2 %vm1199_vm8, %v835_v43  ;;  %v865_v62 = vmul.f32 %v4337_v15, %v548_v33 }
 0x22b   : > { %v4522_v57 = vadd.f32 %v2047_v53, %v1974_v42  ;;  %2262 = vmatmul.f32.gmra.mxu1 %v834_v55  ;;  %v320_v42 = vld [vmem:[%s2870_s23 + $0x308] sm:$0xf] }
 0x22c   : > { %v1828_v61 = vpop.f32.mrf.mxu3 }
 0x22d   : > { %v1829_v32 = vadd.f32 %v1828_v61, %v4128_v26  ;;  %v2050_v50 = vpop.f32.mrf.mxu2  ;;  %v545_v26 = vunpack.c.h.bf16 %v4121_v17  ;;  %v591_v17 = vunpack.c.l.bf16 %v4544_v7  ;;  %v563_v61 = vunpack.c.l.bf16 %v320_v42 }
 0x22e   : > { %v4536_v34 = vpop.f32.mrf.mxu0 }
 0x22f   : > { %v1903_v39 = vadd.f32 %v4464_v19, %v1829_v32  ;;  %v547_v19 = vunpack.c.h.bf16 %v4490_v40  ;;  %v862_v51 = vmul.f32 %v4334_v27, %v545_v26  ;;  %v908_v40 = vmul.f32 %v4284_v63, %v591_v17 }
 0x230   : > { %v1979_v36 = vpop.f32.mrf.mxu1 }
 0x231   : > { %v1977_v56 = vadd.f32 %v1976_v1, %v1903_v39  ;;  %2117 = vmatmul.f32.gmra.mxu3 %v847_v35  ;;  %2200 = vmatmul.f32.gmra.mxu0 %v893_v5  ;;  %v864_v1 = vmul.f32 %v4343_v8, %v547_v19 }
 0x232   : > { %2462 = vmatmul.msk.f32.gmra.mxu2 %vm1199_vm8, %v850_v47 }
 0x233   : > { %v4540_v14 = vadd.f32 %v2050_v50, %v1977_v56  ;;  %2265 = vmatmul.f32.gmra.mxu1 %v849_v46  ;;  %v4562_v50 = vld [vmem:[%s2870_s23 + $0x3b4] sm:$0xff]  ;;  %v880_v46 = vmul.f32 %v4337_v15, %v563_v61 }
 0x234   : > { %v1831_v53 = vpop.f32.mrf.mxu3 }
 0x235   : > { %v1832_v43 = vadd.f32 %v1831_v53, %v4160_v60  ;;  %v2053_v55 = vpop.f32.mrf.mxu2  ;;  %v560_v60 = vunpack.c.h.bf16 %v4150_v21  ;;  %v606_v21 = vunpack.c.l.bf16 %v4562_v50 }
 0x236   : > { %v4554_v29 = vpop.f32.mrf.mxu0 }
 0x237   : > { %v1906_v38 = vadd.f32 %v4482_v45, %v1832_v43  ;;  %v562_v45 = vunpack.c.h.bf16 %v4508_v37  ;;  %v877_v47 = vmul.f32 %v4334_v27, %v560_v60  ;;  %v923_v37 = vmul.f32 %v4284_v63, %v606_v21 }
 0x238   : > { %v1982_v41 = vpop.f32.mrf.mxu1 }
 0x239   : > { %v1980_v52 = vadd.f32 %v1979_v36, %v1906_v38  ;;  %2120 = vmatmul.f32.gmra.mxu3 %v862_v51  ;;  %2203 = vmatmul.f32.gmra.mxu0 %v908_v40  ;;  %v879_v5 = vmul.f32 %v4343_v8, %v562_v45  ;;  %v328_v36 = vld [vmem:[%s2870_s23 + $0x344] sm:$0xf]  ;;  %v4580_v51 = vld [vmem:[%s2870_s23 + $0x3f0] sm:$0xff]  ;;  %v336_v40 = vld [vmem:[%s2870_s23 + $0x380] sm:$0xf] }
 0x23a   : > { %2463 = vmatmul.msk.f32.gmra.mxu2 %vm1199_vm8, %v865_v62  ;;  %v578_v19 = vunpack.c.l.bf16 %v328_v36  ;;  %v593_v61 = vunpack.c.l.bf16 %v336_v40  ;;  %v344_v36 = vld [vmem:[%s2870_s23 + $0x3bc] sm:$0xf] }
 0x23b   : > { %v4558_v32 = vadd.f32 %v2053_v55, %v1980_v52  ;;  %2268 = vmatmul.f32.gmra.mxu1 %v864_v1 }
 0x23c   : > { %v1834_v35 = vpop.f32.mrf.mxu3  ;;  %v895_v38 = vmul.f32 %v4337_v15, %v578_v19 }
 0x23d   : > { %v1835_v10 = vadd.f32 %v1834_v35, %v4189_v9  ;;  %v2056_v39 = vpop.f32.mrf.mxu2  ;;  %v575_v9 = vunpack.c.h.bf16 %v4182_v23  ;;  %v621_v23 = vunpack.c.l.bf16 %v4580_v51 }
 0x23e   : > { %v4572_v26 = vpop.f32.mrf.mxu0 }
 0x23f   : > { %v1909_v11 = vadd.f32 %v4500_v3, %v1835_v10  ;;  %v577_v3 = vunpack.c.h.bf16 %v4526_v0  ;;  %v892_v17 = vmul.f32 %v4334_v27, %v575_v9  ;;  %v938_v0 = vmul.f32 %v4284_v63, %v621_v23  ;;  %v4598_v10 = vld [vmem:[%s2870_s23 + $0x42c] sm:$0xff] }
 0x240   : > { %v1985_v56 = vpop.f32.mrf.mxu1  ;;  %v608_v9 = vunpack.c.l.bf16 %v344_v36  ;;  %v637_v36 = vunpack.c.h.bf16 %v4598_v10 }
 0x241   : > { %v1983_v33 = vadd.f32 %v1982_v41, %v1909_v11  ;;  %2123 = vmatmul.f32.gmra.mxu3 %v877_v47  ;;  %2206 = vmatmul.f32.gmra.mxu0 %v923_v37  ;;  %v894_v42 = vmul.f32 %v4343_v8, %v577_v3 }
 0x242   : > { %2464 = vmatmul.msk.f32.gmra.mxu2 %vm1199_vm8, %v880_v46  ;;  %v910_v46 = vmul.f32 %v4337_v15, %v593_v61  ;;  %v925_v23 = vmul.f32 %v4337_v15, %v608_v9 }
 0x243   : > { %v4576_v53 = vadd.f32 %v2056_v39, %v1983_v33  ;;  %2271 = vmatmul.f32.gmra.mxu1 %v879_v5 }
 0x244   : > { %v1837_v43 = vpop.f32.mrf.mxu3 }
 0x245   : > { %v1838_v55 = vadd.f32 %v1837_v43, %v4218_v18  ;;  %v2059_v62 = vpop.f32.mrf.mxu2  ;;  %v590_v18 = vunpack.c.h.bf16 %v4205_v31  ;;  %v636_v31 = vunpack.c.l.bf16 %v4598_v10  ;;  %v4616_v43 = vld [vmem:[%s2870_s23 + $0x468] sm:$0xff] }
 0x246   : > { %v4590_v52 = vpop.f32.mrf.mxu0 }
 0x247   : > { %v1912_v1 = vadd.f32 %v4518_v28, %v1838_v55  ;;  %v592_v28 = vunpack.c.h.bf16 %v4544_v7  ;;  %v907_v39 = vmul.f32 %v4334_v27, %v590_v18  ;;  %v953_v7 = vmul.f32 %v4284_v63, %v636_v31 }
 0x248   : > { %v1988_v41 = vpop.f32.mrf.mxu1 }
 0x249   : > { %v1986_v60 = vadd.f32 %v1985_v56, %v1912_v1  ;;  %2126 = vmatmul.f32.gmra.mxu3 %v892_v17  ;;  %2209 = vmatmul.f32.gmra.mxu0 %v938_v0  ;;  %v909_v5 = vmul.f32 %v4343_v8, %v592_v28 }
 0x24a   : > { %2465 = vmatmul.msk.f32.gmra.mxu2 %vm1199_vm8, %v895_v38 }
 0x24b   : > { %v4594_v45 = vadd.f32 %v2059_v62, %v1986_v60  ;;  %2274 = vmatmul.f32.gmra.mxu1 %v894_v42  ;;  %v352_v42 = vld [vmem:[%s2870_s23 + $0x3f8] sm:$0xf] }
 0x24c   : > { %v1840_v35 = vpop.f32.mrf.mxu3  ;;  %v623_v60 = vunpack.c.l.bf16 %v352_v42 }
 0x24d   : > { %v1841_v47 = vadd.f32 %v1840_v35, %v4247_v4  ;;  %v2062_v21 = vpop.f32.mrf.mxu2  ;;  %v605_v4 = vunpack.c.h.bf16 %v4231_v44  ;;  %v651_v44 = vunpack.c.l.bf16 %v4616_v43 }
 0x24e   : > { %v4608_v56 = vpop.f32.mrf.mxu0 }
 0x24f   : > { %v1915_v11 = vadd.f32 %v4536_v34, %v1841_v47  ;;  %v607_v34 = vunpack.c.h.bf16 %v4562_v50  ;;  %v922_v17 = vmul.f32 %v4334_v27, %v605_v4  ;;  %v968_v50 = vmul.f32 %v4284_v63, %v651_v44 }
 0x250   : > { %v1991_v37 = vpop.f32.mrf.mxu1  ;;  %v940_v47 = vmul.f32 %v4337_v15, %v623_v60  ;;  %v652_v44 = vunpack.c.h.bf16 %v4616_v43 }
 0x251   : > { %v1989_v33 = vadd.f32 %v1988_v41, %v1915_v11  ;;  %2129 = vmatmul.f32.gmra.mxu3 %v907_v39  ;;  %2212 = vmatmul.f32.gmra.mxu0 %v953_v7  ;;  %v924_v1 = vmul.f32 %v4343_v8, %v607_v34  ;;  %v368_v34 = vld [vmem:[%s2870_s23 + $0x470] sm:$0xf] }
 0x252   : > { %2466 = vmatmul.msk.f32.gmra.mxu2 %vm1199_vm8, %v910_v46 }
 0x253   : > { %v4612_v19 = vadd.f32 %v2062_v21, %v1989_v33  ;;  %2277 = vmatmul.f32.gmra.mxu1 %v909_v5  ;;  %v360_v21 = vld [vmem:[%s2870_s23 + $0x434] sm:$0xf] }
 0x254   : > { %v1843_v3 = vpop.f32.mrf.mxu3 }
 0x255   : > { %v1844_v55 = vadd.f32 %v1843_v3, %v4270_v24  ;;  %v2065_v62 = vpop.f32.mrf.mxu2  ;;  %v620_v24 = vunpack.c.h.bf16 %v4260_v48 }
 0x256   : > { %v4626_v0 = vpop.f32.mrf.mxu0 }
 0x257   : > { %v1918_v38 = vadd.f32 %v4554_v29, %v1844_v55  ;;  %v622_v29 = vunpack.c.h.bf16 %v4580_v51  ;;  %v937_v28 = vmul.f32 %v4334_v27, %v620_v24  ;;  %v635_v51 = vunpack.c.h.bf16 %v4289_v13 }
 0x258   : > { %v1994_v40 = vpop.f32.mrf.mxu1  ;;  %v954_v13 = vmul.f32 %v4343_v8, %v637_v36 }
 0x259   : > { %v1992_v41 = vadd.f32 %v1991_v37, %v1918_v38  ;;  %2132 = vmatmul.f32.gmra.mxu3 %v922_v17  ;;  %2215 = vmatmul.f32.gmra.mxu0 %v968_v50  ;;  %v939_v48 = vmul.f32 %v4343_v8, %v622_v29  ;;  %v952_v37 = vmul.f32 %v4334_v27, %v635_v51 }
 0x25a   : > { %2467 = vmatmul.msk.f32.gmra.mxu2 %vm1199_vm8, %v925_v23 }
 0x25b   : > { %v4630_v18 = vadd.f32 %v2065_v62, %v1992_v41  ;;  %2280 = vmatmul.f32.gmra.mxu1 %v924_v1  ;;  %v4732_v62 = vld [vmem:[#allocation2_spill] sm:$0xff]  ;;  %v969_v41 = vmul.f32 %v4343_v8, %v652_v44 }
 0x25c   : > { %v1846_v61 = vpop.f32.mrf.mxu3  ;;  %v650_v10 = vunpack.c.h.bf16 %v4732_v62 }
 0x25d   : > { %v1847_v63 = vadd.f32 %v1846_v61, %v4296_v25  ;;  %v2068_v35 = vpop.f32.mrf.mxu2  ;;  %v638_v25 = vunpack.c.l.bf16 %v360_v21 }
 0x25e   : > { %v2171_v46 = vpop.f32.mrf.mxu0  ;;  %v967_v1 = vmul.f32 %v4334_v27, %v650_v10 }
 0x25f   : > { %v1921_v39 = vadd.f32 %v4572_v26, %v1847_v63  ;;  %v955_v4 = vmul.f32 %v4337_v15, %v638_v25 }
 0x260   : > { %v2236_v31 = vpop.f32.mrf.mxu1 }
 0x261   : > { %v1995_v11 = vadd.f32 %v1994_v40, %v1921_v39  ;;  %2135 = vmatmul.f32.gmra.mxu3 %v937_v28 }
 0x262   : > { %2468 = vmatmul.msk.f32.gmra.mxu2 %vm1199_vm8, %v940_v47 }
 0x263   : > { %v4641_v5 = vadd.f32 %v2068_v35, %v1995_v11  ;;  %2283 = vmatmul.f32.gmra.mxu1 %v939_v48 }
 0x264   : > { %v2088_v26 = vpop.f32.mrf.mxu3 }
 0x265   : > { %v2089_v7 = vadd.f32 %v2088_v26, %v4316_v58  ;;  %v2310_v33 = vpop.f32.mrf.mxu2  ;;  %v653_v58 = vunpack.c.l.bf16 %v368_v34 }
 0x266   : > { %v2174_v55 = vpop.f32.mrf.mxu0 }
 0x267   : > { %v2163_v9 = vadd.f32 %v4590_v52, %v2089_v7  ;;  %v970_v50 = vmul.f32 %v4337_v15, %v653_v58 }
 0x268   : > { %v2239_v3 = vpop.f32.mrf.mxu1 }
 0x269   : > { %v2237_v17 = vadd.f32 %v2236_v31, %v2163_v9  ;;  %2138 = vmatmul.f32.gmra.mxu3 %v952_v37 }
 0x26a   : > { %2469 = vmatmul.msk.f32.gmra.mxu2 %vm1199_vm8, %v955_v4 }
 0x26b   : > { %v2311_v52 = vadd.f32 %v2310_v33, %v2237_v17  ;;  %2286 = vmatmul.f32.gmra.mxu1 %v954_v13 }
 0x26c   : > { %v2091_v23 = vpop.f32.mrf.mxu3 }
 0x26d   : > { %2368 = vst.msk [vmem:[%s4655_s20] sm:$0xff] %vm2367_vm9, %v2311_v52  ;;  %v2092_v38 = vadd.f32 %v2091_v23, %v4339_v16  ;;  %v2313_v42 = vpop.f32.mrf.mxu2 }
 0x26e   : > { %v2177_v43 = vpop.f32.mrf.mxu0 }
 0x26f   : > { %v2166_v40 = vadd.f32 %v4608_v56, %v2092_v38 }
 0x270   : > { %v2242_v24 = vpop.f32.mrf.mxu1 }
 0x271   : > { %v2240_v60 = vadd.f32 %v2239_v3, %v2166_v40  ;;  %2141 = vmatmul.f32.gmra.mxu3 %v967_v1 }
 0x272   : > { %2470 = vmatmul.msk.f32.gmra.mxu2 %vm1199_vm8, %v970_v50 }
 0x273   : > { %v2314_v29 = vadd.f32 %v2313_v42, %v2240_v60  ;;  %2289 = vmatmul.f32.gmra.mxu1 %v969_v41 }
 0x274   : > { %v2094_v61 = vpop.f32.mrf.mxu3 }
 0x275   : > { %2369 = vst.msk [vmem:[%s4655_s20 + $0x8] sm:$0xff] %vm2367_vm9, %v2314_v29  ;;  %v2095_v27 = vadd.f32 %v2094_v61, %v4360_v20  ;;  %v2316_v15 = vpop.f32.mrf.mxu2 }
 0x276   : > { %v2180_v35 = vpop.f32.mrf.mxu0 }
 0x277   : > { %v2169_v16 = vadd.f32 %v4626_v0, %v2095_v27 }
 0x278   : > { %v2245_v56 = vpop.f32.mrf.mxu1 }
 0x279   : > { %v2243_v8 = vadd.f32 %v2242_v24, %v2169_v16 }
 0x27b   : > { %v2317_v63 = vadd.f32 %v2316_v15, %v2243_v8 }
 0x27c   : > { %v2097_v28 = vpop.f32.mrf.mxu3 }
 0x27d   : > { %2370 = vst.msk [vmem:[%s4655_s20 + $0x10] sm:$0xff] %vm2367_vm9, %v2317_v63  ;;  %v2098_v47 = vadd.f32 %v2097_v28, %v4378_v54  ;;  %v2319_v39 = vpop.f32.mrf.mxu2 }
 0x27e   : > { %v2183_v25 = vpop.f32.mrf.mxu0 }
 0x27f   : > { %v2172_v48 = vadd.f32 %v2171_v46, %v2098_v47 }
 0x280   : > { %v2248_v21 = vpop.f32.mrf.mxu1 }
 0x281   : > { %v2246_v31 = vadd.f32 %v2245_v56, %v2172_v48 }
 0x283   : > { %v2320_v11 = vadd.f32 %v2319_v39, %v2246_v31 }
 0x284   : > { %v2100_v20 = vpop.f32.mrf.mxu3 }
 0x285   : > { %2371 = vst.msk [vmem:[%s4655_s20 + $0x18] sm:$0xff] %vm2367_vm9, %v2320_v11  ;;  %v2101_v0 = vadd.f32 %v2100_v20, %v4396_v49  ;;  %v2322_v51 = vpop.f32.mrf.mxu2 }
 0x286   : > { %v2186_v13 = vpop.f32.mrf.mxu0 }
 0x287   : > { %v2175_v36 = vadd.f32 %v2174_v55, %v2101_v0 }
 0x288   : > { %v2251_v26 = vpop.f32.mrf.mxu1 }
 0x289   : > { %v2249_v7 = vadd.f32 %v2248_v21, %v2175_v36 }
 0x28b   : > { %v2323_v37 = vadd.f32 %v2322_v51, %v2249_v7 }
 0x28c   : > { %v2103_v33 = vpop.f32.mrf.mxu3 }
 0x28d   : > { %2372 = vst.msk [vmem:[%s4655_s20 + $0x20] sm:$0xff] %vm2367_vm9, %v2323_v37  ;;  %v2104_v54 = vadd.f32 %v2103_v33, %v4414_v59  ;;  %v2325_v46 = vpop.f32.mrf.mxu2 }
 0x28e   : > { %v2189_v52 = vpop.f32.mrf.mxu0 }
 0x28f   : > { %v2178_v4 = vadd.f32 %v2177_v43, %v2104_v54 }
 0x290   : > { %v2254_v9 = vpop.f32.mrf.mxu1 }
 0x291   : > { %v2252_v34 = vadd.f32 %v2251_v26, %v2178_v4 }
 0x293   : > { %v2326_v3 = vadd.f32 %v2325_v46, %v2252_v34 }
 0x294   : > { %v2106_v49 = vpop.f32.mrf.mxu3 }
 0x295   : > { %2373 = vst.msk [vmem:[%s4655_s20 + $0x28] sm:$0xff] %vm2367_vm9, %v2326_v3  ;;  %v2107_v55 = vadd.f32 %v2106_v49, %v4432_v12  ;;  %v2328_v17 = vpop.f32.mrf.mxu2 }
 0x296   : > { %v2192_v12 = vpop.f32.mrf.mxu0 }
 0x297   : > { %v2181_v62 = vadd.f32 %v2180_v35, %v2107_v55 }
 0x298   : > { %v2257_v10 = vpop.f32.mrf.mxu1 }
 0x299   : > { %v2255_v58 = vadd.f32 %v2254_v9, %v2181_v62 }
 0x29b   : > { %v2329_v44 = vadd.f32 %v2328_v17, %v2255_v58 }
 0x29c   : > { %v2109_v59 = vpop.f32.mrf.mxu3 }
 0x29d   : > { %2374 = vst.msk [vmem:[%s4655_s20 + $0x30] sm:$0xff] %vm2367_vm9, %v2329_v44  ;;  %v2110_v23 = vadd.f32 %v2109_v59, %v4450_v30  ;;  %v2331_v38 = vpop.f32.mrf.mxu2 }
 0x29e   : > { %v2195_v56 = vpop.f32.mrf.mxu0 }
 0x29f   : > { %v2184_v1 = vadd.f32 %v2183_v25, %v2110_v23 }
 0x2a0   : > { %v2260_v42 = vpop.f32.mrf.mxu1 }
 0x2a1   : > { %v2258_v50 = vadd.f32 %v2257_v10, %v2184_v1 }
 0x2a3   : > { %v2332_v40 = vadd.f32 %v2331_v38, %v2258_v50 }
 0x2a4   : > { %v2112_v41 = vpop.f32.mrf.mxu3 }
 0x2a5   : > { %2375 = vst.msk [vmem:[%s4655_s20 + $0x38] sm:$0xff] %vm2367_vm9, %v2332_v40  ;;  %v2113_v24 = vadd.f32 %v2112_v41, %v4468_v2  ;;  %v2334_v60 = vpop.f32.mrf.mxu2 }
 0x2a6   : > { %v2198_v31 = vpop.f32.mrf.mxu0 }
 0x2a7   : > { %v2187_v43 = vadd.f32 %v2186_v13, %v2113_v24 }
 0x2a8   : > { %v2263_v29 = vpop.f32.mrf.mxu1 }
 0x2a9   : > { %v2261_v61 = vadd.f32 %v2260_v42, %v2187_v43 }
 0x2ab   : > { %v2335_v27 = vadd.f32 %v2334_v60, %v2261_v61 }
 0x2ac   : > { %v2115_v15 = vpop.f32.mrf.mxu3 }
 0x2ad   : > { %2376 = vst.msk [vmem:[%s4655_s20 + $0x40] sm:$0xff] %vm2367_vm9, %v2335_v27  ;;  %v2116_v30 = vadd.f32 %v2115_v15, %v4486_v22  ;;  %v2337_v16 = vpop.f32.mrf.mxu2 }
 0x2ae   : > { %v2201_v7 = vpop.f32.mrf.mxu0 }
 0x2af   : > { %v2190_v8 = vadd.f32 %v2189_v52, %v2116_v30 }
 0x2b0   : > { %v2266_v63 = vpop.f32.mrf.mxu1 }
 0x2b1   : > { %v2264_v28 = vadd.f32 %v2263_v29, %v2190_v8 }
 0x2b3   : > { %v2338_v35 = vadd.f32 %v2337_v16, %v2264_v28 }
 0x2b4   : > { %v2118_v47 = vpop.f32.mrf.mxu3 }
 0x2b5   : > { %2377 = vst.msk [vmem:[%s4655_s20 + $0x48] sm:$0xff] %vm2367_vm9, %v2338_v35  ;;  %v2119_v2 = vadd.f32 %v2118_v47, %v4504_v6  ;;  %v2340_v39 = vpop.f32.mrf.mxu2 }
 0x2b7   : > { %v2193_v48 = vadd.f32 %v2192_v12, %v2119_v2 }
 0x2b8   : > { %v2269_v21 = vpop.f32.mrf.mxu1 }
 0x2b9   : > { %v2267_v11 = vadd.f32 %v2266_v63, %v2193_v48 }
 0x2bb   : > { %v2341_v20 = vadd.f32 %v2340_v39, %v2267_v11 }
 0x2bc   : > { %v2121_v22 = vpop.f32.mrf.mxu3 }
 0x2bd   : > { %2378 = vst.msk [vmem:[%s4655_s20 + $0x50] sm:$0xff] %vm2367_vm9, %v2341_v20  ;;  %v2122_v0 = vadd.f32 %v2121_v22, %v4522_v57  ;;  %v2343_v51 = vpop.f32.mrf.mxu2  ;;  %v2204_v57 = vpop.f32.mrf.mxu0 }
 0x2bf   : > { %v2196_v25 = vadd.f32 %v2195_v56, %v2122_v0 }
 0x2c0   : > { %v2272_v36 = vpop.f32.mrf.mxu1 }
 0x2c1   : > { %v2270_v26 = vadd.f32 %v2269_v21, %v2196_v25 }
 0x2c3   : > { %v2344_v37 = vadd.f32 %v2343_v51, %v2270_v26 }
 0x2c4   : > { %v2124_v6 = vpop.f32.mrf.mxu3 }
 0x2c5   : > { %2379 = vst.msk [vmem:[%s4655_s20 + $0x58] sm:$0xff] %vm2367_vm9, %v2344_v37  ;;  %v2125_v33 = vadd.f32 %v2124_v6, %v4540_v14  ;;  %v2346_v54 = vpop.f32.mrf.mxu2  ;;  %v2207_v44 = vpop.f32.mrf.mxu0 }
 0x2c7   : > { %v2199_v46 = vadd.f32 %v2198_v31, %v2125_v33 }
 0x2c8   : > { %v2275_v4 = vpop.f32.mrf.mxu1 }
 0x2c9   : > { %v2273_v9 = vadd.f32 %v2272_v36, %v2199_v46 }
 0x2cb   : > { %v2347_v13 = vadd.f32 %v2346_v54, %v2273_v9 }
 0x2cc   : > { %v2127_v34 = vpop.f32.mrf.mxu3 }
 0x2cd   : > { %2380 = vst.msk [vmem:[%s4655_s20 + $0x60] sm:$0xff] %vm2367_vm9, %v2347_v13  ;;  %v2128_v3 = vadd.f32 %v2127_v34, %v4558_v32  ;;  %v2349_v49 = vpop.f32.mrf.mxu2  ;;  %v2210_v41 = vpop.f32.mrf.mxu0 }
 0x2cf   : > { %v2202_v55 = vadd.f32 %v2201_v7, %v2128_v3 }
 0x2d0   : > { %v2278_v17 = vpop.f32.mrf.mxu1 }
 0x2d1   : > { %v2276_v62 = vadd.f32 %v2275_v4, %v2202_v55 }
 0x2d3   : > { %v2350_v10 = vadd.f32 %v2349_v49, %v2276_v62 }
 0x2d4   : > { %v2130_v58 = vpop.f32.mrf.mxu3 }
 0x2d5   : > { %2381 = vst.msk [vmem:[%s4655_s20 + $0x68] sm:$0xff] %vm2367_vm9, %v2350_v10  ;;  %v2131_v14 = vadd.f32 %v2130_v58, %v4576_v53  ;;  %v2352_v52 = vpop.f32.mrf.mxu2  ;;  %v2213_v15 = vpop.f32.mrf.mxu0 }
 0x2d7   : > { %v2205_v59 = vadd.f32 %v2204_v57, %v2131_v14 }
 0x2d8   : > { %v2281_v23 = vpop.f32.mrf.mxu1 }
 0x2d9   : > { %v2279_v38 = vadd.f32 %v2278_v17, %v2205_v59 }
 0x2db   : > { %v2353_v1 = vadd.f32 %v2352_v52, %v2279_v38 }
 0x2dc   : > { %v2133_v42 = vpop.f32.mrf.mxu3 }
 0x2dd   : > { %2382 = vst.msk [vmem:[%s4655_s20 + $0x70] sm:$0xff] %vm2367_vm9, %v2353_v1  ;;  %v2134_v32 = vadd.f32 %v2133_v42, %v4594_v45  ;;  %v2355_v50 = vpop.f32.mrf.mxu2  ;;  %v2216_v2 = vpop.f32.mrf.mxu0 }
 0x2df   : > { %v2208_v40 = vadd.f32 %v2207_v44, %v2134_v32 }
 0x2e0   : > { %v2284_v24 = vpop.f32.mrf.mxu1 }
 0x2e1   : > { %v2282_v12 = vadd.f32 %v2281_v23, %v2208_v40 }
 0x2e3   : > { %v2356_v60 = vadd.f32 %v2355_v50, %v2282_v12 }
 0x2e4   : > { %v2136_v53 = vpop.f32.mrf.mxu3 }
 0x2e5   : > { %2383 = vst.msk [vmem:[%s4655_s20 + $0x78] sm:$0xff] %vm2367_vm9, %v2356_v60  ;;  %v2137_v43 = vadd.f32 %v2136_v53, %v4612_v19  ;;  %v2358_v29 = vpop.f32.mrf.mxu2 }
 0x2e7   : > { %v2211_v61 = vadd.f32 %v2210_v41, %v2137_v43 }
 0x2e8   : > { %v2287_v45 = vpop.f32.mrf.mxu1 }
 0x2e9   : > { %v2285_v27 = vadd.f32 %v2284_v24, %v2211_v61 }
 0x2eb   : > { %v2359_v30 = vadd.f32 %v2358_v29, %v2285_v27 }
 0x2ec   : > { %v2139_v16 = vpop.f32.mrf.mxu3 }
 0x2ed   : > { %2384 = vst.msk [vmem:[%s4655_s20 + $0x80] sm:$0xff] %vm2367_vm9, %v2359_v30  ;;  %v2140_v56 = vadd.f32 %v2139_v16, %v4630_v18  ;;  %v2361_v8 = vpop.f32.mrf.mxu2 }
 0x2ef   : > { %v2214_v63 = vadd.f32 %v2213_v15, %v2140_v56 }
 0x2f0   : > { %v2290_v39 = vpop.f32.mrf.mxu1 }
 0x2f1   : > { %v2288_v28 = vadd.f32 %v2287_v45, %v2214_v63 }
 0x2f3   : > { %v2362_v35 = vadd.f32 %v2361_v8, %v2288_v28 }
 0x2f4   : > { %v2142_v47 = vpop.f32.mrf.mxu3 }
 0x2f5   : > { %2385 = vst.msk [vmem:[%s4655_s20 + $0x88] sm:$0xff] %vm2367_vm9, %v2362_v35  ;;  %v2143_v19 = vadd.f32 %v2142_v47, %v4641_v5  ;;  %v2364_v21 = vpop.f32.mrf.mxu2 }
 0x2f7   : > { %v2217_v48 = vadd.f32 %v2216_v2, %v2143_v19 }
 0x2f9   : > { %v2291_v31 = vadd.f32 %v2290_v39, %v2217_v48 }
 0x2fb   : > { %v2365_v11 = vadd.f32 %v2364_v21, %v2291_v31 }
 0x2fd   : > { %2386 = vst.msk [vmem:[%s4655_s20 + $0x90] sm:$0xff] %vm2367_vm9, %v2365_v11 }
 0x2fe PF: > { %s13_s12 = sadd.s32 1, %s2567_s12  }
 0x2ff   : > { %p10_p4 = scmp.ge.s32.totalorder %s13_s12, 4  }
 0x301   :  { %12 = sbr.rel (!%p10_p4) target bundleno = 1 (0x1), region = 62 }

</bundles_post_ra>
